<compile_context>
chip_gen: v7x
topology: tpu7x:2x2x1
jax: 0.10.0
libtpu: 0.0.40
codegen_flags: <defaults>
</compile_context>

<pallas_src>
import functools

import jax
import jax.numpy as jnp
from jax.experimental import pallas as pl
from jax.experimental.pallas import tpu as pltpu

EPS = 1e-5
VMEM_LIMIT_BYTES = 32 * 1024 * 1024   # explicit budget: > v5e's 16 MiB default,
                                      # == v6e/v7x scoped default, << physical.


def _round_up(x, m):
    return (x + m - 1) // m * m


# --------------------------------------------------------------------------
# Pass A kernel: per-image conv as a sum of per-tap GEMMs + partial BN stats
# --------------------------------------------------------------------------
def _conv_bn_stats_kernel(*refs, n_phases, taps, out_hw):
    """refs = (phase_0..phase_{P-1}, w_taps, y_out, stats_out).

    Each phase ref holds one (1, Hph, Wph, Cin) padded/phase-decomposed image
    slab; `taps` maps every kernel tap (dy, dx) to (phase_index, row_off,
    col_off) so every read below is a contiguous static slice.
    """
    ph_refs = refs[:n_phases]
    w_ref, y_ref, stats_ref = refs[n_phases:]
    ho, wo = out_hw

    acc = None
    for t, (p, oy, ox) in enumerate(taps):
        xs = ph_refs[p][0, oy:oy + ho, ox:ox + wo, :]          # (ho, wo, Cin) bf16
        xs = xs.reshape(ho * wo, xs.shape[-1])                 # (M, Cin)
        part = jnp.dot(xs, w_ref[t], preferred_element_type=jnp.float32)
        acc = part if acc is None else acc + part              # (M, ncols) f32

    y_ref[0] = acc.astype(y_ref.dtype)
    # Partial per-channel statistics for this image (f32), two explicit rows.
    stats_ref[0, 0:1, :] = jnp.sum(acc, axis=0, keepdims=True)
    stats_ref[0, 1:2, :] = jnp.sum(acc * acc, axis=0, keepdims=True)


def conv_bn_stats(phases, w_taps, taps, out_hw, out_dtype=jnp.bfloat16):
    """phases: list of (N, Hph, Wph, Cin) bf16; w_taps: (ntaps, Cin, ncols) bf16.

    Returns y: (N, M, ncols) out_dtype (pre-BN conv output, M = Ho*Wo) and
    stats: (N, 2, ncols) f32 with per-image (sum, sum of squares).
    """
    n = phases[0].shape[0]
    ho, wo = out_hw
    m = ho * wo
    ntaps, cin, ncols = w_taps.shape

    in_specs = []
    for ph in phases:
        blk = (1,) + ph.shape[1:]
        in_specs.append(pl.BlockSpec(blk, lambda i: (i, 0, 0, 0)))
    # Per-tap weights: resident (constant index_map), small (ntaps*Cin*ncols).
    in_specs.append(pl.BlockSpec((ntaps, cin, ncols), lambda i: (0, 0, 0)))

    kernel = functools.partial(_conv_bn_stats_kernel, n_phases=len(phases),
                               taps=taps, out_hw=out_hw)
    y, stats = pl.pallas_call(
        kernel,
        grid=(n,),
        in_specs=in_specs,
        out_specs=[pl.BlockSpec((1, m, ncols), lambda i: (i, 0, 0)),
                   pl.BlockSpec((1, 2, ncols), lambda i: (i, 0, 0))],
        out_shape=[jax.ShapeDtypeStruct((n, m, ncols), out_dtype),
                   jax.ShapeDtypeStruct((n, 2, ncols), jnp.float32)],
        compiler_params=pltpu.CompilerParams(
            dimension_semantics=("parallel",),
            vmem_limit_bytes=VMEM_LIMIT_BYTES),
    )(*phases, w_taps)
    return y, stats


# --------------------------------------------------------------------------
# Pass B kernel: normalize (+ normalized residual) (+ ReLU), elementwise
# --------------------------------------------------------------------------
def _bn_act_kernel(*refs, relu, add_residual):
    if add_residual:
        y_ref, sc_ref, sh_ref, r_ref, rsc_ref, rsh_ref, o_ref = refs
    else:
        y_ref, sc_ref, sh_ref, o_ref = refs

    out = y_ref[0].astype(jnp.float32) * sc_ref[0] + sh_ref[0]
    if add_residual:
        out = out + (r_ref[0].astype(jnp.float32) * rsc_ref[0] + rsh_ref[0])
    if relu:
        out = jnp.maximum(out, 0.0)
    o_ref[0] = out.astype(o_ref.dtype)


def bn_act(y, scale, shift, *, relu, col_block=0, residual=None,
           res_scale=None, res_shift=None, res_col_block=0,
           out_dtype=jnp.bfloat16):
    """Normalize a (1, M, cp)-wide column block of y; optionally add a
    normalized residual read from another column block (no HBM copies)."""
    n, m, _ = y.shape
    cp = scale.shape[0]
    add_res = residual is not None

    in_specs = [pl.BlockSpec((1, m, cp), lambda i: (i, 0, col_block)),
                pl.BlockSpec((1, 1, cp), lambda i: (0, 0, 0)),
                pl.BlockSpec((1, 1, cp), lambda i: (0, 0, 0))]
    inputs = [y, scale.reshape(1, 1, cp), shift.reshape(1, 1, cp)]
    if add_res:
        in_specs += [pl.BlockSpec((1, m, cp), lambda i: (i, 0, res_col_block)),
                     pl.BlockSpec((1, 1, cp), lambda i: (0, 0, 0)),
                     pl.BlockSpec((1, 1, cp), lambda i: (0, 0, 0))]
        inputs += [residual, res_scale.reshape(1, 1, cp),
                   res_shift.reshape(1, 1, cp)]

    kernel = functools.partial(_bn_act_kernel, relu=relu, add_residual=add_res)
    return pl.pallas_call(
        kernel,
        grid=(n,),
        in_specs=in_specs,
        out_specs=pl.BlockSpec((1, m, cp), lambda i: (i, 0, 0)),
        out_shape=jax.ShapeDtypeStruct((n, m, cp), out_dtype),
        compiler_params=pltpu.CompilerParams(
            dimension_semantics=("parallel",),
            vmem_limit_bytes=VMEM_LIMIT_BYTES),
    )(*inputs)


# --------------------------------------------------------------------------
# Wrapper-side helpers (tiny tensors only)
# --------------------------------------------------------------------------
def make_phases(x_nhwc, k, stride, pad):
    """Pad spatially and split into stride^2 phases so each kernel tap reads a
    contiguous slice.  Total phase bytes == padded-input bytes (no expansion)."""
    xp = jnp.pad(x_nhwc, ((0, 0), (pad, pad), (pad, pad), (0, 0))) if pad else x_nhwc
    s = stride
    if s == 1:
        phases = [xp]
        taps = [(0, dy, dx) for dy in range(k) for dx in range(k)]
    else:
        phases, idx = [], {}
        for py in range(s):
            for px in range(s):
                idx[(py, px)] = len(phases)
                phases.append(xp[:, py::s, px::s, :])
        taps = [(idx[(dy % s, dx % s)], dy // s, dx // s)
                for dy in range(k) for dx in range(k)]
    return phases, taps


def _conv_w_to_taps(w_oihw):
    # PyTorch conv weight [Cout, Cin, kh, kw] -> [kh*kw, Cin, Cout]
    cout, cin, kh, kw = w_oihw.shape
    return jnp.transpose(w_oihw, (2, 3, 1, 0)).reshape(kh * kw, cin, cout)


def _pad_vec(v, n):
    # Pad gamma/beta with zeros: padded output channels get scale = 0, so they
    # are forced to exactly 0 (never amplified by 1/sqrt(eps)).
    return jnp.pad(v.astype(jnp.float32), (0, n - v.shape[0]))


def bn_coeffs(stats, count, gamma_p, beta_p):
    ssum = jnp.sum(stats[:, 0, :], axis=0)
    ssq = jnp.sum(stats[:, 1, :], axis=0)
    mean = ssum / count
    # f32 E[x^2]-E[x]^2 with a clamp; activations here are O(1).
    # TODO(synk): switch to a two-pass / Welford reduction if activations can be large.
    var = jnp.maximum(ssq / count - mean * mean, 0.0)
    scale = gamma_p * jax.lax.rsqrt(var + EPS)
    shift = beta_p - mean * scale
    return scale, shift


# --------------------------------------------------------------------------
# BasicBlock forward (NCHW in / NCHW out, training-mode BatchNorm)
# --------------------------------------------------------------------------
def basic_block_forward(x_nchw, params, stride):
    x = jnp.transpose(x_nchw, (0, 2, 3, 1)).astype(jnp.bfloat16)   # NCHW -> NHWC
    n, h, w, cin = x.shape
    cout = params["conv1_w"].shape[0]
    has_proj = (stride != 1) or (cin != cout)
    cp = _round_up(cout, 128)                                      # lane-dense columns

    ho = (h + 2 - 3) // stride + 1
    wo = (w + 2 - 3) // stride + 1
    m = ho * wo

    # ---- stage 1: conv1 (3x3/stride, pad 1), 1x1 shortcut fused as extra columns ----
    ncols1 = 2 * cp if has_proj else cp
    w1 = jnp.zeros((9, cin, ncols1), jnp.float32)
    w1 = w1.at[:, :, :cout].set(_conv_w_to_taps(params["conv1_w"]))
    if has_proj:
        # The 1x1 projection's input is exactly conv1's centre tap (dy=dx=1).
        w1 = w1.at[4, :, cp:cp + cout].set(_conv_w_to_taps(params["convs_w"])[0])
    w1 = w1.astype(jnp.bfloat16)

    phases1, taps1 = make_phases(x, 3, stride, 1)
    y1, st1 = conv_bn_stats(phases1, w1, taps1, (ho, wo))

    g1 = _pad_vec(params["bn1_g"], cp)
    b1 = _pad_vec(params["bn1_b"], cp)
    if has_proj:
        g1 = jnp.concatenate([g1, _pad_vec(params["bns_g"], cp)])
        b1 = jnp.concatenate([b1, _pad_vec(params["bns_b"], cp)])
    scale1, shift1 = bn_coeffs(st1, n * m, g1, b1)

    # bn1 + ReLU on conv1's columns only; shortcut columns stay pre-BN and are
    # normalized inside the final fused kernel.
    out1 = bn_act(y1, scale1[:cp], shift1[:cp], relu=True, col_block=0)

    # ---- stage 2: conv2 (3x3/1, pad 1) -> bn2 -> + shortcut -> ReLU ----
    w2 = jnp.zeros((9, cp, cp), jnp.float32)
    w2 = w2.at[:, :cout, :cout].set(_conv_w_to_taps(params["conv2_w"]))
    w2 = w2.astype(jnp.bfloat16)

    phases2, taps2 = make_phases(out1.reshape(n, ho, wo, cp), 3, 1, 1)
    y2, st2 = conv_bn_stats(phases2, w2, taps2, (ho, wo))
    scale2, shift2 = bn_coeffs(st2, n * m, _pad_vec(params["bn2_g"], cp),
                               _pad_vec(params["bn2_b"], cp))

    if has_proj:
        res, res_col = y1, 1                           # pre-BN projection columns
        rscale, rshift = scale1[cp:], shift1[cp:]
    else:
        res = jnp.pad(x, ((0, 0), (0, 0), (0, 0), (0, cp - cin))).reshape(n, m, cp)
        res_col = 0
        rscale = jnp.ones((cp,), jnp.float32)
        rshift = jnp.zeros((cp,), jnp.float32)

    out = bn_act(y2, scale2, shift2, relu=True,
                 residual=res, res_scale=rscale, res_shift=rshift,
                 res_col_block=res_col, out_dtype=jnp.bfloat16)

    out = out.reshape(n, ho, wo, cp)[..., :cout]
    # bf16 store in the kernel; the f32 upcast fuses with this NCHW transpose.
    return jnp.transpose(out, (0, 3, 1, 2)).astype(jnp.float32)


# --------------------------------------------------------------------------
# Pure-JAX f32 reference (true module semantics, for correctness check)
# --------------------------------------------------------------------------
def reference_forward(x, params, stride):
    def conv(x, w, s, pad):
        return jax.lax.conv_general_dilated(
            x, w, (s, s), [(pad, pad), (pad, pad)],
            dimension_numbers=("NCHW", "OIHW", "NCHW"),
            precision=jax.lax.Precision.HIGHEST)

    def bn(x, g, b):
        mean = jnp.mean(x, axis=(0, 2, 3), keepdims=True)
        var = jnp.mean(jnp.square(x - mean), axis=(0, 2, 3), keepdims=True)
        return ((x - mean) * jax.lax.rsqrt(var + EPS)
                * g.reshape(1, -1, 1, 1) + b.reshape(1, -1, 1, 1))

    cin = x.shape[1]
    cout = params["conv1_w"].shape[0]
    out = jax.nn.relu(bn(conv(x, params["conv1_w"], stride, 1),
                         params["bn1_g"], params["bn1_b"]))
    out = bn(conv(out, params["conv2_w"], 1, 1),
             params["bn2_g"], params["bn2_b"])
    if stride != 1 or cin != cout:
        sc = bn(conv(x, params["convs_w"], stride, 0),
                params["bns_g"], params["bns_b"])
    else:
        sc = x
    return jax.nn.relu(out + sc)


# --------------------------------------------------------------------------
def make_params(key, in_channels, out_channels, stride):
    ks = jax.random.split(key, 3)
    params = {
        "conv1_w": 0.1 * jax.random.normal(ks[0], (out_channels, in_channels, 3, 3), jnp.float32),
        "conv2_w": 0.1 * jax.random.normal(ks[1], (out_channels, out_channels, 3, 3), jnp.float32),
        "bn1_g": jnp.ones((out_channels,), jnp.float32),
        "bn1_b": jnp.zeros((out_channels,), jnp.float32),
        "bn2_g": jnp.ones((out_channels,), jnp.float32),
        "bn2_b": jnp.zeros((out_channels,), jnp.float32),
    }
    if stride != 1 or in_channels != out_channels:
        params["convs_w"] = 0.1 * jax.random.normal(
            ks[2], (out_channels, in_channels, 1, 1), jnp.float32)
        params["bns_g"] = jnp.ones((out_channels,), jnp.float32)
        params["bns_b"] = jnp.zeros((out_channels,), jnp.float32)
    return params


if __name__ == "__main__":
    key = jax.random.PRNGKey(0)
    kx, kp = jax.random.split(key)

    in_channels, out_channels, stride = 4, 8, 2
    x = jax.random.normal(kx, (2, in_channels, 16, 16), jnp.float32)   # NCHW
    params = make_params(kp, in_channels, out_channels, stride)

    fwd = jax.jit(functools.partial(basic_block_forward, stride=stride))
    out = jax.block_until_ready(fwd(x, params))

    ref = jax.block_until_ready(reference_forward(x, params, stride))
    assert out.shape == ref.shape, (out.shape, ref.shape)
    # bf16 MXU inputs / bf16 intermediates vs. the f32-HIGHEST reference:
    # correspondingly loosened tolerance.
    err = float(jnp.max(jnp.abs(out - ref)))
    assert jnp.allclose(out, ref, rtol=5e-2, atol=5e-2), err

    print("KERNEL_OK")
</pallas_src>

<mosaic_0001>
module attributes {stable_mosaic.version = 11 : i64} {
  func.func @_conv_bn_stats_kernel(%arg0: i32, %arg1: memref<1x9x9x4xbf16, #tpu.memory_space<vmem>>, %arg2: memref<1x9x9x4xbf16, #tpu.memory_space<vmem>>, %arg3: memref<1x9x9x4xbf16, #tpu.memory_space<vmem>>, %arg4: memref<1x9x9x4xbf16, #tpu.memory_space<vmem>>, %arg5: memref<9x4x256xbf16, #tpu.memory_space<vmem>>, %arg6: memref<1x64x256xbf16, #tpu.memory_space<vmem>>, %arg7: memref<1x2x256xf32, #tpu.memory_space<vmem>>) attributes {dimension_semantics = [#tpu.dimension_semantics<parallel>], iteration_bounds = array<i64: 2>, scalar_prefetch = 0 : i64, scratch_operands = 0 : i64, tpu.core_type = #tpu.core_type<tc>, window_params = [{transform_indices = @transform_0, window_bounds = array<i64: 1, 9, 9, 4>}, {transform_indices = @transform_1, window_bounds = array<i64: 1, 9, 9, 4>}, {transform_indices = @transform_2, window_bounds = array<i64: 1, 9, 9, 4>}, {transform_indices = @transform_3, window_bounds = array<i64: 1, 9, 9, 4>}, {pipeline_mode = #tpu.pipeline_mode<synchronous>, transform_indices = @transform_4, window_bounds = array<i64: 9, 4, 256>}, {transform_indices = @transform_5, window_bounds = array<i64: 1, 64, 256>}, {transform_indices = @transform_6, window_bounds = array<i64: 1, 2, 256>}]} {
    %c0 = arith.constant 0 : index
    %c0_0 = arith.constant 0 : index
    %c0_1 = arith.constant 0 : index
    %c0_2 = arith.constant 0 : index
    %0 = vector.load %arg1[%c0, %c0_0, %c0_1, %c0_2] : memref<1x9x9x4xbf16, #tpu.memory_space<vmem>>, vector<1x8x8x4xbf16>
    %1 = vector.shape_cast %0 : vector<1x8x8x4xbf16> to vector<8x8x4xbf16>
    %2 = vector.shape_cast %1 : vector<8x8x4xbf16> to vector<64x4xbf16>
    %c0_3 = arith.constant 0 : index
    %c0_4 = arith.constant 0 : index
    %c0_5 = arith.constant 0 : index
    %3 = vector.load %arg5[%c0_3, %c0_4, %c0_5] : memref<9x4x256xbf16, #tpu.memory_space<vmem>>, vector<1x4x256xbf16>
    %4 = vector.shape_cast %3 : vector<1x4x256xbf16> to vector<4x256xbf16>
    %cst = arith.constant dense<0.000000e+00> : vector<64x256xf32>
    %5 = tpu.matmul %2, %4, %cst {dimension_numbers = #tpu.dot_dimension_numbers<[1], [0], [0], [1], [0, 0, 1, 1], [], []>} : vector<64x4xbf16>, vector<4x256xbf16>, vector<64x256xf32> -> vector<64x256xf32>
    %c0_6 = arith.constant 0 : index
    %c0_7 = arith.constant 0 : index
    %c0_8 = arith.constant 0 : index
    %c0_9 = arith.constant 0 : index
    %6 = vector.load %arg2[%c0_6, %c0_7, %c0_8, %c0_9] : memref<1x9x9x4xbf16, #tpu.memory_space<vmem>>, vector<1x8x8x4xbf16>
    %7 = vector.shape_cast %6 : vector<1x8x8x4xbf16> to vector<8x8x4xbf16>
    %8 = vector.shape_cast %7 : vector<8x8x4xbf16> to vector<64x4xbf16>
    %c1 = arith.constant 1 : index
    %c0_10 = arith.constant 0 : index
    %c0_11 = arith.constant 0 : index
    %9 = vector.load %arg5[%c1, %c0_10, %c0_11] : memref<9x4x256xbf16, #tpu.memory_space<vmem>>, vector<1x4x256xbf16>
    %10 = vector.shape_cast %9 : vector<1x4x256xbf16> to vector<4x256xbf16>
    %cst_12 = arith.constant dense<0.000000e+00> : vector<64x256xf32>
    %11 = tpu.matmul %8, %10, %cst_12 {dimension_numbers = #tpu.dot_dimension_numbers<[1], [0], [0], [1], [0, 0, 1, 1], [], []>} : vector<64x4xbf16>, vector<4x256xbf16>, vector<64x256xf32> -> vector<64x256xf32>
    %12 = arith.addf %5, %11 : vector<64x256xf32>
    %c0_13 = arith.constant 0 : index
    %c0_14 = arith.constant 0 : index
    %c1_15 = arith.constant 1 : index
    %c0_16 = arith.constant 0 : index
    %13 = vector.load %arg1[%c0_13, %c0_14, %c1_15, %c0_16] : memref<1x9x9x4xbf16, #tpu.memory_space<vmem>>, vector<1x8x8x4xbf16>
    %14 = vector.shape_cast %13 : vector<1x8x8x4xbf16> to vector<8x8x4xbf16>
    %15 = vector.shape_cast %14 : vector<8x8x4xbf16> to vector<64x4xbf16>
    %c2 = arith.constant 2 : index
    %c0_17 = arith.constant 0 : index
    %c0_18 = arith.constant 0 : index
    %16 = vector.load %arg5[%c2, %c0_17, %c0_18] : memref<9x4x256xbf16, #tpu.memory_space<vmem>>, vector<1x4x256xbf16>
    %17 = vector.shape_cast %16 : vector<1x4x256xbf16> to vector<4x256xbf16>
    %cst_19 = arith.constant dense<0.000000e+00> : vector<64x256xf32>
    %18 = tpu.matmul %15, %17, %cst_19 {dimension_numbers = #tpu.dot_dimension_numbers<[1], [0], [0], [1], [0, 0, 1, 1], [], []>} : vector<64x4xbf16>, vector<4x256xbf16>, vector<64x256xf32> -> vector<64x256xf32>
    %19 = arith.addf %12, %18 : vector<64x256xf32>
    %c0_20 = arith.constant 0 : index
    %c0_21 = arith.constant 0 : index
    %c0_22 = arith.constant 0 : index
    %c0_23 = arith.constant 0 : index
    %20 = vector.load %arg3[%c0_20, %c0_21, %c0_22, %c0_23] : memref<1x9x9x4xbf16, #tpu.memory_space<vmem>>, vector<1x8x8x4xbf16>
    %21 = vector.shape_cast %20 : vector<1x8x8x4xbf16> to vector<8x8x4xbf16>
    %22 = vector.shape_cast %21 : vector<8x8x4xbf16> to vector<64x4xbf16>
    %c3 = arith.constant 3 : index
    %c0_24 = arith.constant 0 : index
    %c0_25 = arith.constant 0 : index
    %23 = vector.load %arg5[%c3, %c0_24, %c0_25] : memref<9x4x256xbf16, #tpu.memory_space<vmem>>, vector<1x4x256xbf16>
    %24 = vector.shape_cast %23 : vector<1x4x256xbf16> to vector<4x256xbf16>
    %cst_26 = arith.constant dense<0.000000e+00> : vector<64x256xf32>
    %25 = tpu.matmul %22, %24, %cst_26 {dimension_numbers = #tpu.dot_dimension_numbers<[1], [0], [0], [1], [0, 0, 1, 1], [], []>} : vector<64x4xbf16>, vector<4x256xbf16>, vector<64x256xf32> -> vector<64x256xf32>
    %26 = arith.addf %19, %25 : vector<64x256xf32>
    %c0_27 = arith.constant 0 : index
    %c0_28 = arith.constant 0 : index
    %c0_29 = arith.constant 0 : index
    %c0_30 = arith.constant 0 : index
    %27 = vector.load %arg4[%c0_27, %c0_28, %c0_29, %c0_30] : memref<1x9x9x4xbf16, #tpu.memory_space<vmem>>, vector<1x8x8x4xbf16>
    %28 = vector.shape_cast %27 : vector<1x8x8x4xbf16> to vector<8x8x4xbf16>
    %29 = vector.shape_cast %28 : vector<8x8x4xbf16> to vector<64x4xbf16>
    %c4 = arith.constant 4 : index
    %c0_31 = arith.constant 0 : index
    %c0_32 = arith.constant 0 : index
    %30 = vector.load %arg5[%c4, %c0_31, %c0_32] : memref<9x4x256xbf16, #tpu.memory_space<vmem>>, vector<1x4x256xbf16>
    %31 = vector.shape_cast %30 : vector<1x4x256xbf16> to vector<4x256xbf16>
    %cst_33 = arith.constant dense<0.000000e+00> : vector<64x256xf32>
    %32 = tpu.matmul %29, %31, %cst_33 {dimension_numbers = #tpu.dot_dimension_numbers<[1], [0], [0], [1], [0, 0, 1, 1], [], []>} : vector<64x4xbf16>, vector<4x256xbf16>, vector<64x256xf32> -> vector<64x256xf32>
    %33 = arith.addf %26, %32 : vector<64x256xf32>
    %c0_34 = arith.constant 0 : index
    %c0_35 = arith.constant 0 : index
    %c1_36 = arith.constant 1 : index
    %c0_37 = arith.constant 0 : index
    %34 = vector.load %arg3[%c0_34, %c0_35, %c1_36, %c0_37] : memref<1x9x9x4xbf16, #tpu.memory_space<vmem>>, vector<1x8x8x4xbf16>
    %35 = vector.shape_cast %34 : vector<1x8x8x4xbf16> to vector<8x8x4xbf16>
    %36 = vector.shape_cast %35 : vector<8x8x4xbf16> to vector<64x4xbf16>
    %c5 = arith.constant 5 : index
    %c0_38 = arith.constant 0 : index
    %c0_39 = arith.constant 0 : index
    %37 = vector.load %arg5[%c5, %c0_38, %c0_39] : memref<9x4x256xbf16, #tpu.memory_space<vmem>>, vector<1x4x256xbf16>
    %38 = vector.shape_cast %37 : vector<1x4x256xbf16> to vector<4x256xbf16>
    %cst_40 = arith.constant dense<0.000000e+00> : vector<64x256xf32>
    %39 = tpu.matmul %36, %38, %cst_40 {dimension_numbers = #tpu.dot_dimension_numbers<[1], [0], [0], [1], [0, 0, 1, 1], [], []>} : vector<64x4xbf16>, vector<4x256xbf16>, vector<64x256xf32> -> vector<64x256xf32>
    %40 = arith.addf %33, %39 : vector<64x256xf32>
    %c0_41 = arith.constant 0 : index
    %c1_42 = arith.constant 1 : index
    %c0_43 = arith.constant 0 : index
    %c0_44 = arith.constant 0 : index
    %41 = vector.load %arg1[%c0_41, %c1_42, %c0_43, %c0_44] : memref<1x9x9x4xbf16, #tpu.memory_space<vmem>>, vector<1x8x8x4xbf16>
    %42 = vector.shape_cast %41 : vector<1x8x8x4xbf16> to vector<8x8x4xbf16>
    %43 = vector.shape_cast %42 : vector<8x8x4xbf16> to vector<64x4xbf16>
    %c6 = arith.constant 6 : index
    %c0_45 = arith.constant 0 : index
    %c0_46 = arith.constant 0 : index
    %44 = vector.load %arg5[%c6, %c0_45, %c0_46] : memref<9x4x256xbf16, #tpu.memory_space<vmem>>, vector<1x4x256xbf16>
    %45 = vector.shape_cast %44 : vector<1x4x256xbf16> to vector<4x256xbf16>
    %cst_47 = arith.constant dense<0.000000e+00> : vector<64x256xf32>
    %46 = tpu.matmul %43, %45, %cst_47 {dimension_numbers = #tpu.dot_dimension_numbers<[1], [0], [0], [1], [0, 0, 1, 1], [], []>} : vector<64x4xbf16>, vector<4x256xbf16>, vector<64x256xf32> -> vector<64x256xf32>
    %47 = arith.addf %40, %46 : vector<64x256xf32>
    %c0_48 = arith.constant 0 : index
    %c1_49 = arith.constant 1 : index
    %c0_50 = arith.constant 0 : index
    %c0_51 = arith.constant 0 : index
    %48 = vector.load %arg2[%c0_48, %c1_49, %c0_50, %c0_51] : memref<1x9x9x4xbf16, #tpu.memory_space<vmem>>, vector<1x8x8x4xbf16>
    %49 = vector.shape_cast %48 : vector<1x8x8x4xbf16> to vector<8x8x4xbf16>
    %50 = vector.shape_cast %49 : vector<8x8x4xbf16> to vector<64x4xbf16>
    %c7 = arith.constant 7 : index
    %c0_52 = arith.constant 0 : index
    %c0_53 = arith.constant 0 : index
    %51 = vector.load %arg5[%c7, %c0_52, %c0_53] : memref<9x4x256xbf16, #tpu.memory_space<vmem>>, vector<1x4x256xbf16>
    %52 = vector.shape_cast %51 : vector<1x4x256xbf16> to vector<4x256xbf16>
    %cst_54 = arith.constant dense<0.000000e+00> : vector<64x256xf32>
    %53 = tpu.matmul %50, %52, %cst_54 {dimension_numbers = #tpu.dot_dimension_numbers<[1], [0], [0], [1], [0, 0, 1, 1], [], []>} : vector<64x4xbf16>, vector<4x256xbf16>, vector<64x256xf32> -> vector<64x256xf32>
    %54 = arith.addf %47, %53 : vector<64x256xf32>
    %c0_55 = arith.constant 0 : index
    %c1_56 = arith.constant 1 : index
    %c1_57 = arith.constant 1 : index
    %c0_58 = arith.constant 0 : index
    %55 = vector.load %arg1[%c0_55, %c1_56, %c1_57, %c0_58] : memref<1x9x9x4xbf16, #tpu.memory_space<vmem>>, vector<1x8x8x4xbf16>
    %56 = vector.shape_cast %55 : vector<1x8x8x4xbf16> to vector<8x8x4xbf16>
    %57 = vector.shape_cast %56 : vector<8x8x4xbf16> to vector<64x4xbf16>
    %c8 = arith.constant 8 : index
    %c0_59 = arith.constant 0 : index
    %c0_60 = arith.constant 0 : index
    %58 = vector.load %arg5[%c8, %c0_59, %c0_60] : memref<9x4x256xbf16, #tpu.memory_space<vmem>>, vector<1x4x256xbf16>
    %59 = vector.shape_cast %58 : vector<1x4x256xbf16> to vector<4x256xbf16>
    %cst_61 = arith.constant dense<0.000000e+00> : vector<64x256xf32>
    %60 = tpu.matmul %57, %59, %cst_61 {dimension_numbers = #tpu.dot_dimension_numbers<[1], [0], [0], [1], [0, 0, 1, 1], [], []>} : vector<64x4xbf16>, vector<4x256xbf16>, vector<64x256xf32> -> vector<64x256xf32>
    %61 = arith.addf %54, %60 : vector<64x256xf32>
    %62 = arith.truncf %61 : vector<64x256xf32> to vector<64x256xbf16>
    %c0_62 = arith.constant 0 : index
    %c0_63 = arith.constant 0 : index
    %c0_64 = arith.constant 0 : index
    %63 = vector.load %arg6[%c0_62, %c0_63, %c0_64] : memref<1x64x256xbf16, #tpu.memory_space<vmem>>, vector<1x64x256xbf16>
    %64 = vector.shape_cast %63 : vector<1x64x256xbf16> to vector<64x256xbf16>
    %65 = vector.shape_cast %62 : vector<64x256xbf16> to vector<1x64x256xbf16>
    tpu.vector_store %arg6[%c0_62, %c0_63, %c0_64], %65 {strides = array<i32>} : memref<1x64x256xbf16, #tpu.memory_space<vmem>>, vector<1x64x256xbf16>,
    %cst_65 = arith.constant dense<0.000000e+00> : vector<256xf32>
    %66 = vector.multi_reduction <add>, %61, %cst_65 [0] : vector<64x256xf32> to vector<256xf32>
    %67 = vector.shape_cast %66 : vector<256xf32> to vector<1x256xf32>
    %c0_66 = arith.constant 0 : index
    %c0_67 = arith.constant 0 : index
    %c0_68 = arith.constant 0 : index
    %68 = vector.load %arg7[%c0_66, %c0_67, %c0_68] : memref<1x2x256xf32, #tpu.memory_space<vmem>>, vector<1x1x256xf32>
    %69 = vector.shape_cast %68 : vector<1x1x256xf32> to vector<1x256xf32>
    %70 = vector.shape_cast %67 : vector<1x256xf32> to vector<1x1x256xf32>
    tpu.vector_store %arg7[%c0_66, %c0_67, %c0_68], %70 {strides = array<i32>} : memref<1x2x256xf32, #tpu.memory_space<vmem>>, vector<1x1x256xf32>,
    %71 = arith.mulf %61, %61 : vector<64x256xf32>
    %cst_69 = arith.constant dense<0.000000e+00> : vector<256xf32>
    %72 = vector.multi_reduction <add>, %71, %cst_69 [0] : vector<64x256xf32> to vector<256xf32>
    %73 = vector.shape_cast %72 : vector<256xf32> to vector<1x256xf32>
    %c0_70 = arith.constant 0 : index
    %c1_71 = arith.constant 1 : index
    %c0_72 = arith.constant 0 : index
    %74 = vector.load %arg7[%c0_70, %c1_71, %c0_72] : memref<1x2x256xf32, #tpu.memory_space<vmem>>, vector<1x1x256xf32>
    %75 = vector.shape_cast %74 : vector<1x1x256xf32> to vector<1x256xf32>
    %76 = vector.shape_cast %73 : vector<1x256xf32> to vector<1x1x256xf32>
    tpu.vector_store %arg7[%c0_70, %c1_71, %c0_72], %76 {strides = array<i32>} : memref<1x2x256xf32, #tpu.memory_space<vmem>>, vector<1x1x256xf32>,
    return
  }
  func.func @transform_0(%arg0: i32) -> (i32, i32, i32, i32) {
    %c0_i32 = arith.constant 0 : i32
    %c0_i32_0 = arith.constant 0 : i32
    %c0_i32_1 = arith.constant 0 : i32
    %c0_i32_2 = arith.constant 0 : i32
    return %arg0, %c0_i32, %c0_i32_0, %c0_i32_1 : i32, i32, i32, i32
  }
  func.func @transform_1(%arg0: i32) -> (i32, i32, i32, i32) {
    %c0_i32 = arith.constant 0 : i32
    %c0_i32_0 = arith.constant 0 : i32
    %c0_i32_1 = arith.constant 0 : i32
    %c0_i32_2 = arith.constant 0 : i32
    return %arg0, %c0_i32, %c0_i32_0, %c0_i32_1 : i32, i32, i32, i32
  }
  func.func @transform_2(%arg0: i32) -> (i32, i32, i32, i32) {
    %c0_i32 = arith.constant 0 : i32
    %c0_i32_0 = arith.constant 0 : i32
    %c0_i32_1 = arith.constant 0 : i32
    %c0_i32_2 = arith.constant 0 : i32
    return %arg0, %c0_i32, %c0_i32_0, %c0_i32_1 : i32, i32, i32, i32
  }
  func.func @transform_3(%arg0: i32) -> (i32, i32, i32, i32) {
    %c0_i32 = arith.constant 0 : i32
    %c0_i32_0 = arith.constant 0 : i32
    %c0_i32_1 = arith.constant 0 : i32
    %c0_i32_2 = arith.constant 0 : i32
    return %arg0, %c0_i32, %c0_i32_0, %c0_i32_1 : i32, i32, i32, i32
  }
  func.func @transform_4(%arg0: i32) -> (i32, i32, i32) {
    %c0_i32 = arith.constant 0 : i32
    %c0_i32_0 = arith.constant 0 : i32
    %c0_i32_1 = arith.constant 0 : i32
    %c0_i32_2 = arith.constant 0 : i32
    return %c0_i32, %c0_i32_0, %c0_i32_1 : i32, i32, i32
  }
  func.func @transform_5(%arg0: i32) -> (i32, i32, i32) {
    %c0_i32 = arith.constant 0 : i32
    %c0_i32_0 = arith.constant 0 : i32
    %c0_i32_1 = arith.constant 0 : i32
    return %arg0, %c0_i32, %c0_i32_0 : i32, i32, i32
  }
  func.func @transform_6(%arg0: i32) -> (i32, i32, i32) {
    %c0_i32 = arith.constant 0 : i32
    %c0_i32_0 = arith.constant 0 : i32
    %c0_i32_1 = arith.constant 0 : i32
    return %arg0, %c0_i32, %c0_i32_0 : i32, i32, i32
  }
}

module attributes {stable_mosaic.version = 11 : i64} {
  func.func @_bn_act_kernel(%arg0: i32, %arg1: memref<1x64x128xbf16, #tpu.memory_space<vmem>>, %arg2: memref<1x1x128xf32, #tpu.memory_space<vmem>>, %arg3: memref<1x1x128xf32, #tpu.memory_space<vmem>>, %arg4: memref<1x64x128xbf16, #tpu.memory_space<vmem>>) attributes {dimension_semantics = [#tpu.dimension_semantics<parallel>], iteration_bounds = array<i64: 2>, scalar_prefetch = 0 : i64, scratch_operands = 0 : i64, tpu.core_type = #tpu.core_type<tc>, window_params = [{transform_indices = @transform_0, window_bounds = array<i64: 1, 64, 128>}, {pipeline_mode = #tpu.pipeline_mode<synchronous>, transform_indices = @transform_1, window_bounds = array<i64: 1, 1, 128>}, {pipeline_mode = #tpu.pipeline_mode<synchronous>, transform_indices = @transform_2, window_bounds = array<i64: 1, 1, 128>}, {transform_indices = @transform_3, window_bounds = array<i64: 1, 64, 128>}]} {
    %c0 = arith.constant 0 : index
    %c0_0 = arith.constant 0 : index
    %c0_1 = arith.constant 0 : index
    %0 = vector.load %arg1[%c0, %c0_0, %c0_1] : memref<1x64x128xbf16, #tpu.memory_space<vmem>>, vector<1x64x128xbf16>
    %1 = vector.shape_cast %0 : vector<1x64x128xbf16> to vector<64x128xbf16>
    %2 = arith.extf %1 : vector<64x128xbf16> to vector<64x128xf32>
    %c0_2 = arith.constant 0 : index
    %c0_3 = arith.constant 0 : index
    %c0_4 = arith.constant 0 : index
    %3 = vector.load %arg2[%c0_2, %c0_3, %c0_4] : memref<1x1x128xf32, #tpu.memory_space<vmem>>, vector<1x1x128xf32>
    %4 = vector.shape_cast %3 : vector<1x1x128xf32> to vector<1x128xf32>
    %5 = vector.broadcast %4 : vector<1x128xf32> to vector<64x128xf32>
    %6 = arith.mulf %2, %5 : vector<64x128xf32>
    %c0_5 = arith.constant 0 : index
    %c0_6 = arith.constant 0 : index
    %c0_7 = arith.constant 0 : index
    %7 = vector.load %arg3[%c0_5, %c0_6, %c0_7] : memref<1x1x128xf32, #tpu.memory_space<vmem>>, vector<1x1x128xf32>
    %8 = vector.shape_cast %7 : vector<1x1x128xf32> to vector<1x128xf32>
    %9 = vector.broadcast %8 : vector<1x128xf32> to vector<64x128xf32>
    %10 = arith.addf %6, %9 : vector<64x128xf32>
    %cst = arith.constant 0.000000e+00 : f32
    %11 = vector.broadcast %cst : f32 to vector<64x128xf32>
    %12 = arith.maximumf %10, %11 : vector<64x128xf32>
    %13 = arith.truncf %12 : vector<64x128xf32> to vector<64x128xbf16>
    %c0_8 = arith.constant 0 : index
    %c0_9 = arith.constant 0 : index
    %c0_10 = arith.constant 0 : index
    %14 = vector.load %arg4[%c0_8, %c0_9, %c0_10] : memref<1x64x128xbf16, #tpu.memory_space<vmem>>, vector<1x64x128xbf16>
    %15 = vector.shape_cast %14 : vector<1x64x128xbf16> to vector<64x128xbf16>
    %16 = vector.shape_cast %13 : vector<64x128xbf16> to vector<1x64x128xbf16>
    tpu.vector_store %arg4[%c0_8, %c0_9, %c0_10], %16 {strides = array<i32>} : memref<1x64x128xbf16, #tpu.memory_space<vmem>>, vector<1x64x128xbf16>,
    return
  }
  func.func @transform_0(%arg0: i32) -> (i32, i32, i32) {
    %c0_i32 = arith.constant 0 : i32
    %c0_i32_0 = arith.constant 0 : i32
    %c0_i32_1 = arith.constant 0 : i32
    return %arg0, %c0_i32, %c0_i32_0 : i32, i32, i32
  }
  func.func @transform_1(%arg0: i32) -> (i32, i32, i32) {
    %c0_i32 = arith.constant 0 : i32
    %c0_i32_0 = arith.constant 0 : i32
    %c0_i32_1 = arith.constant 0 : i32
    %c0_i32_2 = arith.constant 0 : i32
    return %c0_i32, %c0_i32_0, %c0_i32_1 : i32, i32, i32
  }
  func.func @transform_2(%arg0: i32) -> (i32, i32, i32) {
    %c0_i32 = arith.constant 0 : i32
    %c0_i32_0 = arith.constant 0 : i32
    %c0_i32_1 = arith.constant 0 : i32
    %c0_i32_2 = arith.constant 0 : i32
    return %c0_i32, %c0_i32_0, %c0_i32_1 : i32, i32, i32
  }
  func.func @transform_3(%arg0: i32) -> (i32, i32, i32) {
    %c0_i32 = arith.constant 0 : i32
    %c0_i32_0 = arith.constant 0 : i32
    %c0_i32_1 = arith.constant 0 : i32
    return %arg0, %c0_i32, %c0_i32_0 : i32, i32, i32
  }
}

module attributes {stable_mosaic.version = 11 : i64} {
  func.func @_conv_bn_stats_kernel(%arg0: i32, %arg1: memref<1x10x10x128xbf16, #tpu.memory_space<vmem>>, %arg2: memref<9x128x128xbf16, #tpu.memory_space<vmem>>, %arg3: memref<1x64x128xbf16, #tpu.memory_space<vmem>>, %arg4: memref<1x2x128xf32, #tpu.memory_space<vmem>>) attributes {dimension_semantics = [#tpu.dimension_semantics<parallel>], iteration_bounds = array<i64: 2>, scalar_prefetch = 0 : i64, scratch_operands = 0 : i64, tpu.core_type = #tpu.core_type<tc>, window_params = [{transform_indices = @transform_0, window_bounds = array<i64: 1, 10, 10, 128>}, {pipeline_mode = #tpu.pipeline_mode<synchronous>, transform_indices = @transform_1, window_bounds = array<i64: 9, 128, 128>}, {transform_indices = @transform_2, window_bounds = array<i64: 1, 64, 128>}, {transform_indices = @transform_3, window_bounds = array<i64: 1, 2, 128>}]} {
    %c0 = arith.constant 0 : index
    %c0_0 = arith.constant 0 : index
    %c0_1 = arith.constant 0 : index
    %c0_2 = arith.constant 0 : index
    %0 = vector.load %arg1[%c0, %c0_0, %c0_1, %c0_2] : memref<1x10x10x128xbf16, #tpu.memory_space<vmem>>, vector<1x8x8x128xbf16>
    %1 = vector.shape_cast %0 : vector<1x8x8x128xbf16> to vector<8x8x128xbf16>
    %2 = vector.shape_cast %1 : vector<8x8x128xbf16> to vector<64x128xbf16>
    %c0_3 = arith.constant 0 : index
    %c0_4 = arith.constant 0 : index
    %c0_5 = arith.constant 0 : index
    %3 = vector.load %arg2[%c0_3, %c0_4, %c0_5] : memref<9x128x128xbf16, #tpu.memory_space<vmem>>, vector<1x128x128xbf16>
    %4 = vector.shape_cast %3 : vector<1x128x128xbf16> to vector<128x128xbf16>
    %cst = arith.constant dense<0.000000e+00> : vector<64x128xf32>
    %5 = tpu.matmul %2, %4, %cst {dimension_numbers = #tpu.dot_dimension_numbers<[1], [0], [0], [1], [0, 0, 1, 1], [], []>} : vector<64x128xbf16>, vector<128x128xbf16>, vector<64x128xf32> -> vector<64x128xf32>
    %c0_6 = arith.constant 0 : index
    %c0_7 = arith.constant 0 : index
    %c1 = arith.constant 1 : index
    %c0_8 = arith.constant 0 : index
    %6 = vector.load %arg1[%c0_6, %c0_7, %c1, %c0_8] : memref<1x10x10x128xbf16, #tpu.memory_space<vmem>>, vector<1x8x8x128xbf16>
    %7 = vector.shape_cast %6 : vector<1x8x8x128xbf16> to vector<8x8x128xbf16>
    %8 = vector.shape_cast %7 : vector<8x8x128xbf16> to vector<64x128xbf16>
    %c1_9 = arith.constant 1 : index
    %c0_10 = arith.constant 0 : index
    %c0_11 = arith.constant 0 : index
    %9 = vector.load %arg2[%c1_9, %c0_10, %c0_11] : memref<9x128x128xbf16, #tpu.memory_space<vmem>>, vector<1x128x128xbf16>
    %10 = vector.shape_cast %9 : vector<1x128x128xbf16> to vector<128x128xbf16>
    %cst_12 = arith.constant dense<0.000000e+00> : vector<64x128xf32>
    %11 = tpu.matmul %8, %10, %cst_12 {dimension_numbers = #tpu.dot_dimension_numbers<[1], [0], [0], [1], [0, 0, 1, 1], [], []>} : vector<64x128xbf16>, vector<128x128xbf16>, vector<64x128xf32> -> vector<64x128xf32>
    %12 = arith.addf %5, %11 : vector<64x128xf32>
    %c0_13 = arith.constant 0 : index
    %c0_14 = arith.constant 0 : index
    %c2 = arith.constant 2 : index
    %c0_15 = arith.constant 0 : index
    %13 = vector.load %arg1[%c0_13, %c0_14, %c2, %c0_15] : memref<1x10x10x128xbf16, #tpu.memory_space<vmem>>, vector<1x8x8x128xbf16>
    %14 = vector.shape_cast %13 : vector<1x8x8x128xbf16> to vector<8x8x128xbf16>
    %15 = vector.shape_cast %14 : vector<8x8x128xbf16> to vector<64x128xbf16>
    %c2_16 = arith.constant 2 : index
    %c0_17 = arith.constant 0 : index
    %c0_18 = arith.constant 0 : index
    %16 = vector.load %arg2[%c2_16, %c0_17, %c0_18] : memref<9x128x128xbf16, #tpu.memory_space<vmem>>, vector<1x128x128xbf16>
    %17 = vector.shape_cast %16 : vector<1x128x128xbf16> to vector<128x128xbf16>
    %cst_19 = arith.constant dense<0.000000e+00> : vector<64x128xf32>
    %18 = tpu.matmul %15, %17, %cst_19 {dimension_numbers = #tpu.dot_dimension_numbers<[1], [0], [0], [1], [0, 0, 1, 1], [], []>} : vector<64x128xbf16>, vector<128x128xbf16>, vector<64x128xf32> -> vector<64x128xf32>
    %19 = arith.addf %12, %18 : vector<64x128xf32>
    %c0_20 = arith.constant 0 : index
    %c1_21 = arith.constant 1 : index
    %c0_22 = arith.constant 0 : index
    %c0_23 = arith.constant 0 : index
    %20 = vector.load %arg1[%c0_20, %c1_21, %c0_22, %c0_23] : memref<1x10x10x128xbf16, #tpu.memory_space<vmem>>, vector<1x8x8x128xbf16>
    %21 = vector.shape_cast %20 : vector<1x8x8x128xbf16> to vector<8x8x128xbf16>
    %22 = vector.shape_cast %21 : vector<8x8x128xbf16> to vector<64x128xbf16>
    %c3 = arith.constant 3 : index
    %c0_24 = arith.constant 0 : index
    %c0_25 = arith.constant 0 : index
    %23 = vector.load %arg2[%c3, %c0_24, %c0_25] : memref<9x128x128xbf16, #tpu.memory_space<vmem>>, vector<1x128x128xbf16>
    %24 = vector.shape_cast %23 : vector<1x128x128xbf16> to vector<128x128xbf16>
    %cst_26 = arith.constant dense<0.000000e+00> : vector<64x128xf32>
    %25 = tpu.matmul %22, %24, %cst_26 {dimension_numbers = #tpu.dot_dimension_numbers<[1], [0], [0], [1], [0, 0, 1, 1], [], []>} : vector<64x128xbf16>, vector<128x128xbf16>, vector<64x128xf32> -> vector<64x128xf32>
    %26 = arith.addf %19, %25 : vector<64x128xf32>
    %c0_27 = arith.constant 0 : index
    %c1_28 = arith.constant 1 : index
    %c1_29 = arith.constant 1 : index
    %c0_30 = arith.constant 0 : index
    %27 = vector.load %arg1[%c0_27, %c1_28, %c1_29, %c0_30] : memref<1x10x10x128xbf16, #tpu.memory_space<vmem>>, vector<1x8x8x128xbf16>
    %28 = vector.shape_cast %27 : vector<1x8x8x128xbf16> to vector<8x8x128xbf16>
    %29 = vector.shape_cast %28 : vector<8x8x128xbf16> to vector<64x128xbf16>
    %c4 = arith.constant 4 : index
    %c0_31 = arith.constant 0 : index
    %c0_32 = arith.constant 0 : index
    %30 = vector.load %arg2[%c4, %c0_31, %c0_32] : memref<9x128x128xbf16, #tpu.memory_space<vmem>>, vector<1x128x128xbf16>
    %31 = vector.shape_cast %30 : vector<1x128x128xbf16> to vector<128x128xbf16>
    %cst_33 = arith.constant dense<0.000000e+00> : vector<64x128xf32>
    %32 = tpu.matmul %29, %31, %cst_33 {dimension_numbers = #tpu.dot_dimension_numbers<[1], [0], [0], [1], [0, 0, 1, 1], [], []>} : vector<64x128xbf16>, vector<128x128xbf16>, vector<64x128xf32> -> vector<64x128xf32>
    %33 = arith.addf %26, %32 : vector<64x128xf32>
    %c0_34 = arith.constant 0 : index
    %c1_35 = arith.constant 1 : index
    %c2_36 = arith.constant 2 : index
    %c0_37 = arith.constant 0 : index
    %34 = vector.load %arg1[%c0_34, %c1_35, %c2_36, %c0_37] : memref<1x10x10x128xbf16, #tpu.memory_space<vmem>>, vector<1x8x8x128xbf16>
    %35 = vector.shape_cast %34 : vector<1x8x8x128xbf16> to vector<8x8x128xbf16>
    %36 = vector.shape_cast %35 : vector<8x8x128xbf16> to vector<64x128xbf16>
    %c5 = arith.constant 5 : index
    %c0_38 = arith.constant 0 : index
    %c0_39 = arith.constant 0 : index
    %37 = vector.load %arg2[%c5, %c0_38, %c0_39] : memref<9x128x128xbf16, #tpu.memory_space<vmem>>, vector<1x128x128xbf16>
    %38 = vector.shape_cast %37 : vector<1x128x128xbf16> to vector<128x128xbf16>
    %cst_40 = arith.constant dense<0.000000e+00> : vector<64x128xf32>
    %39 = tpu.matmul %36, %38, %cst_40 {dimension_numbers = #tpu.dot_dimension_numbers<[1], [0], [0], [1], [0, 0, 1, 1], [], []>} : vector<64x128xbf16>, vector<128x128xbf16>, vector<64x128xf32> -> vector<64x128xf32>
    %40 = arith.addf %33, %39 : vector<64x128xf32>
    %c0_41 = arith.constant 0 : index
    %c2_42 = arith.constant 2 : index
    %c0_43 = arith.constant 0 : index
    %c0_44 = arith.constant 0 : index
    %41 = vector.load %arg1[%c0_41, %c2_42, %c0_43, %c0_44] : memref<1x10x10x128xbf16, #tpu.memory_space<vmem>>, vector<1x8x8x128xbf16>
    %42 = vector.shape_cast %41 : vector<1x8x8x128xbf16> to vector<8x8x128xbf16>
    %43 = vector.shape_cast %42 : vector<8x8x128xbf16> to vector<64x128xbf16>
    %c6 = arith.constant 6 : index
    %c0_45 = arith.constant 0 : index
    %c0_46 = arith.constant 0 : index
    %44 = vector.load %arg2[%c6, %c0_45, %c0_46] : memref<9x128x128xbf16, #tpu.memory_space<vmem>>, vector<1x128x128xbf16>
    %45 = vector.shape_cast %44 : vector<1x128x128xbf16> to vector<128x128xbf16>
    %cst_47 = arith.constant dense<0.000000e+00> : vector<64x128xf32>
    %46 = tpu.matmul %43, %45, %cst_47 {dimension_numbers = #tpu.dot_dimension_numbers<[1], [0], [0], [1], [0, 0, 1, 1], [], []>} : vector<64x128xbf16>, vector<128x128xbf16>, vector<64x128xf32> -> vector<64x128xf32>
    %47 = arith.addf %40, %46 : vector<64x128xf32>
    %c0_48 = arith.constant 0 : index
    %c2_49 = arith.constant 2 : index
    %c1_50 = arith.constant 1 : index
    %c0_51 = arith.constant 0 : index
    %48 = vector.load %arg1[%c0_48, %c2_49, %c1_50, %c0_51] : memref<1x10x10x128xbf16, #tpu.memory_space<vmem>>, vector<1x8x8x128xbf16>
    %49 = vector.shape_cast %48 : vector<1x8x8x128xbf16> to vector<8x8x128xbf16>
    %50 = vector.shape_cast %49 : vector<8x8x128xbf16> to vector<64x128xbf16>
    %c7 = arith.constant 7 : index
    %c0_52 = arith.constant 0 : index
    %c0_53 = arith.constant 0 : index
    %51 = vector.load %arg2[%c7, %c0_52, %c0_53] : memref<9x128x128xbf16, #tpu.memory_space<vmem>>, vector<1x128x128xbf16>
    %52 = vector.shape_cast %51 : vector<1x128x128xbf16> to vector<128x128xbf16>
    %cst_54 = arith.constant dense<0.000000e+00> : vector<64x128xf32>
    %53 = tpu.matmul %50, %52, %cst_54 {dimension_numbers = #tpu.dot_dimension_numbers<[1], [0], [0], [1], [0, 0, 1, 1], [], []>} : vector<64x128xbf16>, vector<128x128xbf16>, vector<64x128xf32> -> vector<64x128xf32>
    %54 = arith.addf %47, %53 : vector<64x128xf32>
    %c0_55 = arith.constant 0 : index
    %c2_56 = arith.constant 2 : index
    %c2_57 = arith.constant 2 : index
    %c0_58 = arith.constant 0 : index
    %55 = vector.load %arg1[%c0_55, %c2_56, %c2_57, %c0_58] : memref<1x10x10x128xbf16, #tpu.memory_space<vmem>>, vector<1x8x8x128xbf16>
    %56 = vector.shape_cast %55 : vector<1x8x8x128xbf16> to vector<8x8x128xbf16>
    %57 = vector.shape_cast %56 : vector<8x8x128xbf16> to vector<64x128xbf16>
    %c8 = arith.constant 8 : index
    %c0_59 = arith.constant 0 : index
    %c0_60 = arith.constant 0 : index
    %58 = vector.load %arg2[%c8, %c0_59, %c0_60] : memref<9x128x128xbf16, #tpu.memory_space<vmem>>, vector<1x128x128xbf16>
    %59 = vector.shape_cast %58 : vector<1x128x128xbf16> to vector<128x128xbf16>
    %cst_61 = arith.constant dense<0.000000e+00> : vector<64x128xf32>
    %60 = tpu.matmul %57, %59, %cst_61 {dimension_numbers = #tpu.dot_dimension_numbers<[1], [0], [0], [1], [0, 0, 1, 1], [], []>} : vector<64x128xbf16>, vector<128x128xbf16>, vector<64x128xf32> -> vector<64x128xf32>
    %61 = arith.addf %54, %60 : vector<64x128xf32>
    %62 = arith.truncf %61 : vector<64x128xf32> to vector<64x128xbf16>
    %c0_62 = arith.constant 0 : index
    %c0_63 = arith.constant 0 : index
    %c0_64 = arith.constant 0 : index
    %63 = vector.load %arg3[%c0_62, %c0_63, %c0_64] : memref<1x64x128xbf16, #tpu.memory_space<vmem>>, vector<1x64x128xbf16>
    %64 = vector.shape_cast %63 : vector<1x64x128xbf16> to vector<64x128xbf16>
    %65 = vector.shape_cast %62 : vector<64x128xbf16> to vector<1x64x128xbf16>
    tpu.vector_store %arg3[%c0_62, %c0_63, %c0_64], %65 {strides = array<i32>} : memref<1x64x128xbf16, #tpu.memory_space<vmem>>, vector<1x64x128xbf16>,
    %cst_65 = arith.constant dense<0.000000e+00> : vector<128xf32>
    %66 = vector.multi_reduction <add>, %61, %cst_65 [0] : vector<64x128xf32> to vector<128xf32>
    %67 = vector.shape_cast %66 : vector<128xf32> to vector<1x128xf32>
    %c0_66 = arith.constant 0 : index
    %c0_67 = arith.constant 0 : index
    %c0_68 = arith.constant 0 : index
    %68 = vector.load %arg4[%c0_66, %c0_67, %c0_68] : memref<1x2x128xf32, #tpu.memory_space<vmem>>, vector<1x1x128xf32>
    %69 = vector.shape_cast %68 : vector<1x1x128xf32> to vector<1x128xf32>
    %70 = vector.shape_cast %67 : vector<1x128xf32> to vector<1x1x128xf32>
    tpu.vector_store %arg4[%c0_66, %c0_67, %c0_68], %70 {strides = array<i32>} : memref<1x2x128xf32, #tpu.memory_space<vmem>>, vector<1x1x128xf32>,
    %71 = arith.mulf %61, %61 : vector<64x128xf32>
    %cst_69 = arith.constant dense<0.000000e+00> : vector<128xf32>
    %72 = vector.multi_reduction <add>, %71, %cst_69 [0] : vector<64x128xf32> to vector<128xf32>
    %73 = vector.shape_cast %72 : vector<128xf32> to vector<1x128xf32>
    %c0_70 = arith.constant 0 : index
    %c1_71 = arith.constant 1 : index
    %c0_72 = arith.constant 0 : index
    %74 = vector.load %arg4[%c0_70, %c1_71, %c0_72] : memref<1x2x128xf32, #tpu.memory_space<vmem>>, vector<1x1x128xf32>
    %75 = vector.shape_cast %74 : vector<1x1x128xf32> to vector<1x128xf32>
    %76 = vector.shape_cast %73 : vector<1x128xf32> to vector<1x1x128xf32>
    tpu.vector_store %arg4[%c0_70, %c1_71, %c0_72], %76 {strides = array<i32>} : memref<1x2x128xf32, #tpu.memory_space<vmem>>, vector<1x1x128xf32>,
    return
  }
  func.func @transform_0(%arg0: i32) -> (i32, i32, i32, i32) {
    %c0_i32 = arith.constant 0 : i32
    %c0_i32_0 = arith.constant 0 : i32
    %c0_i32_1 = arith.constant 0 : i32
    %c0_i32_2 = arith.constant 0 : i32
    return %arg0, %c0_i32, %c0_i32_0, %c0_i32_1 : i32, i32, i32, i32
  }
  func.func @transform_1(%arg0: i32) -> (i32, i32, i32) {
    %c0_i32 = arith.constant 0 : i32
    %c0_i32_0 = arith.constant 0 : i32
    %c0_i32_1 = arith.constant 0 : i32
    %c0_i32_2 = arith.constant 0 : i32
    return %c0_i32, %c0_i32_0, %c0_i32_1 : i32, i32, i32
  }
  func.func @transform_2(%arg0: i32) -> (i32, i32, i32) {
    %c0_i32 = arith.constant 0 : i32
    %c0_i32_0 = arith.constant 0 : i32
    %c0_i32_1 = arith.constant 0 : i32
    return %arg0, %c0_i32, %c0_i32_0 : i32, i32, i32
  }
  func.func @transform_3(%arg0: i32) -> (i32, i32, i32) {
    %c0_i32 = arith.constant 0 : i32
    %c0_i32_0 = arith.constant 0 : i32
    %c0_i32_1 = arith.constant 0 : i32
    return %arg0, %c0_i32, %c0_i32_0 : i32, i32, i32
  }
}

module attributes {stable_mosaic.version = 11 : i64} {
  func.func @_bn_act_kernel(%arg0: i32, %arg1: memref<1x64x128xbf16, #tpu.memory_space<vmem>>, %arg2: memref<1x1x128xf32, #tpu.memory_space<vmem>>, %arg3: memref<1x1x128xf32, #tpu.memory_space<vmem>>, %arg4: memref<1x64x128xbf16, #tpu.memory_space<vmem>>, %arg5: memref<1x1x128xf32, #tpu.memory_space<vmem>>, %arg6: memref<1x1x128xf32, #tpu.memory_space<vmem>>, %arg7: memref<1x64x128xbf16, #tpu.memory_space<vmem>>) attributes {dimension_semantics = [#tpu.dimension_semantics<parallel>], iteration_bounds = array<i64: 2>, scalar_prefetch = 0 : i64, scratch_operands = 0 : i64, tpu.core_type = #tpu.core_type<tc>, window_params = [{transform_indices = @transform_0, window_bounds = array<i64: 1, 64, 128>}, {pipeline_mode = #tpu.pipeline_mode<synchronous>, transform_indices = @transform_1, window_bounds = array<i64: 1, 1, 128>}, {pipeline_mode = #tpu.pipeline_mode<synchronous>, transform_indices = @transform_2, window_bounds = array<i64: 1, 1, 128>}, {transform_indices = @transform_3, window_bounds = array<i64: 1, 64, 128>}, {pipeline_mode = #tpu.pipeline_mode<synchronous>, transform_indices = @transform_4, window_bounds = array<i64: 1, 1, 128>}, {pipeline_mode = #tpu.pipeline_mode<synchronous>, transform_indices = @transform_5, window_bounds = array<i64: 1, 1, 128>}, {transform_indices = @transform_6, window_bounds = array<i64: 1, 64, 128>}]} {
    %c0 = arith.constant 0 : index
    %c0_0 = arith.constant 0 : index
    %c0_1 = arith.constant 0 : index
    %0 = vector.load %arg1[%c0, %c0_0, %c0_1] : memref<1x64x128xbf16, #tpu.memory_space<vmem>>, vector<1x64x128xbf16>
    %1 = vector.shape_cast %0 : vector<1x64x128xbf16> to vector<64x128xbf16>
    %2 = arith.extf %1 : vector<64x128xbf16> to vector<64x128xf32>
    %c0_2 = arith.constant 0 : index
    %c0_3 = arith.constant 0 : index
    %c0_4 = arith.constant 0 : index
    %3 = vector.load %arg2[%c0_2, %c0_3, %c0_4] : memref<1x1x128xf32, #tpu.memory_space<vmem>>, vector<1x1x128xf32>
    %4 = vector.shape_cast %3 : vector<1x1x128xf32> to vector<1x128xf32>
    %5 = vector.broadcast %4 : vector<1x128xf32> to vector<64x128xf32>
    %6 = arith.mulf %2, %5 : vector<64x128xf32>
    %c0_5 = arith.constant 0 : index
    %c0_6 = arith.constant 0 : index
    %c0_7 = arith.constant 0 : index
    %7 = vector.load %arg3[%c0_5, %c0_6, %c0_7] : memref<1x1x128xf32, #tpu.memory_space<vmem>>, vector<1x1x128xf32>
    %8 = vector.shape_cast %7 : vector<1x1x128xf32> to vector<1x128xf32>
    %9 = vector.broadcast %8 : vector<1x128xf32> to vector<64x128xf32>
    %10 = arith.addf %6, %9 : vector<64x128xf32>
    %c0_8 = arith.constant 0 : index
    %c0_9 = arith.constant 0 : index
    %c0_10 = arith.constant 0 : index
    %11 = vector.load %arg4[%c0_8, %c0_9, %c0_10] : memref<1x64x128xbf16, #tpu.memory_space<vmem>>, vector<1x64x128xbf16>
    %12 = vector.shape_cast %11 : vector<1x64x128xbf16> to vector<64x128xbf16>
    %13 = arith.extf %12 : vector<64x128xbf16> to vector<64x128xf32>
    %c0_11 = arith.constant 0 : index
    %c0_12 = arith.constant 0 : index
    %c0_13 = arith.constant 0 : index
    %14 = vector.load %arg5[%c0_11, %c0_12, %c0_13] : memref<1x1x128xf32, #tpu.memory_space<vmem>>, vector<1x1x128xf32>
    %15 = vector.shape_cast %14 : vector<1x1x128xf32> to vector<1x128xf32>
    %16 = vector.broadcast %15 : vector<1x128xf32> to vector<64x128xf32>
    %17 = arith.mulf %13, %16 : vector<64x128xf32>
    %c0_14 = arith.constant 0 : index
    %c0_15 = arith.constant 0 : index
    %c0_16 = arith.constant 0 : index
    %18 = vector.load %arg6[%c0_14, %c0_15, %c0_16] : memref<1x1x128xf32, #tpu.memory_space<vmem>>, vector<1x1x128xf32>
    %19 = vector.shape_cast %18 : vector<1x1x128xf32> to vector<1x128xf32>
    %20 = vector.broadcast %19 : vector<1x128xf32> to vector<64x128xf32>
    %21 = arith.addf %17, %20 : vector<64x128xf32>
    %22 = arith.addf %10, %21 : vector<64x128xf32>
    %cst = arith.constant 0.000000e+00 : f32
    %23 = vector.broadcast %cst : f32 to vector<64x128xf32>
    %24 = arith.maximumf %22, %23 : vector<64x128xf32>
    %25 = arith.truncf %24 : vector<64x128xf32> to vector<64x128xbf16>
    %c0_17 = arith.constant 0 : index
    %c0_18 = arith.constant 0 : index
    %c0_19 = arith.constant 0 : index
    %26 = vector.load %arg7[%c0_17, %c0_18, %c0_19] : memref<1x64x128xbf16, #tpu.memory_space<vmem>>, vector<1x64x128xbf16>
    %27 = vector.shape_cast %26 : vector<1x64x128xbf16> to vector<64x128xbf16>
    %28 = vector.shape_cast %25 : vector<64x128xbf16> to vector<1x64x128xbf16>
    tpu.vector_store %arg7[%c0_17, %c0_18, %c0_19], %28 {strides = array<i32>} : memref<1x64x128xbf16, #tpu.memory_space<vmem>>, vector<1x64x128xbf16>,
    return
  }
  func.func @transform_0(%arg0: i32) -> (i32, i32, i32) {
    %c0_i32 = arith.constant 0 : i32
    %c0_i32_0 = arith.constant 0 : i32
    %c0_i32_1 = arith.constant 0 : i32
    return %arg0, %c0_i32, %c0_i32_0 : i32, i32, i32
  }
  func.func @transform_1(%arg0: i32) -> (i32, i32, i32) {
    %c0_i32 = arith.constant 0 : i32
    %c0_i32_0 = arith.constant 0 : i32
    %c0_i32_1 = arith.constant 0 : i32
    %c0_i32_2 = arith.constant 0 : i32
    return %c0_i32, %c0_i32_0, %c0_i32_1 : i32, i32, i32
  }
  func.func @transform_2(%arg0: i32) -> (i32, i32, i32) {
    %c0_i32 = arith.constant 0 : i32
    %c0_i32_0 = arith.constant 0 : i32
    %c0_i32_1 = arith.constant 0 : i32
    %c0_i32_2 = arith.constant 0 : i32
    return %c0_i32, %c0_i32_0, %c0_i32_1 : i32, i32, i32
  }
  func.func @transform_3(%arg0: i32) -> (i32, i32, i32) {
    %c0_i32 = arith.constant 0 : i32
    %c1_i32 = arith.constant 1 : i32
    %c0_i32_0 = arith.constant 0 : i32
    return %arg0, %c0_i32, %c1_i32 : i32, i32, i32
  }
  func.func @transform_4(%arg0: i32) -> (i32, i32, i32) {
    %c0_i32 = arith.constant 0 : i32
    %c0_i32_0 = arith.constant 0 : i32
    %c0_i32_1 = arith.constant 0 : i32
    %c0_i32_2 = arith.constant 0 : i32
    return %c0_i32, %c0_i32_0, %c0_i32_1 : i32, i32, i32
  }
  func.func @transform_5(%arg0: i32) -> (i32, i32, i32) {
    %c0_i32 = arith.constant 0 : i32
    %c0_i32_0 = arith.constant 0 : i32
    %c0_i32_1 = arith.constant 0 : i32
    %c0_i32_2 = arith.constant 0 : i32
    return %c0_i32, %c0_i32_0, %c0_i32_1 : i32, i32, i32
  }
  func.func @transform_6(%arg0: i32) -> (i32, i32, i32) {
    %c0_i32 = arith.constant 0 : i32
    %c0_i32_0 = arith.constant 0 : i32
    %c0_i32_1 = arith.constant 0 : i32
    return %arg0, %c0_i32, %c0_i32_0 : i32, i32, i32
  }
}

</mosaic_0001>

<bundles_post_ra>
// kernel: basic_block_forward.5
= control target key start
LH: loop header
LB: loop body
LE: loop exit
PB: predicated region body
PF: predicated region fallthrough
CT: control target
= control target key end

     0   :  { %s539_s12 = smov 0   ;;  %s541_s13 = smov 0   ;;  %s602_s0 = inlined_call_operand.vmem [shape: bf16[2,64,256], index: 0, kind: input, shape index: {}]   ;;  %s603_s1 = inlined_call_operand.vmem [shape: f32[1,1,128], index: 1, kind: input, shape index: {}]   ;;  %s604_s2 = inlined_call_operand.vmem [shape: f32[1,1,128], index: 2, kind: input, shape index: {}]   ;;  %s605_s3 = inlined_call_operand.vmem [shape: bf16[2,64,128], index: 3, kind: output, shape index: {}]  }
   0x1   :  { %s543_s14 = smov 0  }
   0x2 LB: > { %s396_s15 = sadd.s32 4294967295, %s517_s14   ;;  %s556_s16 = sadd.s32 1, %s517_s14   ;;  %s517_s14 = sphi %s543_s14, %s608_s14   ;;  %s513_s13 = sphi %s541_s13, %s607_s13   ;;  %s509_s12 = sphi %s539_s12, %s606_s12  }
   0x3   : > { %s17_s17 = ssub.s32 %s517_s14, %s556_s16  ;;  %s20_s18 = sadd.s32 1, %s513_s13 }
   0x4   : > { %p18_p0 = scmp.eq.s32.totalorder %s17_s17, 0  ;;  %p27_p1 = scmp.ne.s32.totalorder %s513_s13, %s509_s12 }
   0x5   : > { %p28_p2 = scmp.eq.s32.totalorder %s517_s14, 0  ;;  %p399_p4 = scmp.ge.s32.totalorder %s517_s14, 2 }
   0x6   : > { %s565_s19 = scalar_select %p18_p0, %s513_s13, %s20_s18  }
   0x7   : > { %p29_p3 = por %p28_p2, %p27_p1  ;;  %127 = sbr.rel (%p399_p4) target bundleno = 23 (0x17), region = 24 }
   0xe   : > { %130 = sbr.rel (!%p29_p3) target bundleno = 23 (0x17), region = 28  ;;  %s132_s20 = sand.u32 (%p29_p3), 1, %s513_s13  }
   0xf   : > { %s419_s21 = sshll.u32 (%p29_p3), %s517_s14, 6  ;;  %s400_s22 = sshll.u32 (%p29_p3), %s132_s20, 5 }
  0x10   : > { %s137_s25 = scalar_lea.vmem (%p29_p3), %s602_s0, %s419_s21  ;;  %s134_s26 = scalar_lea.vmem (%p29_p3), [#allocation2], %s400_s22 }
  0x11   : > { %v153_v0 = vld [vmem:[%s137_s25] sm:$0xf] (%p29_p3)  ;;  %v155_v1 = vld [vmem:[%s137_s25 + $0x8] sm:$0xf] (%p29_p3)  ;;  %v157_v2 = vld [vmem:[%s137_s25 + $0x10] sm:$0xf] (%p29_p3) }
  0x12   : > { %154 = vst [vmem:[%s134_s26] sm:$0xf] (%p29_p3), %v153_v0  ;;  %156 = vst [vmem:[%s134_s26 + $0x4] sm:$0xf] (%p29_p3), %v155_v1  ;;  %v159_v3 = vld [vmem:[%s137_s25 + $0x18] sm:$0xf] (%p29_p3) }
  0x13   : > { %v161_v4 = vld [vmem:[%s137_s25 + $0x20] sm:$0xf] (%p29_p3)  ;;  %158 = vst [vmem:[%s134_s26 + $0x8] sm:$0xf] (%p29_p3), %v157_v2  ;;  %160 = vst [vmem:[%s134_s26 + $0xc] sm:$0xf] (%p29_p3), %v159_v3 }
  0x14   : > { %162 = vst [vmem:[%s134_s26 + $0x10] sm:$0xf] (%p29_p3), %v161_v4  ;;  %v163_v5 = vld [vmem:[%s137_s25 + $0x28] sm:$0xf] (%p29_p3)  ;;  %v165_v6 = vld [vmem:[%s137_s25 + $0x30] sm:$0xf] (%p29_p3) }
  0x15   : > { %v167_v7 = vld [vmem:[%s137_s25 + $0x38] sm:$0xf]  ;;  %164 = vst [vmem:[%s134_s26 + $0x14] sm:$0xf] %v163_v5  ;;  %166 = vst [vmem:[%s134_s26 + $0x18] sm:$0xf] %v165_v6 }
  0x16   : > { %168 = vst [vmem:[%s134_s26 + $0x1c] sm:$0xf] %v167_v7 }
  0x17 PF: > { %p403_p5 = scmp.ge.s32.totalorder %s517_s14, 1  ;;  %p206_p6 = scmp.lt.s32.totalorder %s517_s14, 3 }
  0x19   : > { %p207_p7 = pnand %p403_p5, %p206_p6 }
  0x1a   : > { %s213_s27 = sand.u32 (!%p207_p7), 1, %s509_s12   ;;  %p236_p8 = scmp.lt.s32.totalorder (!%p207_p7), %s396_s15, 1  ;;  %v407_v8 = vld [vmem:[%s603_s1] ss:$0 sm:$0xff] (!%p207_p7) }
  0x1b   : > { %210 = sbr.rel (%p207_p7) target bundleno = 42 (0x2a), region = 69  ;;  %s404_s28 = sshll.u32 (!%p207_p7), %s213_s27, 5  ;;  %v408_v17 = vld [vmem:[%s604_s2] ss:$0 sm:$0xff] (!%p207_p7) }
  0x1c   : > { %s215_s4 = scalar_lea.vmem (!%p207_p7), [#allocation2], %s404_s28 }
  0x1d   : > { %v430_v9 = vld [vmem:[%s215_s4] sm:$0xff] (!%p207_p7)   ;;  %v465_v10 = vld [vmem:[%s215_s4 + $0x8] sm:$0xff] (!%p207_p7)   ;;  %v466_v11 = vld [vmem:[%s215_s4 + $0x10] sm:$0xff] (!%p207_p7)  }
  0x1e   : > { %v431_v12 = vunpack.c.l.bf16 (!%p207_p7), %v430_v9  ;;  %v432_v13 = vunpack.c.h.bf16 (!%p207_p7), %v430_v9  ;;  %v435_v14 = vunpack.c.l.bf16 (!%p207_p7), %v465_v10  ;;  %v436_v15 = vunpack.c.h.bf16 (!%p207_p7), %v465_v10  ;;  %v467_v16 = vld [vmem:[%s215_s4 + $0x18] sm:$0xff] (!%p207_p7)  }
  0x1f   : > { %v439_v18 = vunpack.c.l.bf16 (!%p207_p7), %v466_v11  ;;  %v440_v19 = vunpack.c.h.bf16 (!%p207_p7), %v466_v11  ;;  %v443_v20 = vunpack.c.l.bf16 (!%p207_p7), %v467_v16  ;;  %v444_v21 = vunpack.c.h.bf16 (!%p207_p7), %v467_v16 }
  0x20   : > { %v264_v22 = vmul.f32 (!%p207_p7), %v431_v12, %v407_v8  ;;  %v265_v23 = vmul.f32 (!%p207_p7), %v432_v13, %v407_v8  ;;  %v266_v24 = vmul.f32 (!%p207_p7), %v435_v14, %v407_v8  ;;  %v267_v25 = vmul.f32 (!%p207_p7), %v436_v15, %v407_v8 }
  0x21   : > { %v268_v26 = vmul.f32 (!%p207_p7), %v439_v18, %v407_v8  ;;  %v269_v27 = vmul.f32 (!%p207_p7), %v440_v19, %v407_v8  ;;  %v270_v28 = vmul.f32 (!%p207_p7), %v443_v20, %v407_v8  ;;  %v271_v29 = vmul.f32 (!%p207_p7), %v444_v21, %v407_v8 }
  0x22   : > { %s610_s15 = smov (!%p236_p8, %s396_s15), 1  ;;  %v279_v30 = vadd.f32 %v408_v17, %v264_v22  ;;  %v280_v31 = vadd.f32 %v408_v17, %v265_v23  ;;  %v281_v32 = vadd.f32 %v408_v17, %v266_v24  ;;  %v282_v33 = vadd.f32 %v408_v17, %v267_v25 }
  0x23   : > { %s420_s7 = sshll.u32 %s610_s15, 5  ;;  %v283_v34 = vadd.f32 %v408_v17, %v268_v26  ;;  %v284_v35 = vadd.f32 %v408_v17, %v269_v27  ;;  %v285_v36 = vadd.f32 %v408_v17, %v270_v28  ;;  %v286_v37 = vadd.f32 %v408_v17, %v271_v29 }
  0x24   : > { %v287_v38 = vmax.f32 %v279_v30, 0.0  ;;  %v288_v39 = vmax.f32 %v280_v31, 0.0  ;;  %v289_v40 = vmax.f32 %v281_v32, 0.0  ;;  %v290_v41 = vmax.f32 %v282_v33, 0.0  ;;  %s240_s10 = scalar_lea.vmem %s605_s3, %s420_s7 }
  0x25   : > { %v291_v42 = vmax.f32 %v283_v34, 0.0  ;;  %v292_v43 = vmax.f32 %v284_v35, 0.0  ;;  %v293_v44 = vmax.f32 %v285_v36, 0.0  ;;  %v294_v45 = vmax.f32 %v286_v37, 0.0 }
  0x26   : > { %v448_v46 = vpack.c.bf16 %v288_v39, %v287_v38  ;;  %v453_v47 = vpack.c.bf16 %v290_v41, %v289_v40 }
  0x27   : > { %v458_v48 = vpack.c.bf16 %v292_v43, %v291_v42  ;;  %v463_v49 = vpack.c.bf16 %v294_v45, %v293_v44 }
  0x28   : > { %449 = vst [vmem:[%s240_s10] sm:$0xff] %v448_v46   ;;  %468 = vst [vmem:[%s240_s10 + $0x8] sm:$0xff] %v453_v47  }
  0x29   : > { %469 = vst [vmem:[%s240_s10 + $0x10] sm:$0xff] %v458_v48   ;;  %470 = vst [vmem:[%s240_s10 + $0x18] sm:$0xff] %v463_v49  }
  0x2a PF: > { %p10_p9 = scmp.ge.s32.totalorder %s556_s16, 4   ;;  %s606_s12 = smov %s513_s13 }
  0x2b   : > { %s607_s13 = smov %s565_s19  ;;  %s608_s14 = smov %s556_s16 }
  0x2c   :  { %12 = sbr.rel (!%p10_p9) target bundleno = 2 (0x2), region = 108 }

// kernel: basic_block_forward.4
= control target key start
LH: loop header
LB: loop body
LE: loop exit
PB: predicated region body
PF: predicated region fallthrough
CT: control target
= control target key end

     0   :  { %s2615_s21 = smov 0   ;;  %s2948_s0 = inlined_call_operand.vmem [shape: bf16[2,9,9,4], index: 0, kind: input, shape index: {}]   ;;  %s2949_s1 = inlined_call_operand.vmem [shape: bf16[2,9,9,4], index: 1, kind: input, shape index: {}]   ;;  %s2950_s2 = inlined_call_operand.vmem [shape: bf16[2,9,9,4], index: 2, kind: input, shape index: {}]   ;;  %s2951_s3 = inlined_call_operand.vmem [shape: bf16[2,9,9,4], index: 3, kind: input, shape index: {}]   ;;  %s2952_s4 = inlined_call_operand.vmem [shape: bf16[9,4,256], index: 4, kind: input, shape index: {}]   ;;  %s2953_s5 = inlined_call_operand.vmem [shape: bf16[2,64,256], index: 5, kind: output, shape index: {0}]   ;;  %s2954_s6 = inlined_call_operand.vmem [shape: f32[2,2,256], index: 6, kind: output, shape index: {1}]  }
   0x1 LB: > { %s2241_s22 = sadd.s32 4294967295, %s2576_s21   ;;  %p2245_p0 = scmp.ge.s32.totalorder %s2576_s21, 1  ;;  %s2576_s21 = sphi %s2615_s21, %s17_s21  }
   0x2   : > { %p245_p1 = scmp.lt.s32.totalorder %s2576_s21, 3 }
   0x4   : > { %p246_p2 = pnand %p2245_p0, %p245_p1 }
   0x5   : > { %v2259_v0 = vld.sshfl [vmem:[%s2952_s4 + $0x4] sm:$0x33 pattern:$0x76325410] (!%p246_p2)  ;;  %vm387_vm0 = vcmask (!%p246_p2), 1041408   ;;  %v2578_v4 = vmov (!%p246_p2), 0  }
   0x6   : > { %249 = sbr.rel (%p246_p2) target bundleno = 395 (0x18b), region = 40  ;;  %v373_v1 = vcombine.high (!%p246_p2), %v2259_v0, %v2259_v0  ;;  %v2302_v2 = vld.sshfl [vmem:[%s2952_s4 + $0x10] sm:$0x33 pattern:$0x76325410] (!%p246_p2)  ;;  %v389_v3 = vsel (!%p246_p2), %vm387_vm0, %v2259_v0, 0  ;;  %426 = vmatprep.mubr.bf16.mxu1 (!%p246_p2), %v2578_v4  ;;  %1083 = vmatprep.mubr.bf16.mxu0 (!%p246_p2), %v2578_v4 }
   0x7   : > { %p295_p3 = scmp.lt.s32.totalorder (!%p246_p2), %s2241_s22, 1  ;;  %v2632_v5 = vcombine.high (!%p246_p2), %v2302_v2, %v2302_v2  ;;  %v2635_v6 = vsel (!%p246_p2), %vm387_vm0, %v2302_v2, 0  ;;  %v2269_v7 = vld.sshfl [vmem:[%s2952_s4] sm:$0x33 pattern:$0x76325410] (!%p246_p2) }
   0x8   : > { %2260 = vmatprep.subr.msk.bf16.mxu1 (!%p246_p2), %vm387_vm0, %v373_v1  ;;  %v495_v8 = vcombine.high (!%p246_p2), %v2269_v7, %v2269_v7  ;;  %v2313_v9 = vld.sshfl [vmem:[%s2952_s4 + $0x14] sm:$0x33 pattern:$0x76325410] (!%p246_p2)  ;;  %vm374_vm1 = vcmask (!%p246_p2), 31744   ;;  %v509_v12 = vsel (!%p246_p2), %vm387_vm0, %v2269_v7, 0 }
   0x9   : > { %2303 = vmatprep.subr.msk.bf16.mxu0 (!%p246_p2), %vm387_vm0, %v2632_v5  ;;  %395 = vmatpush1.bf16.msra.mxu1 (!%p246_p2), %v389_v3  ;;  %v1290_v10 = vcombine.high (!%p246_p2), %v2313_v9, %v2313_v9  ;;  %v2332_v11 = vld.sshfl [vmem:[%s2952_s4 + $0x18] sm:$0x33 pattern:$0x76325410] (!%p246_p2)  ;;  %v1304_v13 = vsel (!%p246_p2), %vm387_vm0, %v2313_v9, 0 }
   0xa   : > { %1052 = vmatpush1.bf16.msra.mxu0 (!%p246_p2), %v2635_v6  ;;  %2270 = vmatprep.subr.msk.bf16.mxu1 (!%p246_p2), %vm387_vm0, %v495_v8  ;;  %v2668_v14 = vld.sshfl [vmem:[%s2952_s4 + $0x8] sm:$0x33 pattern:$0x76325410] (!%p246_p2)  ;;  %vm603_vm2 = vsmask.f32 (!%p246_p2), 3328  ;;  %v1437_v17 = vcombine.high (!%p246_p2), %v2332_v11, %v2332_v11 }
   0xb   : > { %2314 = vmatprep.subr.msk.bf16.mxu0 (!%p246_p2), %vm387_vm0, %v1290_v10  ;;  %vm604_vm3 = vsmask.f32 (!%p246_p2), 7440  ;;  %v740_v18 = vcombine.high (!%p246_p2), %v2668_v14, %v2668_v14  ;;  %v2689_v19 = vsel (!%p246_p2), %vm387_vm0, %v2332_v11, 0 }
   0xc   : > { %v2704_v36 = vld.sshfl [vmem:[%s2952_s4 + $0x1c] sm:$0x33 pattern:$0x76325410] (!%p246_p2)  ;;  %vm2721_vm4 = vmor (!%p246_p2), %vm603_vm2, %vm604_vm3 }
   0xd   : > { %s2958_s22 = smov (!%p295_p3, %s2241_s22), 1  ;;  %v1584_v59 = vcombine.high %v2704_v36, %v2704_v36 }
   0xe   : > { %s2651_s7 = smul.u32 72, %s2958_s22  ;;  %s2395_s8 = sshll.u32 %s2958_s22, 6 }
   0xf   : > { %s2931_s11 = scalar_lea.vmem %s2953_s5, %s2395_s8 }
  0x10   : > { %s2661_s12 = scalar_lea.vmem %s2949_s1, %s2651_s7  ;;  %s2675_s17 = scalar_lea.vmem %s2951_s3, %s2651_s7 }
  0x11   : > { %v2546_v15 = vld [vmem:[%s2661_s12] ss:$8 sps:$4 sm:$0xff]   ;;  %s2682_s20 = scalar_lea.vmem %s2950_s2, %s2651_s7  ;;  %v2548_v20 = vld [vmem:[%s2661_s12 + $0x10] ss:$8 sps:$4 sm:$0xff]   ;;  %s2712_s27 = scalar_lea.vmem %s2948_s0, %s2651_s7 }
  0x12   : > { %v2547_v16 = vld [vmem:[%s2675_s17] ss:$8 sps:$4 sm:$0xff]   ;;  %2261 = vmatmul.mubr.msk.bf16.vlgmr.msra.gmra.mrb[0].mxu1 %vm374_vm1, %v2546_v15  ;;  %v2549_v21 = vld [vmem:[%s2675_s17 + $0x10] ss:$8 sps:$4 sm:$0xff]   ;;  %v1141_v23 = vld [vmem:[%s2682_s20 + $0x4] sm:$0x1] }
  0x13   : > { %515 = vmatpush1.bf16.msra.mxu1 %v509_v12  ;;  %2304 = vmatmul.mubr.msk.bf16.vlgmr.msra.gmra.mrb[0].mxu0 %vm374_vm1, %v2547_v16  ;;  %v1140_v22 = vld [vmem:[%s2682_s20] sm:$0xf]  ;;  %v1142_v24 = vld [vmem:[%s2682_s20 + $0x8] sm:$0xf]  ;;  %v1143_v25 = vld [vmem:[%s2682_s20 + $0xc] sm:$0x1] }
  0x14   : > { %1310 = vmatpush1.bf16.msra.mxu0 %v1304_v13  ;;  %436 = vmatprep.mubr.bf16.mxu1 %v2578_v4  ;;  %v1157_v26 = vshrl.u32 %v1140_v22, 16  ;;  %v1160_v27 = vshll.u32 %v1140_v22, 16  ;;  %v1166_v28 = vshll.u32 %v1141_v23, 16  ;;  %v1171_v29 = vshrl.u32 %v1142_v24, 16  ;;  %v1144_v39 = vld [vmem:[%s2682_s20 + $0x10] sm:$0xf] }
  0x15   : > { %1093 = vmatprep.mubr.bf16.mxu0 %v2578_v4  ;;  %2333 = vmatprep.subr.msk.bf16.mxu0 %vm387_vm0, %v1437_v17  ;;  %v1174_v30 = vshll.u32 %v1142_v24, 16  ;;  %v1180_v31 = vshll.u32 %v1143_v25, 16  ;;  %v1145_v40 = vld [vmem:[%s2682_s20 + $0x14] sm:$0x1]  ;;  %v1146_v42 = vld [vmem:[%s2682_s20 + $0x18] sm:$0xf] }
  0x16   : > { %2281 = vmatprep.subr.msk.bf16.mxu1 %vm387_vm0, %v740_v18  ;;  %v1159_v32 = vrot.slane %v1157_v26, 4  ;;  %v1162_v33 = vrot.slane %v1160_v27, 5  ;;  %v1168_v34 = vrot.slane %v1166_v28, 5  ;;  %v1173_v35 = vrot.slane %v1171_v29, 4  ;;  %v1147_v43 = vld [vmem:[%s2682_s20 + $0x1c] sm:$0x1] }
  0x17   : > { %v1176_v37 = vrot.slane %v1174_v30, 5  ;;  %v1182_v38 = vrot.slane %v1180_v31, 5  ;;  %v1185_v44 = vshrl.u32 %v1144_v39, 16  ;;  %v1188_v45 = vshll.u32 %v1144_v39, 16  ;;  %v2550_v55 = vld [vmem:[%s2661_s12 + $0x20] ss:$8 sps:$4 sm:$0xff]  }
  0x18   : > { %v1163_v41 = vor.u32 %v1162_v33, %v1159_v32  ;;  %v1194_v48 = vshll.u32 %v1145_v40, 16  ;;  %v1199_v49 = vshrl.u32 %v1146_v42, 16  ;;  %v1202_v50 = vshll.u32 %v1146_v42, 16  ;;  %v1148_v0 = vld [vmem:[%s2682_s20 + $0x20] sm:$0xf] }
  0x19   : > { %v1177_v47 = vor.u32 %v1176_v37, %v1173_v35  ;;  %v1187_v52 = vrot.slane %v1185_v44, 4  ;;  %v1190_v53 = vrot.slane %v1188_v45, 5  ;;  %v1208_v54 = vshll.u32 %v1147_v43, 16  ;;  %v1149_v1 = vld [vmem:[%s2682_s20 + $0x24] sm:$0x1] }
  0x1a   : > { %2262 = vmatmul.mubr.msk.bf16.gmra.mrb[4].mxu1 %vm374_vm1, %v2548_v20  ;;  %v1164_v51 = vrot.slane %v1163_v41, 4  ;;  %v1201_v57 = vrot.slane %v1199_v49, 4  ;;  %v1204_v58 = vrot.slane %v1202_v50, 5  ;;  %v1196_v62 = vrot.slane %v1194_v48, 5  ;;  %v1150_v7 = vld [vmem:[%s2682_s20 + $0x28] sm:$0xf] }
  0x1b   : > { %2305 = vmatmul.mubr.msk.bf16.gmra.mrb[4].mxu0 %vm374_vm1, %v2549_v21  ;;  %446 = vmatprep.mubr.bf16.mxu1 %v2578_v4  ;;  %v1178_v56 = vrot.slane %v1177_v47, 4  ;;  %v1191_v61 = vor.u32 %v1190_v53, %v1187_v52  ;;  %v1210_v63 = vrot.slane %v1208_v54, 5  ;;  %v1151_v8 = vld [vmem:[%s2682_s20 + $0x2c] sm:$0x1]  ;;  %v1213_v9 = vshrl.u32 %v1148_v0, 16 }
  0x1c   : > { %1341 = vmatprep.mubr.bf16.mxu0 %v2578_v4  ;;  %v1169_v60 = vsel %vm2721_vm4, %v1164_v51, %v1168_v34  ;;  %v1205_v3 = vor.u32 %v1204_v58, %v1201_v57  ;;  %v1216_v10 = vshll.u32 %v1148_v0, 16  ;;  %v1222_v13 = vshll.u32 %v1149_v1, 16  ;;  %v1152_v25 = vld [vmem:[%s2682_s20 + $0x30] sm:$0xf]  ;;  %v1154_v28 = vld [vmem:[%s2682_s20 + $0x38] sm:$0xf] }
  0x1d   : > { %v1183_v2 = vsel %vm2721_vm4, %v1178_v56, %v1182_v38  ;;  %v1192_v12 = vrot.slane %v1191_v61, 4  ;;  %v1227_v15 = vshrl.u32 %v1150_v7, 16  ;;  %v1215_v17 = vrot.slane %v1213_v9, 4  ;;  %v2551_v30 = vld [vmem:[%s2661_s12 + $0x30] ss:$8 sps:$4 sm:$0xff]  }
  0x1e   : > { %v2309_v11 = vcombine.low %v1169_v60, %v1183_v2  ;;  %v1206_v16 = vrot.slane %v1205_v3, 4  ;;  %v1218_v18 = vrot.slane %v1216_v10, 5  ;;  %v1230_v20 = vshll.u32 %v1150_v7, 16  ;;  %v1153_v34 = vld [vmem:[%s2682_s20 + $0x34] sm:$0x1] }
  0x1f   : > { %v1229_v21 = vrot.slane %v1227_v15, 4  ;;  %v1236_v24 = vshll.u32 %v1151_v8, 16  ;;  %v1197_v26 = vsel %vm2721_vm4, %v1192_v12, %v1196_v62  ;;  %v1241_v29 = vshrl.u32 %v1152_v25, 16  ;;  %v1155_v40 = vld [vmem:[%s2682_s20 + $0x3c] sm:$0x1] }
  0x20   : > { %v1219_v22 = vor.u32 %v1218_v18, %v1215_v17  ;;  %v1232_v23 = vrot.slane %v1230_v20, 5  ;;  %v1211_v27 = vsel %vm2721_vm4, %v1206_v16, %v1210_v63  ;;  %v1224_v31 = vrot.slane %v1222_v13, 5  ;;  %v2552_v53 = vld [vmem:[%s2712_s27] ss:$8 sps:$4 sm:$0xff]   ;;  %v2553_v1 = vld [vmem:[%s2712_s27 + $0x10] ss:$8 sps:$4 sm:$0xff]  }
  0x21   : > { %v1244_v33 = vshll.u32 %v1152_v25, 16  ;;  %v1255_v35 = vshrl.u32 %v1154_v28, 16  ;;  %v2310_v37 = vcombine.low %v1197_v26, %v1211_v27  ;;  %v1238_v39 = vrot.slane %v1236_v24, 5  ;;  %v587_v63 = vld [vmem:[%s2712_s27] sm:$0xf] }
  0x22   : > { %2263 = vmatmul.mubr.msk.bf16.gmra.mrb[8].mxu1 %vm374_vm1, %v2550_v55  ;;  %v1233_v32 = vor.u32 %v1232_v23, %v1229_v21  ;;  %v1220_v38 = vrot.slane %v1219_v22, 4  ;;  %v1243_v41 = vrot.slane %v1241_v29, 4  ;;  %v1250_v47 = vshll.u32 %v1153_v34, 16  ;;  %v589_v0 = vld [vmem:[%s2712_s27 + $0x8] sm:$0xf] }
  0x23   : > { %2315 = vmatmul.mubr.msk.bf16.vlgmr.msra.gmra.mrb[0].mxu0 %vm374_vm1, %v2309_v11  ;;  %456 = vmatprep.mubr.bf16.mxu1 %v2578_v4  ;;  %v1246_v43 = vrot.slane %v1244_v33, 5  ;;  %v1257_v44 = vrot.slane %v1255_v35, 4  ;;  %v1264_v48 = vshll.u32 %v1155_v40, 16  ;;  %v754_v55 = vsel %vm387_vm0, %v2668_v14, 0  ;;  %v588_v3 = vld [vmem:[%s2712_s27 + $0x4] sm:$0x1] }
  0x24   : > { %1457 = vmatpush1.bf16.msra.mxu0 %v2689_v19  ;;  %1351 = vmatprep.mubr.bf16.mxu0 %v2578_v4  ;;  %v1258_v19 = vshll.u32 %v1154_v28, 16  ;;  %v1234_v42 = vrot.slane %v1233_v32, 4  ;;  %v1225_v49 = vsel %vm2721_vm4, %v1220_v38, %v1224_v31  ;;  %v2764_v54 = vld.sshfl [vmem:[%s2952_s4 + $0xc] sm:$0x33 pattern:$0x76325410] }
  0x25   : > { %2352 = vmatprep.subr.msk.bf16.mxu0 %vm387_vm0, %v1584_v59  ;;  %v1247_v51 = vor.u32 %v1246_v43, %v1243_v41  ;;  %v1252_v58 = vrot.slane %v1250_v47, 5  ;;  %v1266_v60 = vrot.slane %v1264_v48, 5  ;;  %v886_v61 = vcombine.high %v2764_v54, %v2764_v54  ;;  %v590_v11 = vld [vmem:[%s2712_s27 + $0xc] sm:$0x1]  ;;  %v2554_v18 = vld [vmem:[%s2712_s27 + $0x20] ss:$8 sps:$4 sm:$0xff]  }
  0x26   : > { %v1260_v45 = vrot.slane %v1258_v19, 5  ;;  %v1239_v50 = vsel %vm2721_vm4, %v1234_v42, %v1238_v39  ;;  %v607_v7 = vshrl.u32 %v587_v63, 16  ;;  %v610_v8 = vshll.u32 %v587_v63, 16  ;;  %v591_v21 = vld [vmem:[%s2712_s27 + $0x10] sm:$0xf] }
  0x27   : > { %v2311_v56 = vcombine.low %v1225_v49, %v1239_v50  ;;  %v1248_v57 = vrot.slane %v1247_v51, 4  ;;  %v621_v9 = vshrl.u32 %v589_v0, 16  ;;  %v624_v10 = vshll.u32 %v589_v0, 16  ;;  %v2555_v23 = vld [vmem:[%s2712_s27 + $0x8] ss:$8 sps:$4 sm:$0xff]  }
  0x28   : > { %v1261_v52 = vor.u32 %v1260_v45, %v1257_v44  ;;  %v616_v12 = vshll.u32 %v588_v3, 16  ;;  %v609_v13 = vrot.slane %v607_v7, 4  ;;  %v612_v15 = vrot.slane %v610_v8, 5  ;;  %v593_v24 = vld [vmem:[%s2712_s27 + $0x18] sm:$0xf] }
  0x29   : > { %v1253_v14 = vsel %vm2721_vm4, %v1248_v57, %v1252_v58  ;;  %v623_v16 = vrot.slane %v621_v9, 4  ;;  %v626_v17 = vrot.slane %v624_v10, 5  ;;  %v630_v20 = vshll.u32 %v590_v11, 16  ;;  %v2556_v35 = vld [vmem:[%s2712_s27 + $0x30] ss:$8 sps:$4 sm:$0xff]  }
  0x2a   : > { %2264 = vmatmul.mubr.msk.bf16.gmra.mrb[12].mxu1 %vm374_vm1, %v2551_v30  ;;  %v1262_v59 = vrot.slane %v1261_v52, 4  ;;  %v2793_v22 = vld.sshfl [vmem:[%s2952_s4 + $0x20] sm:$0x33 pattern:$0x76325410]  ;;  %v1598_v25 = vsel %vm387_vm0, %v2704_v36, 0  ;;  %v613_v26 = vor.u32 %v612_v15, %v609_v13 }
  0x2b   : > { %2316 = vmatmul.mubr.msk.bf16.gmra.mrb[4].mxu0 %vm374_vm1, %v2310_v37  ;;  %546 = vmatprep.mubr.bf16.mxu1 %v2578_v4  ;;  %v618_v27 = vrot.slane %v616_v12, 5  ;;  %v627_v28 = vor.u32 %v626_v17, %v623_v16  ;;  %v632_v29 = vrot.slane %v630_v20, 5  ;;  %v635_v30 = vshrl.u32 %v591_v21, 16  ;;  %v592_v36 = vld [vmem:[%s2712_s27 + $0x14] sm:$0x1] }
  0x2c   : > { %1361 = vmatprep.mubr.bf16.mxu0 %v2578_v4  ;;  %v1267_v62 = vsel %vm2721_vm4, %v1262_v59, %v1266_v60  ;;  %v638_v31 = vshll.u32 %v591_v21, 16  ;;  %v1842_v32 = vcombine.high %v2793_v22, %v2793_v22  ;;  %v649_v33 = vshrl.u32 %v593_v24, 16  ;;  %v594_v38 = vld [vmem:[%s2712_s27 + $0x1c] sm:$0x1]  ;;  %v2557_v43 = vld [vmem:[%s2712_s27 + $0x18] ss:$8 sps:$4 sm:$0xff]  }
  0x2d   : > { %v2312_v2 = vcombine.low %v1253_v14, %v1267_v62  ;;  %v652_v34 = vshll.u32 %v593_v24, 16  ;;  %v614_v19 = vrot.slane %v613_v26, 4  ;;  %v628_v37 = vrot.slane %v627_v28, 4  ;;  %v595_v44 = vld [vmem:[%s2712_s27 + $0x20] sm:$0xf] }
  0x2e   : > { %v637_v39 = vrot.slane %v635_v30, 4  ;;  %v640_v40 = vrot.slane %v638_v31, 5  ;;  %v651_v41 = vrot.slane %v649_v33, 4  ;;  %v644_v45 = vshll.u32 %v592_v36, 16  ;;  %v597_v48 = vld [vmem:[%s2712_s27 + $0x28] sm:$0xf] }
  0x2f   : > { %v654_v42 = vrot.slane %v652_v34, 5  ;;  %v658_v47 = vshll.u32 %v594_v38, 16  ;;  %v619_v49 = vsel %vm2721_vm4, %v614_v19, %v618_v27  ;;  %v633_v50 = vsel %vm2721_vm4, %v628_v37, %v632_v29  ;;  %v598_v14 = vld [vmem:[%s2712_s27 + $0x2c] sm:$0x1]  ;;  %v599_v8 = vld [vmem:[%s2712_s27 + $0x30] sm:$0xf] }
  0x30   : > { %v641_v51 = vor.u32 %v640_v40, %v637_v39  ;;  %v680_v57 = vshll.u32 %v597_v48, 16  ;;  %v646_v58 = vrot.slane %v644_v45, 5  ;;  %v2276_v60 = vcombine.low %v619_v49, %v633_v50  ;;  %v601_v10 = vld [vmem:[%s2712_s27 + $0x38] sm:$0xf]  ;;  %v600_v30 = vld [vmem:[%s2712_s27 + $0x34] sm:$0x1] }
  0x31   : > { %v655_v52 = vor.u32 %v654_v42, %v651_v41  ;;  %v660_v59 = vrot.slane %v658_v47, 5  ;;  %v900_v9 = vsel %vm387_vm0, %v2764_v54, 0  ;;  %v686_v12 = vshll.u32 %v598_v14, 16  ;;  %v602_v34 = vld [vmem:[%s2712_s27 + $0x3c] sm:$0x1] }
  0x32   : > { %2271 = vmatmul.mubr.msk.bf16.vlgmr.msra.gmra.mrb[0].mxu1 %vm374_vm1, %v2552_v53  ;;  %v663_v53 = vshrl.u32 %v595_v44, 16  ;;  %v642_v62 = vrot.slane %v641_v51, 4  ;;  %v682_v7 = vrot.slane %v680_v57, 5  ;;  %v691_v17 = vshrl.u32 %v599_v8, 16  ;;  %v2560_v40 = vld [vmem:[%s2661_s12 + $0x8] ss:$8 sps:$4 sm:$0xff]  }
  0x33   : > { %760 = vmatpush1.bf16.msra.mxu1 %v754_v55  ;;  %2317 = vmatmul.mubr.msk.bf16.gmra.mrb[8].mxu0 %vm374_vm1, %v2311_v56  ;;  %v666_v55 = vshll.u32 %v595_v44, 16  ;;  %v677_v56 = vshrl.u32 %v597_v48, 16  ;;  %v656_v63 = vrot.slane %v655_v52, 4  ;;  %v694_v54 = vshll.u32 %v599_v8, 16  ;;  %v2561_v50 = vld [vmem:[%s2661_s12 + $0x18] ss:$8 sps:$4 sm:$0xff]  }
  0x34   : > { %556 = vmatprep.mubr.bf16.mxu1 %v2578_v4  ;;  %1371 = vmatprep.mubr.bf16.mxu0 %v2578_v4  ;;  %v665_v0 = vrot.slane %v663_v53, 4  ;;  %v647_v13 = vsel %vm2721_vm4, %v642_v62, %v646_v58  ;;  %v705_v20 = vshrl.u32 %v601_v10, 16  ;;  %v708_v21 = vshll.u32 %v601_v10, 16  ;;  %v2359_v51 = vld [vmem:[%s2712_s27 + $0x10] sm:$0xf] }
  0x35   : > { %2292 = vmatprep.subr.msk.bf16.mxu1 %vm387_vm0, %v886_v61  ;;  %v596_v61 = vld [vmem:[%s2712_s27 + $0x24] sm:$0x1]  ;;  %v679_v3 = vrot.slane %v677_v56, 4  ;;  %v661_v15 = vsel %vm2721_vm4, %v656_v63, %v660_v59  ;;  %v688_v27 = vrot.slane %v686_v12, 5  ;;  %v693_v28 = vrot.slane %v691_v17, 4 }
  0x36   : > { %v672_v11 = vshll.u32 %v596_v61, 16  ;;  %v2277_v24 = vcombine.low %v647_v13, %v661_v15  ;;  %v696_v31 = vrot.slane %v694_v54, 5  ;;  %v710_v33 = vrot.slane %v708_v21, 5  ;;  %v2562_v57 = vld [vmem:[%s2682_s20] ss:$8 sps:$4 sm:$0xff]  }
  0x37   : > { %v714_v38 = vshll.u32 %v602_v34, 16  ;;  %v1856_v45 = vsel %vm387_vm0, %v2793_v22, 0  ;;  %v2357_v22 = vld [vmem:[%s2712_s27 + $0x8] sm:$0xf]  ;;  %v1726_v56 = vshll.u32 %v2359_v51, 16 }
  0x38   : > { %v697_v19 = vor.u32 %v696_v31, %v693_v28  ;;  %v1709_v52 = vshrl.u32 %v2357_v22, 16  ;;  %v1712_v53 = vshll.u32 %v2357_v22, 16  ;;  %v2563_v14 = vld [vmem:[%s2661_s12 + $0x28] ss:$8 sps:$4 sm:$0xff]   ;;  %v2358_v62 = vld [vmem:[%s2712_s27 + $0xc] sm:$0x1] }
  0x39   : > { %v716_v44 = vrot.slane %v714_v38, 5  ;;  %v1728_v61 = vrot.slane %v1726_v56, 5  ;;  %v2360_v63 = vld [vmem:[%s2712_s27 + $0x14] sm:$0x1]  ;;  %v2564_v13 = vld [vmem:[%s2682_s20 + $0x10] ss:$8 sps:$4 sm:$0xff]  }
  0x3a   : > { %2272 = vmatmul.mubr.msk.bf16.gmra.mrb[4].mxu1 %vm374_vm1, %v2553_v1  ;;  %v668_v1 = vrot.slane %v666_v55, 5  ;;  %v698_v41 = vrot.slane %v697_v19, 4  ;;  %v1723_v55 = vshrl.u32 %v2359_v51, 16  ;;  %v1711_v58 = vrot.slane %v1709_v52, 4  ;;  %v2565_v15 = vld [vmem:[%s2661_s12 + $0x38] ss:$8 sps:$4 sm:$0xff]  }
  0x3b   : > { %2318 = vmatmul.mubr.msk.bf16.gmra.mrb[12].mxu0 %vm374_vm1, %v2312_v2  ;;  %566 = vmatprep.mubr.bf16.mxu1 %v2578_v4  ;;  %v2558_v2 = vld [vmem:[%s2712_s27 + $0x28] ss:$8 sps:$4 sm:$0xff]   ;;  %v1714_v59 = vrot.slane %v1712_v53, 5  ;;  %v1732_v8 = vshll.u32 %v2360_v63, 16  ;;  %s2396_s12 = sshll.u32 %s2958_s22, 2 }
  0x3c   : > { %1488 = vmatprep.mubr.bf16.mxu0 %v2578_v4  ;;  %v669_v16 = vor.u32 %v668_v1, %v665_v0  ;;  %v2361_v0 = vld [vmem:[%s2712_s27 + $0x18] sm:$0xf]  ;;  %v2363_v1 = vld [vmem:[%s2712_s27 + $0x20] sm:$0xf]  ;;  %s324_s15 = scalar_lea.vmem %s2954_s6, %s2396_s12 }
  0x3d   : > { %v1740_v10 = vshll.u32 %v2361_v0, 16  ;;  %v1754_v12 = vshll.u32 %v2363_v1, 16  ;;  %v1734_v54 = vrot.slane %v1732_v8, 5  ;;  %v2566_v19 = vld [vmem:[%s2682_s20 + $0x20] ss:$8 sps:$4 sm:$0xff]  }
  0x3e   : > { %v670_v26 = vrot.slane %v669_v16, 4 }
  0x42   : > { %2273 = vmatmul.mubr.msk.bf16.gmra.mrb[8].mxu1 %vm374_vm1, %v2554_v18  ;;  %v683_v18 = vor.u32 %v682_v7, %v679_v3  ;;  %v1718_v3 = vshll.u32 %v2358_v62, 16 }
  0x43   : > { %2334 = vmatmul.mubr.msk.bf16.vlgmr.msra.gmra.mrb[0].mxu0 %vm374_vm1, %v2555_v23  ;;  %576 = vmatprep.mubr.bf16.mxu1 %v2578_v4  ;;  %v674_v23 = vrot.slane %v672_v11, 5  ;;  %v1751_v11 = vshrl.u32 %v2363_v1, 16  ;;  %v2370_v1 = vld [vmem:[%s2712_s27 + $0x3c] sm:$0x1] }
  0x44   : > { %1604 = vmatpush1.bf16.msra.mxu0 %v1598_v25  ;;  %1498 = vmatprep.mubr.bf16.mxu0 %v2578_v4  ;;  %v2559_v25 = vld [vmem:[%s2712_s27 + $0x38] ss:$8 sps:$4 sm:$0xff]   ;;  %v684_v29 = vrot.slane %v683_v18, 4  ;;  %v1720_v17 = vrot.slane %v1718_v3, 5 }
  0x45   : > { %2379 = vmatprep.subr.msk.bf16.mxu0 %vm387_vm0, %v1842_v32  ;;  %v707_v32 = vrot.slane %v705_v20, 4  ;;  %v675_v36 = vsel %vm2721_vm4, %v670_v26, %v674_v23  ;;  %v2362_v20 = vld [vmem:[%s2712_s27 + $0x1c] sm:$0x1]  ;;  %v1742_v23 = vrot.slane %v1740_v10, 5  ;;  %v2365_v26 = vld [vmem:[%s2712_s27 + $0x28] sm:$0xf] }
  0x46   : > { %v1765_v34 = vshrl.u32 %v2365_v26, 16 }
  0x47   : > { %v711_v37 = vor.u32 %v710_v33, %v707_v32 }
  0x4a   : > { %2274 = vmatmul.mubr.msk.bf16.gmra.mrb[12].mxu1 %vm374_vm1, %v2556_v35  ;;  %v700_v35 = vshll.u32 %v600_v30, 16  ;;  %v1746_v30 = vshll.u32 %v2362_v20, 16 }
  0x4b   : > { %2335 = vmatmul.mubr.msk.bf16.gmra.mrb[4].mxu0 %vm374_vm1, %v2557_v43  ;;  %791 = vmatprep.mubr.bf16.mxu1 %v2578_v4  ;;  %v712_v43 = vrot.slane %v711_v37, 4 }
  0x4c   : > { %1508 = vmatprep.mubr.bf16.mxu0 %v2578_v4  ;;  %v702_v42 = vrot.slane %v700_v35, 5  ;;  %v1748_v38 = vrot.slane %v1746_v30, 5 }
  0x4d   : > { %v717_v48 = vsel %vm2721_vm4, %v712_v43, %v716_v44  ;;  %v2368_v43 = vld [vmem:[%s2712_s27 + $0x34] sm:$0x1]  ;;  %v1767_v44 = vrot.slane %v1765_v34, 4 }
  0x4e   : > { %v703_v47 = vsel %vm2721_vm4, %v698_v41, %v702_v42  ;;  %v1788_v51 = vshll.u32 %v2368_v43, 16 }
  0x4f   : > { %v2279_v49 = vcombine.low %v703_v47, %v717_v48 }
  0x52   : > { %2282 = vmatmul.mubr.msk.bf16.vlgmr.msra.gmra.mrb[0].mxu1 %vm374_vm1, %v2276_v60  ;;  %v1725_v60 = vrot.slane %v1723_v55, 4 }
  0x53   : > { %906 = vmatpush1.bf16.msra.mxu1 %v900_v9  ;;  %2336 = vmatmul.mubr.msk.bf16.gmra.mrb[8].mxu0 %vm374_vm1, %v2558_v2  ;;  %v1715_v2 = vor.u32 %v1714_v59, %v1711_v58  ;;  %v1737_v9 = vshrl.u32 %v2361_v0, 16  ;;  %v1790_v0 = vrot.slane %v1788_v51, 5 }
  0x54   : > { %801 = vmatprep.mubr.bf16.mxu1 %v2578_v4  ;;  %1518 = vmatprep.mubr.bf16.mxu0 %v2578_v4  ;;  %v1729_v7 = vor.u32 %v1728_v61, %v1725_v60  ;;  %v2567_v61 = vld [vmem:[%s2682_s20 + $0x30] ss:$8 sps:$4 sm:$0xff]  }
  0x55   : > { %2405 = vmatprep.subr.msk.bf16.mxu1 %vm387_vm0, %v2632_v5  ;;  %v689_v5 = vsel %vm2721_vm4, %v684_v29, %v688_v27  ;;  %v1716_v16 = vrot.slane %v1715_v2, 4  ;;  %v1739_v21 = vrot.slane %v1737_v9, 4  ;;  %v2367_v27 = vld [vmem:[%s2712_s27 + $0x30] sm:$0xf] }
  0x56   : > { %v2278_v39 = vcombine.low %v675_v36, %v689_v5  ;;  %v1730_v18 = vrot.slane %v1729_v7, 4  ;;  %v1768_v36 = vshll.u32 %v2365_v26, 16  ;;  %v1779_v35 = vshrl.u32 %v2367_v27, 16  ;;  %v2372_v7 = vld [vmem:[%s2712_s27 + $0x44] sm:$0x1] }
  0x57   : > { %v1721_v28 = vsel %vm2721_vm4, %v1716_v16, %v1720_v17  ;;  %v1743_v32 = vor.u32 %v1742_v23, %v1739_v21  ;;  %v1782_v5 = vshll.u32 %v2367_v27, 16  ;;  %v2569_v26 = vld [vmem:[%s2675_s17 + $0x30] ss:$8 sps:$4 sm:$0xff]  }
  0x58   : > { %v1735_v29 = vsel %vm2721_vm4, %v1730_v18, %v1734_v54  ;;  %v1781_v47 = vrot.slane %v1779_v35, 4  ;;  %v2568_v18 = vld [vmem:[%s2675_s17 + $0x20] ss:$8 sps:$4 sm:$0xff]  }
  0x59   : > { %v2374_v37 = vcombine.low %v1721_v28, %v1735_v29  ;;  %v1744_v41 = vrot.slane %v1743_v32, 4  ;;  %v1784_v48 = vrot.slane %v1782_v5, 5 }
  0x5a   : > { %2283 = vmatmul.mubr.msk.bf16.gmra.mrb[4].mxu1 %vm374_vm1, %v2277_v24  ;;  %v1753_v24 = vrot.slane %v1751_v11, 4  ;;  %v1802_v11 = vshll.u32 %v2370_v1, 16 }
  0x5b   : > { %2337 = vmatmul.mubr.msk.bf16.gmra.mrb[12].mxu0 %vm374_vm1, %v2559_v25  ;;  %811 = vmatprep.mubr.bf16.mxu1 %v2578_v4  ;;  %v1756_v25 = vrot.slane %v1754_v12, 5  ;;  %v1749_v52 = vsel %vm2721_vm4, %v1744_v41, %v1748_v38  ;;  %v1816_v12 = vshll.u32 %v2372_v7, 16 }
  0x5c   : > { %1635 = vmatprep.mubr.bf16.mxu0 %v2578_v4 }
  0x5d   : > { %v1757_v33 = vor.u32 %v1756_v25, %v1753_v24  ;;  %v1818_v23 = vrot.slane %v1816_v12, 5 }
  0x5f   : > { %v1758_v42 = vrot.slane %v1757_v33, 4 }
  0x62   : > { %2284 = vmatmul.mubr.msk.bf16.gmra.mrb[8].mxu1 %vm374_vm1, %v2278_v39 }
  0x63   : > { %2353 = vmatmul.mubr.msk.bf16.vlgmr.msra.gmra.mrb[0].mxu0 %vm374_vm1, %v2560_v40  ;;  %821 = vmatprep.mubr.bf16.mxu1 %v2578_v4  ;;  %v2366_v40 = vld [vmem:[%s2712_s27 + $0x2c] sm:$0x1] }
  0x64   : > { %1862 = vmatpush1.bf16.msra.mxu0 %v1856_v45  ;;  %1645 = vmatprep.mubr.bf16.mxu0 %v2578_v4  ;;  %v1770_v45 = vrot.slane %v1768_v36, 5  ;;  %v1774_v22 = vshll.u32 %v2366_v40, 16 }
  0x66   : > { %v1771_v55 = vor.u32 %v1770_v45, %v1767_v44 }
  0x68   : > { %v1772_v63 = vrot.slane %v1771_v55, 4 }
  0x6a   : > { %2285 = vmatmul.mubr.msk.bf16.gmra.mrb[12].mxu1 %vm374_vm1, %v2279_v49  ;;  %v2369_v49 = vld [vmem:[%s2712_s27 + $0x38] sm:$0xf] }
  0x6b   : > { %2354 = vmatmul.mubr.msk.bf16.gmra.mrb[4].mxu0 %vm374_vm1, %v2561_v50  ;;  %937 = vmatprep.mubr.bf16.mxu1 %v2578_v4  ;;  %v2371_v50 = vld [vmem:[%s2712_s27 + $0x40] sm:$0xf]  ;;  %v1793_v56 = vshrl.u32 %v2369_v49, 16  ;;  %v1796_v58 = vshll.u32 %v2369_v49, 16 }
  0x6c   : > { %1655 = vmatprep.mubr.bf16.mxu0 %v2578_v4  ;;  %v1807_v59 = vshrl.u32 %v2371_v50, 16  ;;  %v1810_v60 = vshll.u32 %v2371_v50, 16 }
  0x6d   : > { %v1795_v2 = vrot.slane %v1793_v56, 4  ;;  %v1798_v8 = vrot.slane %v1796_v58, 5 }
  0x6e   : > { %v1809_v9 = vrot.slane %v1807_v59, 4  ;;  %v1812_v10 = vrot.slane %v1810_v60, 5 }
  0x6f   : > { %v1799_v16 = vor.u32 %v1798_v8, %v1795_v2 }
  0x70   : > { %v1813_v17 = vor.u32 %v1812_v10, %v1809_v9 }
  0x71   : > { %v1800_v20 = vrot.slane %v1799_v16, 4 }
  0x72   : > { %2293 = vmatmul.mubr.msk.bf16.vlgmr.msra.gmra.mrb[0].mxu1 %vm374_vm1, %v2562_v57  ;;  %v1785_v57 = vor.u32 %v1784_v48, %v1781_v47  ;;  %v1814_v21 = vrot.slane %v1813_v17, 4 }
  0x73   : > { %2406 = vmatpush1.bf16.msra.mxu1 %v2635_v6  ;;  %2355 = vmatmul.mubr.msk.bf16.gmra.mrb[8].mxu0 %vm374_vm1, %v2563_v14  ;;  %v2364_v6 = vld [vmem:[%s2712_s27 + $0x24] sm:$0x1]  ;;  %v1776_v14 = vrot.slane %v1774_v22, 5 }
  0x74   : > { %947 = vmatprep.mubr.bf16.mxu1 %v2578_v4  ;;  %1665 = vmatprep.mubr.bf16.mxu0 %v2578_v4  ;;  %v1760_v31 = vshll.u32 %v2364_v6, 16  ;;  %v1786_v3 = vrot.slane %v1785_v57, 4  ;;  %v1804_v6 = vrot.slane %v1802_v11, 5  ;;  %v1819_v25 = vsel %vm2721_vm4, %v1814_v21, %v1818_v23 }
  0x76   : > { %v1762_v39 = vrot.slane %v1760_v31, 5  ;;  %v1805_v24 = vsel %vm2721_vm4, %v1800_v20, %v1804_v6 }
  0x77   : > { %v2377_v27 = vcombine.low %v1805_v24, %v1819_v25 }
  0x78   : > { %v1763_v53 = vsel %vm2721_vm4, %v1758_v42, %v1762_v39 }
  0x79   : > { %v2375_v62 = vcombine.low %v1749_v52, %v1763_v53 }
  0x7a   : > { %2294 = vmatmul.mubr.msk.bf16.gmra.mrb[4].mxu1 %vm374_vm1, %v2564_v13  ;;  %v1777_v13 = vsel %vm2721_vm4, %v1772_v63, %v1776_v14 }
  0x7b   : > { %2356 = vmatmul.mubr.msk.bf16.gmra.mrb[12].mxu0 %vm374_vm1, %v2565_v15  ;;  %957 = vmatprep.mubr.bf16.mxu1 %v2578_v4  ;;  %v1791_v15 = vsel %vm2721_vm4, %v1786_v3, %v1790_v0 }
  0x7c   : > { %1893 = vmatprep.mubr.bf16.mxu0 %v2578_v4  ;;  %v2376_v54 = vcombine.low %v1777_v13, %v1791_v15 }
  0x82   : > { %2295 = vmatmul.mubr.msk.bf16.gmra.mrb[8].mxu1 %vm374_vm1, %v2566_v19 }
  0x83   : > { %2380 = vmatmul.mubr.msk.bf16.vlgmr.msra.gmra.mrb[0].mxu0 %vm374_vm1, %v2374_v37  ;;  %967 = vmatprep.mubr.bf16.mxu1 %v2578_v4 }
  0x84   : > { %1903 = vmatprep.mubr.bf16.mxu0 %v2578_v4 }
  0x8a   : > { %2296 = vmatmul.mubr.msk.bf16.gmra.mrb[12].mxu1 %vm374_vm1, %v2567_v61 }
  0x8b   : > { %2381 = vmatmul.mubr.msk.bf16.gmra.mrb[4].mxu0 %vm374_vm1, %v2375_v62  ;;  %1103 = vmatprep.mubr.bf16.mxu1 %v2578_v4 }
  0x8c   : > { %1913 = vmatprep.mubr.bf16.mxu0 %v2578_v4 }
  0x92   : > { %2306 = vmatmul.mubr.msk.bf16.vlgmr.msra.gmra.mrb[8].mxu1 %vm374_vm1, %v2568_v18 }
  0x93   : > { %2382 = vmatmul.mubr.msk.bf16.gmra.mrb[8].mxu0 %vm374_vm1, %v2376_v54  ;;  %1113 = vmatprep.mubr.bf16.mxu1 %v2578_v4 }
  0x94   : > { %1923 = vmatprep.mubr.bf16.mxu0 %v2578_v4 }
  0x9a   : > { %2307 = vmatmul.mubr.msk.bf16.gmra.mrb[12].mxu1 %vm374_vm1, %v2569_v26 }
  0x9b   : > { %2383 = vmatmul.mubr.msk.bf16.gmra.mrb[12].mxu0 %vm374_vm1, %v2377_v27 }
 0x145   : > { %v939_v28 = vpop.f32.mrb[0].mxu1 }
 0x146   : > { %v941_v29 = vpop.f32.mrb[1].mxu1 }
 0x147   : > { %v943_v30 = vpop.f32.mrb[2].mxu1 }
 0x148   : > { %v945_v31 = vpop.f32.mrb[3].mxu1 }
 0x14d   : > { %v949_v32 = vpop.f32.mrb[4].mxu1 }
 0x14e   : > { %v951_v33 = vpop.f32.mrb[5].mxu1 }
 0x14f   : > { %v953_v4 = vpop.f32.mrb[6].mxu1 }
 0x150   : > { %v955_v34 = vpop.f32.mrb[7].mxu1 }
 0x156   : > { %v1895_v36 = vpop.f32.mrb[0].mxu0 }
 0x157   : > { %v2407_v35 = vadd.f32 %v1895_v36, %v939_v28  ;;  %v1897_v5 = vpop.f32.mrb[1].mxu0 }
 0x158   : > { %v2408_v46 = vadd.f32 %v1897_v5, %v941_v29  ;;  %v1899_v19 = vpop.f32.mrb[2].mxu0 }
 0x159   : > { %v2409_v37 = vadd.f32 %v1899_v19, %v943_v30  ;;  %v1901_v38 = vpop.f32.mrb[3].mxu0  ;;  %v2055_v41 = vmul.f32 %v2407_v35, %v2407_v35 }
 0x15a   : > { %v2397_v39 = vpack.c.bf16 %v2408_v46, %v2407_v35  ;;  %v2410_v40 = vadd.f32 %v1901_v38, %v945_v31  ;;  %v2056_v44 = vmul.f32 %v2408_v46, %v2408_v46 }
 0x15b   : > { %v2006_v42 = vadd.f32 %v2409_v37, %v2407_v35  ;;  %v2057_v43 = vmul.f32 %v2409_v37, %v2409_v37 }
 0x15c   : > { %1998 = vst [vmem:[%s2931_s11] sm:$0xff] %v2397_v39  ;;  %v2398_v45 = vpack.c.bf16 %v2410_v40, %v2409_v37  ;;  %v2019_v47 = vadd.f32 %v2410_v40, %v2408_v46  ;;  %v2058_v48 = vmul.f32 %v2410_v40, %v2410_v40 }
 0x15d   : > { %v2071_v49 = vadd.f32 %v2057_v43, %v2055_v41 }
 0x15e   : > { %1999 = vst [vmem:[%s2931_s11 + $0x8] sm:$0xff] %v2398_v45  ;;  %v2084_v50 = vadd.f32 %v2058_v48, %v2056_v44  ;;  %v1905_v22 = vpop.f32.mrb[4].mxu0 }
 0x15f   : > { %v2411_v51 = vadd.f32 %v1905_v22, %v949_v32  ;;  %v1907_v52 = vpop.f32.mrb[5].mxu0 }
 0x160   : > { %v2412_v53 = vadd.f32 %v1907_v52, %v951_v33  ;;  %v1909_v55 = vpop.f32.mrb[6].mxu0 }
 0x161   : > { %v2007_v56 = vadd.f32 %v2411_v51, %v2006_v42  ;;  %v2059_v57 = vmul.f32 %v2411_v51, %v2411_v51  ;;  %v2413_v58 = vadd.f32 %v1909_v55, %v953_v4  ;;  %v1911_v59 = vpop.f32.mrb[7].mxu0 }
 0x162   : > { %v2399_v60 = vpack.c.bf16 %v2412_v53, %v2411_v51  ;;  %v2020_v61 = vadd.f32 %v2412_v53, %v2019_v47  ;;  %v2060_v14 = vmul.f32 %v2412_v53, %v2412_v53  ;;  %v2414_v62 = vadd.f32 %v1911_v59, %v955_v34 }
 0x163   : > { %v2072_v63 = vadd.f32 %v2071_v49, %v2059_v57  ;;  %v2008_v0 = vadd.f32 %v2413_v58, %v2007_v56  ;;  %v2061_v1 = vmul.f32 %v2413_v58, %v2413_v58 }
 0x164   : > { %2000 = vst [vmem:[%s2931_s11 + $0x10] sm:$0xff] %v2399_v60  ;;  %v2085_v2 = vadd.f32 %v2084_v50, %v2060_v14  ;;  %v2400_v3 = vpack.c.bf16 %v2414_v62, %v2413_v58  ;;  %v2021_v7 = vadd.f32 %v2414_v62, %v2020_v61  ;;  %v2062_v8 = vmul.f32 %v2414_v62, %v2414_v62 }
 0x165   : > { %v2073_v9 = vadd.f32 %v2072_v63, %v2061_v1  ;;  %v1105_v10 = vpop.f32.mrb[8].mxu1  ;;  %v2579_v1 = vmov 1966171168  }
 0x166   : > { %2001 = vst [vmem:[%s2931_s11 + $0x18] sm:$0xff] %v2400_v3  ;;  %v2086_v11 = vadd.f32 %v2085_v2, %v2062_v8  ;;  %v1915_v12 = vpop.f32.mrb[8].mxu0  ;;  %v1107_v13 = vpop.f32.mrb[9].mxu1  ;;  %v2036_v2 = vunpack.c.l.s4 %v2579_v1  ;;  %v2038_v3 = vlaneseq }
 0x167   : > { %v2415_v15 = vadd.f32 %v1915_v12, %v1105_v10  ;;  %v1917_v16 = vpop.f32.mrb[9].mxu0  ;;  %v1109_v17 = vpop.f32.mrb[10].mxu1 }
 0x168   : > { %v2416_v18 = vadd.f32 %v1917_v16, %v1107_v13  ;;  %v1919_v54 = vpop.f32.mrb[10].mxu0  ;;  %v1111_v20 = vpop.f32.mrb[11].mxu1  ;;  %v2037_v16 = vunpack.c.0.s8 %v2036_v2  ;;  %vm2052_vm5 = vcmp.lt.s32.totalorder %v2038_v3, 256 }
 0x169   : > { %v2009_v6 = vadd.f32 %v2415_v15, %v2008_v0  ;;  %v2063_v21 = vmul.f32 %v2415_v15, %v2415_v15  ;;  %v2417_v23 = vadd.f32 %v1919_v54, %v1109_v17  ;;  %v1921_v24 = vpop.f32.mrb[11].mxu0  ;;  %v2039_v17 = vshrl.u32 %v2038_v3, 7 }
 0x16a   : > { %v2401_v25 = vpack.c.bf16 %v2416_v18, %v2415_v15  ;;  %v2022_v26 = vadd.f32 %v2416_v18, %v2021_v7  ;;  %v2064_v27 = vmul.f32 %v2416_v18, %v2416_v18  ;;  %v2418_v28 = vadd.f32 %v1921_v24, %v1111_v20 }
 0x16b   : > { %v2074_v29 = vadd.f32 %v2073_v9, %v2063_v21  ;;  %v2010_v30 = vadd.f32 %v2417_v23, %v2009_v6  ;;  %v2065_v31 = vmul.f32 %v2417_v23, %v2417_v23 }
 0x16c   : > { %2002 = vst [vmem:[%s2931_s11 + $0x20] sm:$0xff] %v2401_v25  ;;  %v2087_v32 = vadd.f32 %v2086_v11, %v2064_v27  ;;  %v2402_v33 = vpack.c.bf16 %v2418_v28, %v2417_v23  ;;  %v2023_v4 = vadd.f32 %v2418_v28, %v2022_v26  ;;  %v2066_v34 = vmul.f32 %v2418_v28, %v2418_v28 }
 0x16d   : > { %v2075_v36 = vadd.f32 %v2074_v29, %v2065_v31  ;;  %v1115_v35 = vpop.f32.mrb[12].mxu1  ;;  %v2040_v26 = vsub.s32 %v2037_v16, %v2039_v17 }
 0x16e   : > { %2003 = vst [vmem:[%s2931_s11 + $0x28] sm:$0xff] %v2402_v33  ;;  %v2088_v5 = vadd.f32 %v2087_v32, %v2066_v34  ;;  %v1925_v46 = vpop.f32.mrb[12].mxu0  ;;  %v1117_v19 = vpop.f32.mrb[13].mxu1 }
 0x16f   : > { %v2419_v37 = vadd.f32 %v1925_v46, %v1115_v35  ;;  %v1927_v38 = vpop.f32.mrb[13].mxu0  ;;  %v1119_v39 = vpop.f32.mrb[14].mxu1 }
 0x170   : > { %v2420_v40 = vadd.f32 %v1927_v38, %v1117_v19  ;;  %v1929_v41 = vpop.f32.mrb[14].mxu0  ;;  %v1121_v42 = vpop.f32.mrb[15].mxu1 }
 0x171   : > { %v2011_v43 = vadd.f32 %v2419_v37, %v2010_v30  ;;  %v2067_v44 = vmul.f32 %v2419_v37, %v2419_v37  ;;  %v2421_v45 = vadd.f32 %v1929_v41, %v1119_v39  ;;  %v1931_v47 = vpop.f32.mrb[15].mxu0 }
 0x172   : > { %v2403_v48 = vpack.c.bf16 %v2420_v40, %v2419_v37  ;;  %v2024_v49 = vadd.f32 %v2420_v40, %v2023_v4  ;;  %v2068_v50 = vmul.f32 %v2420_v40, %v2420_v40  ;;  %v2422_v22 = vadd.f32 %v1931_v47, %v1121_v42 }
 0x173   : > { %v2076_v51 = vadd.f32 %v2075_v36, %v2067_v44  ;;  %v2012_v52 = vadd.f32 %v2421_v45, %v2011_v43  ;;  %v2069_v53 = vmul.f32 %v2421_v45, %v2421_v45 }
 0x174   : > { %2004 = vst [vmem:[%s2931_s11 + $0x30] sm:$0xff] %v2403_v48  ;;  %v2089_v55 = vadd.f32 %v2088_v5, %v2068_v50  ;;  %v2404_v56 = vpack.c.bf16 %v2422_v22, %v2421_v45  ;;  %v2025_v57 = vadd.f32 %v2422_v22, %v2024_v49  ;;  %v2070_v58 = vmul.f32 %v2422_v22, %v2422_v22 }
 0x175   : > { %v2013_v59 = vrot.slane %v2012_v52, 4  ;;  %v2077_v60 = vadd.f32 %v2076_v51, %v2069_v53 }
 0x176   : > { %2005 = vst [vmem:[%s2931_s11 + $0x38] sm:$0xff] %v2404_v56  ;;  %v2026_v61 = vrot.slane %v2025_v57, 4  ;;  %v2090_v14 = vadd.f32 %v2089_v55, %v2070_v58 }
 0x177   : > { %v2014_v62 = vadd.f32 %v2013_v59, %v2012_v52  ;;  %v2078_v63 = vrot.slane %v2077_v60, 4 }
 0x178   : > { %v2027_v0 = vadd.f32 %v2026_v61, %v2025_v57  ;;  %v2091_v7 = vrot.slane %v2090_v14, 4 }
 0x179   : > { %v2015_v8 = vrot.slane %v2014_v62, 2  ;;  %v2079_v9 = vadd.f32 %v2078_v63, %v2077_v60 }
 0x17a   : > { %v2028_v10 = vrot.slane %v2027_v0, 2  ;;  %v2092_v11 = vadd.f32 %v2091_v7, %v2090_v14 }
 0x17b   : > { %v2016_v12 = vadd.f32 %v2015_v8, %v2014_v62  ;;  %v2080_v13 = vrot.slane %v2079_v9, 2 }
 0x17c   : > { %v2029_v15 = vadd.f32 %v2028_v10, %v2027_v0  ;;  %v2093_v18 = vrot.slane %v2092_v11, 2 }
 0x17d   : > { %v2017_v54 = vrot.slane %v2016_v12, 1  ;;  %v2081_v20 = vadd.f32 %v2080_v13, %v2079_v9 }
 0x17e   : > { %v2030_v6 = vrot.slane %v2029_v15, 1  ;;  %v2094_v21 = vadd.f32 %v2093_v18, %v2092_v11 }
 0x17f   : > { %v2018_v23 = vadd.f32 %v2017_v54, %v2016_v12  ;;  %v2082_v24 = vrot.slane %v2081_v20, 1 }
 0x180   : > { %v2031_v25 = vadd.f32 %v2030_v6, %v2029_v15  ;;  %v2095_v27 = vrot.slane %v2094_v21, 1 }
 0x181   : > { %v2083_v28 = vadd.f32 %v2082_v24, %v2081_v20 }
 0x182   : > { %v2034_v29 = vcombine.low %v2018_v23, %v2031_v25  ;;  %v2096_v30 = vadd.f32 %v2095_v27, %v2094_v21 }
 0x184   : > { %v2041_v31 = vrot.slane %v2034_v29, %v2040_v26  ;;  %v2099_v32 = vcombine.low %v2083_v28, %v2096_v30 }
 0x186   : > { %v2048_v33 = vrot.slane %v2041_v31, %v2040_v26  ;;  %v2106_v4 = vrot.slane %v2099_v32, %v2040_v26 }
 0x188   : > { %2054 = vst.msk [vmem:[%s324_s15] ss:$2 sm:$0x3] %vm2052_vm5, %v2048_v33  ;;  %v2113_v34 = vrot.slane %v2106_v4, %v2040_v26 }
 0x18a   : > { %2392 = vst.msk [vmem:[%s324_s15 + $0x1] ss:$2 sm:$0x3] %vm2052_vm5, %v2113_v34 }
 0x18b PF: > { %s17_s21 = sadd.s32 1, %s2576_s21  }
 0x18c   : > { %p14_p4 = scmp.ge.s32.totalorder %s17_s21, 4  }
 0x18e   :  { %16 = sbr.rel (!%p14_p4) target bundleno = 1 (0x1), region = 102 }

// kernel: basic_block_forward.7
= control target key start
LH: loop header
LB: loop body
LE: loop exit
PB: predicated region body
PF: predicated region fallthrough
CT: control target
= control target key end

     0   :  { %s756_s21 = smov 0   ;;  %s758_s22 = smov 0   ;;  %s842_s0 = inlined_call_operand.vmem [shape: bf16[2,64,128], index: 0, kind: input, shape index: {}]   ;;  %s843_s1 = inlined_call_operand.vmem [shape: f32[1,1,128], index: 1, kind: input, shape index: {}]   ;;  %s844_s2 = inlined_call_operand.vmem [shape: f32[1,1,128], index: 2, kind: input, shape index: {}]   ;;  %s845_s3 = inlined_call_operand.vmem [shape: bf16[2,64,256], index: 3, kind: input, shape index: {}]   ;;  %s846_s4 = inlined_call_operand.vmem [shape: f32[1,1,128], index: 4, kind: input, shape index: {}]   ;;  %s847_s5 = inlined_call_operand.vmem [shape: f32[1,1,128], index: 5, kind: input, shape index: {}]   ;;  %s848_s6 = inlined_call_operand.vmem [shape: bf16[2,64,128], index: 6, kind: output, shape index: {}]  }
   0x1   :  { %s760_s23 = smov 0  }
   0x2 LB: > { %s566_s24 = sadd.s32 4294967295, %s719_s23   ;;  %s773_s25 = sadd.s32 1, %s719_s23   ;;  %s719_s23 = sphi %s760_s23, %s851_s23   ;;  %s715_s22 = sphi %s758_s22, %s850_s22   ;;  %s711_s21 = sphi %s756_s21, %s849_s21  }
   0x3   : > { %s88_s26 = ssub.s32 %s719_s23, %s773_s25  ;;  %s91_s27 = sadd.s32 1, %s715_s22 }
   0x4   : > { %p89_p0 = scmp.eq.s32.totalorder %s88_s26, 0  ;;  %p98_p1 = scmp.ne.s32.totalorder %s715_s22, %s711_s21 }
   0x5   : > { %p99_p2 = scmp.eq.s32.totalorder %s719_s23, 0  ;;  %p569_p4 = scmp.ge.s32.totalorder %s719_s23, 2 }
   0x6   : > { %s782_s28 = scalar_select %p89_p0, %s715_s22, %s91_s27  }
   0x7   : > { %p100_p3 = por %p99_p2, %p98_p1  ;;  %204 = sbr.rel (%p569_p4) target bundleno = 23 (0x17), region = 32 }
   0xe   : > { %215 = sbr.rel (!%p100_p3) target bundleno = 23 (0x17), region = 40  ;;  %s217_s29 = sand.u32 (%p100_p3), 1, %s715_s22  }
   0xf   : > { %s601_s30 = sshll.u32 (%p100_p3), %s719_s23, 6  ;;  %s570_s7 = sshll.u32 (%p100_p3), %s217_s29, 5 }
  0x10   : > { %s518_s10 = scalar_lea.vmem (%p100_p3), %s845_s3, %s601_s30  ;;  %s219_s11 = scalar_lea.vmem (%p100_p3), [#allocation2], %s570_s7 }
  0x11   : > { %v573_v0 = vld [vmem:[%s518_s10 + $0x4] sm:$0xf] (%p100_p3)  ;;  %v574_v1 = vld [vmem:[%s518_s10 + $0xc] sm:$0xf] (%p100_p3)  ;;  %v575_v2 = vld [vmem:[%s518_s10 + $0x14] sm:$0xf] (%p100_p3) }
  0x12   : > { %240 = vst [vmem:[%s219_s11] sm:$0xf] (%p100_p3), %v573_v0  ;;  %242 = vst [vmem:[%s219_s11 + $0x4] sm:$0xf] (%p100_p3), %v574_v1  ;;  %v576_v3 = vld [vmem:[%s518_s10 + $0x1c] sm:$0xf] (%p100_p3) }
  0x13   : > { %v577_v4 = vld [vmem:[%s518_s10 + $0x24] sm:$0xf] (%p100_p3)  ;;  %244 = vst [vmem:[%s219_s11 + $0x8] sm:$0xf] (%p100_p3), %v575_v2  ;;  %246 = vst [vmem:[%s219_s11 + $0xc] sm:$0xf] (%p100_p3), %v576_v3 }
  0x14   : > { %248 = vst [vmem:[%s219_s11 + $0x10] sm:$0xf] (%p100_p3), %v577_v4  ;;  %v578_v5 = vld [vmem:[%s518_s10 + $0x2c] sm:$0xf] (%p100_p3)  ;;  %v579_v6 = vld [vmem:[%s518_s10 + $0x34] sm:$0xf] (%p100_p3) }
  0x15   : > { %v580_v7 = vld [vmem:[%s518_s10 + $0x3c] sm:$0xf]  ;;  %250 = vst [vmem:[%s219_s11 + $0x14] sm:$0xf] %v578_v5  ;;  %252 = vst [vmem:[%s219_s11 + $0x18] sm:$0xf] %v579_v6 }
  0x16   : > { %254 = vst [vmem:[%s219_s11 + $0x1c] sm:$0xf] %v580_v7 }
  0x17 PF: > { %p581_p5 = scmp.ge.s32.totalorder %s719_s23, 1  ;;  %p292_p6 = scmp.lt.s32.totalorder %s719_s23, 3 }
  0x19   : > { %p293_p7 = pnand %p581_p5, %p292_p6 }
  0x1a   : > { %s299_s12 = sand.u32 (!%p293_p7), 1, %s711_s21   ;;  %p333_p8 = scmp.lt.s32.totalorder (!%p293_p7), %s566_s24, 1  ;;  %v589_v8 = vld [vmem:[%s846_s4] ss:$0 sm:$0xff] (!%p293_p7) }
  0x1b   : > { %296 = sbr.rel (%p293_p7) target bundleno = 52 (0x34), region = 81  ;;  %s582_s13 = sshll.u32 (!%p293_p7), %s299_s12, 5  ;;  %v806_v17 = vld [vmem:[%s847_s5] ss:$0 sm:$0xff] (!%p293_p7) }
  0x1c   : > { %s301_s16 = scalar_lea.vmem (!%p293_p7), [#allocation2], %s582_s13  ;;  %v587_v22 = vld [vmem:[%s843_s1] ss:$0 sm:$0xff] (!%p293_p7) }
  0x1d   : > { %v629_v9 = vld [vmem:[%s301_s16] sm:$0xff] (!%p293_p7)   ;;  %v667_v10 = vld [vmem:[%s301_s16 + $0x8] sm:$0xff] (!%p293_p7)   ;;  %v668_v11 = vld [vmem:[%s301_s16 + $0x10] sm:$0xff] (!%p293_p7)  }
  0x1e   : > { %v630_v12 = vunpack.c.l.bf16 (!%p293_p7), %v629_v9  ;;  %v631_v13 = vunpack.c.h.bf16 (!%p293_p7), %v629_v9  ;;  %v634_v14 = vunpack.c.l.bf16 (!%p293_p7), %v667_v10  ;;  %v635_v15 = vunpack.c.h.bf16 (!%p293_p7), %v667_v10  ;;  %v669_v16 = vld [vmem:[%s301_s16 + $0x18] sm:$0xff] (!%p293_p7)   ;;  %v588_v38 = vld [vmem:[%s844_s2] ss:$0 sm:$0xff] (!%p293_p7) }
  0x1f   : > { %v638_v18 = vunpack.c.l.bf16 (!%p293_p7), %v668_v11  ;;  %v639_v19 = vunpack.c.h.bf16 (!%p293_p7), %v668_v11  ;;  %v642_v20 = vunpack.c.l.bf16 (!%p293_p7), %v669_v16  ;;  %v643_v21 = vunpack.c.h.bf16 (!%p293_p7), %v669_v16 }
  0x20   : > { %v412_v23 = vmul.f32 (!%p293_p7), %v630_v12, %v589_v8  ;;  %v413_v24 = vmul.f32 (!%p293_p7), %v631_v13, %v589_v8  ;;  %v414_v25 = vmul.f32 (!%p293_p7), %v634_v14, %v589_v8  ;;  %v415_v26 = vmul.f32 (!%p293_p7), %v635_v15, %v589_v8 }
  0x21   : > { %v416_v30 = vmul.f32 (!%p293_p7), %v638_v18, %v589_v8  ;;  %v417_v31 = vmul.f32 (!%p293_p7), %v639_v19, %v589_v8  ;;  %v418_v32 = vmul.f32 (!%p293_p7), %v642_v20, %v589_v8  ;;  %v419_v33 = vmul.f32 (!%p293_p7), %v643_v21, %v589_v8 }
  0x22   : > { %s853_s24 = smov (!%p333_p8, %s566_s24), 1  ;;  %v427_v36 = vadd.f32 %v806_v17, %v412_v23  ;;  %v428_v37 = vadd.f32 %v806_v17, %v413_v24  ;;  %v429_v41 = vadd.f32 %v806_v17, %v414_v25  ;;  %v430_v42 = vadd.f32 %v806_v17, %v415_v26 }
  0x23   : > { %s602_s17 = sshll.u32 %s853_s24, 5  ;;  %v431_v50 = vadd.f32 %v806_v17, %v416_v30  ;;  %v432_v51 = vadd.f32 %v806_v17, %v417_v31  ;;  %v433_v15 = vadd.f32 %v806_v17, %v418_v32  ;;  %v434_v18 = vadd.f32 %v806_v17, %v419_v33 }
  0x24   : > { %s337_s23 = scalar_lea.vmem %s842_s0, %s602_s17  ;;  %s342_s9 = scalar_lea.vmem %s848_s6, %s602_s17 }
  0x25   : > { %v613_v27 = vld [vmem:[%s337_s23] sm:$0xff]   ;;  %v664_v28 = vld [vmem:[%s337_s23 + $0x8] sm:$0xff]   ;;  %v665_v29 = vld [vmem:[%s337_s23 + $0x10] sm:$0xff]  }
  0x26   : > { %v614_v34 = vunpack.c.l.bf16 %v613_v27  ;;  %v615_v35 = vunpack.c.h.bf16 %v613_v27  ;;  %v618_v39 = vunpack.c.l.bf16 %v664_v28  ;;  %v619_v40 = vunpack.c.h.bf16 %v664_v28  ;;  %v666_v43 = vld [vmem:[%s337_s23 + $0x18] sm:$0xff]  }
  0x27   : > { %v622_v46 = vunpack.c.l.bf16 %v665_v29  ;;  %v623_v47 = vunpack.c.h.bf16 %v665_v29  ;;  %v626_v58 = vunpack.c.l.bf16 %v666_v43  ;;  %v627_v59 = vunpack.c.h.bf16 %v666_v43 }
  0x28   : > { %v366_v44 = vmul.f32 %v614_v34, %v587_v22  ;;  %v367_v45 = vmul.f32 %v615_v35, %v587_v22  ;;  %v368_v48 = vmul.f32 %v618_v39, %v587_v22  ;;  %v369_v49 = vmul.f32 %v619_v40, %v587_v22 }
  0x29   : > { %v370_v54 = vmul.f32 %v622_v46, %v587_v22  ;;  %v371_v55 = vmul.f32 %v623_v47, %v587_v22  ;;  %v372_v2 = vmul.f32 %v626_v58, %v587_v22  ;;  %v373_v3 = vmul.f32 %v627_v59, %v587_v22 }
  0x2a   : > { %v381_v52 = vadd.f32 %v588_v38, %v366_v44  ;;  %v382_v53 = vadd.f32 %v588_v38, %v367_v45  ;;  %v383_v56 = vadd.f32 %v588_v38, %v368_v48  ;;  %v384_v57 = vadd.f32 %v588_v38, %v369_v49 }
  0x2b   : > { %v385_v62 = vadd.f32 %v588_v38, %v370_v54  ;;  %v386_v63 = vadd.f32 %v588_v38, %v371_v55  ;;  %v387_v10 = vadd.f32 %v588_v38, %v372_v2  ;;  %v388_v11 = vadd.f32 %v588_v38, %v373_v3 }
  0x2c   : > { %v435_v60 = vadd.f32 %v427_v36, %v381_v52  ;;  %v436_v61 = vadd.f32 %v428_v37, %v382_v53  ;;  %v437_v0 = vadd.f32 %v429_v41, %v383_v56  ;;  %v438_v1 = vadd.f32 %v430_v42, %v384_v57 }
  0x2d   : > { %v439_v6 = vadd.f32 %v431_v50, %v385_v62  ;;  %v440_v7 = vadd.f32 %v432_v51, %v386_v63  ;;  %v441_v20 = vadd.f32 %v433_v15, %v387_v10  ;;  %v442_v21 = vadd.f32 %v434_v18, %v388_v11 }
  0x2e   : > { %v443_v4 = vmax.f32 %v435_v60, 0.0  ;;  %v444_v5 = vmax.f32 %v436_v61, 0.0  ;;  %v445_v8 = vmax.f32 %v437_v0, 0.0  ;;  %v446_v9 = vmax.f32 %v438_v1, 0.0 }
  0x2f   : > { %v447_v13 = vmax.f32 %v439_v6, 0.0  ;;  %v448_v14 = vmax.f32 %v440_v7, 0.0  ;;  %v449_v22 = vmax.f32 %v441_v20, 0.0  ;;  %v450_v23 = vmax.f32 %v442_v21, 0.0 }
  0x30   : > { %v647_v12 = vpack.c.bf16 %v444_v5, %v443_v4  ;;  %v652_v16 = vpack.c.bf16 %v446_v9, %v445_v8 }
  0x31   : > { %v657_v19 = vpack.c.bf16 %v448_v14, %v447_v13  ;;  %v662_v24 = vpack.c.bf16 %v450_v23, %v449_v22 }
  0x32   : > { %648 = vst [vmem:[%s342_s9] sm:$0xff] %v647_v12   ;;  %670 = vst [vmem:[%s342_s9 + $0x8] sm:$0xff] %v652_v16  }
  0x33   : > { %671 = vst [vmem:[%s342_s9 + $0x10] sm:$0xff] %v657_v19   ;;  %672 = vst [vmem:[%s342_s9 + $0x18] sm:$0xff] %v662_v24  }
  0x34 PF: > { %p13_p9 = scmp.ge.s32.totalorder %s773_s25, 4   ;;  %s849_s21 = smov %s715_s22 }
  0x35   : > { %s850_s22 = smov %s782_s28  ;;  %s851_s23 = smov %s773_s25 }
  0x36   :  { %15 = sbr.rel (!%p13_p9) target bundleno = 2 (0x2), region = 123 }

// kernel: basic_block_forward.6
= control target key start
LH: loop header
LB: loop body
LE: loop exit
PB: predicated region body
PF: predicated region fallthrough
CT: control target
= control target key end

     0   :  { %s3214_s12 = smov 0   ;;  %s3787_s0 = inlined_call_operand.vmem [shape: bf16[2,10,10,128], index: 0, kind: input, shape index: {}]   ;;  %s3788_s1 = inlined_call_operand.vmem [shape: bf16[9,128,128], index: 1, kind: input, shape index: {}]   ;;  %s3789_s2 = inlined_call_operand.vmem [shape: bf16[2,64,128], index: 2, kind: output, shape index: {0}]   ;;  %s3790_s3 = inlined_call_operand.vmem [shape: f32[2,2,128], index: 3, kind: output, shape index: {1}]  }
   0x1 LB: > { %s2314_s13 = sadd.s32 4294967295, %s3192_s12   ;;  %p2318_p0 = scmp.ge.s32.totalorder %s3192_s12, 1  ;;  %s3192_s12 = sphi %s3214_s12, %s14_s12  }
   0x2   : > { %p140_p1 = scmp.lt.s32.totalorder %s3192_s12, 3 }
   0x4   : > { %p141_p2 = pnand %p2318_p0, %p140_p1 }
   0x5   : > { %v3102_v0 = vld [vmem:[%s3788_s1 + $0x40] sm:$0xff] (!%p141_p2)   ;;  %p168_p3 = scmp.lt.s32.totalorder (!%p141_p2), %s2314_s13, 1  ;;  %v3104_v2 = vld [vmem:[%s3788_s1 + $0x48] sm:$0xff] (!%p141_p2)   ;;  %v3106_v4 = vld [vmem:[%s3788_s1 + $0x50] sm:$0xff] (!%p141_p2)   ;;  %vm215_vm0 = vsmask.f32 (!%p141_p2), 3328 }
   0x6   : > { %144 = sbr.rel (%p141_p2) target bundleno = 418 (0x1a2), region = 28  ;;  %v3103_v1 = vld [vmem:[%s3788_s1 + $0x100] sm:$0xff] (!%p141_p2)   ;;  %2797 = vmatprep.subr.bf16.mxu1 (!%p141_p2), %v3102_v0  ;;  %v3105_v3 = vld [vmem:[%s3788_s1 + $0x108] sm:$0xff] (!%p141_p2)   ;;  %v3107_v5 = vld [vmem:[%s3788_s1 + $0x110] sm:$0xff] (!%p141_p2)   ;;  %vm216_vm1 = vsmask.f32 (!%p141_p2), 7440 }
   0x7   : > { %2893 = vmatprep.subr.bf16.mxu0 (!%p141_p2), %v3103_v1  ;;  %2798 = vmatpush3.bf16.msra.mxu1 (!%p141_p2), %v3102_v0  ;;  %v3108_v6 = vld [vmem:[%s3788_s1 + $0x58] sm:$0xff] (!%p141_p2)   ;;  %v3110_v8 = vld [vmem:[%s3788_s1 + $0x60] sm:$0xff] (!%p141_p2)   ;;  %v3112_v10 = vld [vmem:[%s3788_s1 + $0x68] sm:$0xff] (!%p141_p2)   ;;  %vm637_vm3 = vcmask (!%p141_p2), 1042432   ;;  %vm638_vm4 = vcmask (!%p141_p2), 1046532  }
   0x8   : > { %2894 = vmatpush3.bf16.msra.mxu0 (!%p141_p2), %v3103_v1  ;;  %2799 = vmatprep.subr.bf16.mxu1 (!%p141_p2), %v3104_v2  ;;  %v3109_v7 = vld [vmem:[%s3788_s1 + $0x118] sm:$0xff] (!%p141_p2)   ;;  %v3111_v9 = vld [vmem:[%s3788_s1 + $0x120] sm:$0xff] (!%p141_p2)   ;;  %v3113_v14 = vld [vmem:[%s3788_s1 + $0x128] sm:$0xff] (!%p141_p2)  }
   0x9   : > { %2895 = vmatprep.subr.bf16.mxu0 (!%p141_p2), %v3105_v3  ;;  %v3114_v22 = vld [vmem:[%s3788_s1 + $0x70] sm:$0xff] (!%p141_p2)   ;;  %v3116_v37 = vld [vmem:[%s3788_s1 + $0x78] sm:$0xff] (!%p141_p2)   ;;  %vm3303_vm2 = vmor (!%p141_p2), %vm215_vm0, %vm216_vm1 }
   0xa   : > { %v3115_v23 = vld [vmem:[%s3788_s1 + $0x130] sm:$0xff] (!%p141_p2)   ;;  %v3117_v47 = vld [vmem:[%s3788_s1 + $0x138] sm:$0xff] (!%p141_p2)   ;;  %v3118_v63 = vld [vmem:[%s3788_s1] sm:$0xff] (!%p141_p2)  }
   0xb   : > { %2800 = vmatpush3.bf16.msra.mxu1 (!%p141_p2), %v3104_v2  ;;  %v3335_v1 = vld [vmem:[%s3788_s1 + $0x140] sm:$0xff] (!%p141_p2)   ;;  %vm3477_vm5 = vmor (!%p141_p2), %vm637_vm3, %vm638_vm4 }
   0xc   : > { %2896 = vmatpush3.bf16.msra.mxu0 (!%p141_p2), %v3105_v3  ;;  %2801 = vmatprep.subr.bf16.mxu1 (!%p141_p2), %v3106_v4  ;;  %v3182_v38 = vld [vmem:[%s3788_s1 + $0x220] sm:$0xff] (!%p141_p2)  }
   0xd   : > { %s3796_s13 = smov (!%p168_p3, %s2314_s13), 1  ;;  %2897 = vmatprep.subr.bf16.mxu0 %v3107_v5 }
   0xe   : > { %s3093_s30 = smul.u32 80, %s3796_s13  ;;  %s2322_s20 = sshll.u32 %s3796_s13, 1 }
   0xf   : > { %2802 = vmatpush3.bf16.msra.mxu1 %v3106_v4  ;;  %s181_s23 = scalar_lea.vmem %s3790_s3, %s2322_s20 }
  0x10   : > { %2898 = vmatpush3.bf16.msra.mxu0 %v3107_v5  ;;  %2803 = vmatprep.subr.bf16.mxu1 %v3108_v6  ;;  %s3258_s10 = scalar_lea.vmem %s3787_s0, %s3093_s30 }
  0x11   : > { %2899 = vmatprep.subr.bf16.mxu0 %v3109_v7  ;;  %v3264_v11 = vld [vmem:[%s3258_s10] sm:$0xf]  ;;  %v3267_v12 = vld [vmem:[%s3258_s10 + $0x8] sm:$0xf]  ;;  %v3270_v13 = vld [vmem:[%s3258_s10 + $0x4] sm:$0x1] }
  0x12   : > { %v3276_v15 = vld [vmem:[%s3258_s10 + $0xc] sm:$0x1]  ;;  %v219_v16 = vshrl.u32 %v3264_v11, 16  ;;  %v222_v17 = vshll.u32 %v3264_v11, 16  ;;  %v228_v18 = vshll.u32 %v3270_v13, 16  ;;  %v233_v19 = vshrl.u32 %v3267_v12, 16 }
  0x13   : > { %2804 = vmatpush3.bf16.msra.mxu1 %v3108_v6  ;;  %v236_v20 = vshll.u32 %v3267_v12, 16  ;;  %v242_v21 = vshll.u32 %v3276_v15, 16  ;;  %v2435_v30 = vld [vmem:[%s3258_s10 + $0x8] sm:$0xf]  ;;  %v3292_v31 = vld [vmem:[%s3258_s10 + $0xc] sm:$0x1] }
  0x14   : > { %2900 = vmatpush3.bf16.msra.mxu0 %v3109_v7  ;;  %2805 = vmatprep.subr.bf16.mxu1 %v3110_v8  ;;  %v221_v24 = vrot.slane %v219_v16, 4  ;;  %v224_v25 = vrot.slane %v222_v17, 5  ;;  %v230_v26 = vrot.slane %v228_v18, 5  ;;  %v235_v27 = vrot.slane %v233_v19, 4  ;;  %v2437_v33 = vld [vmem:[%s3258_s10 + $0x10] sm:$0xf] }
  0x15   : > { %2901 = vmatprep.subr.bf16.mxu0 %v3111_v9  ;;  %v238_v28 = vrot.slane %v236_v20, 5  ;;  %v244_v29 = vrot.slane %v242_v21, 5  ;;  %v3296_v34 = vld [vmem:[%s3258_s10 + $0x14] sm:$0x1]  ;;  %v1014_v35 = vshrl.u32 %v2435_v30, 16  ;;  %v1017_v36 = vshll.u32 %v2435_v30, 16 }
  0x16   : > { %v225_v32 = vor.u32 %v224_v25, %v221_v24  ;;  %v1023_v40 = vshll.u32 %v3292_v31, 16  ;;  %v1028_v41 = vshrl.u32 %v2437_v33, 16  ;;  %v1031_v42 = vshll.u32 %v2437_v33, 16  ;;  %v3313_v51 = vld [vmem:[%s3258_s10 + $0x10] sm:$0xf] }
  0x17   : > { %2806 = vmatpush3.bf16.msra.mxu1 %v3110_v8  ;;  %v239_v39 = vor.u32 %v238_v28, %v235_v27  ;;  %v1016_v44 = vrot.slane %v1014_v35, 4  ;;  %v1019_v45 = vrot.slane %v1017_v36, 5  ;;  %v1037_v46 = vshll.u32 %v3296_v34, 16  ;;  %v3318_v55 = vld [vmem:[%s3258_s10 + $0x18] sm:$0xf] }
  0x18   : > { %2902 = vmatpush3.bf16.msra.mxu0 %v3111_v9  ;;  %2807 = vmatprep.subr.bf16.mxu1 %v3112_v10  ;;  %v226_v43 = vrot.slane %v225_v32, 4  ;;  %v1030_v49 = vrot.slane %v1028_v41, 4  ;;  %v1033_v50 = vrot.slane %v1031_v42, 5  ;;  %v1025_v54 = vrot.slane %v1023_v40, 5  ;;  %v3321_v56 = vld [vmem:[%s3258_s10 + $0x14] sm:$0x1] }
  0x19   : > { %2903 = vmatprep.subr.bf16.mxu0 %v3113_v14  ;;  %v240_v48 = vrot.slane %v239_v39, 4  ;;  %v1020_v53 = vor.u32 %v1019_v45, %v1016_v44  ;;  %v1039_v59 = vrot.slane %v1037_v46, 5  ;;  %v3326_v60 = vld [vmem:[%s3258_s10 + $0x1c] sm:$0x1]  ;;  %v247_v61 = vshrl.u32 %v3313_v51, 16 }
  0x1a   : > { %v231_v52 = vsel %vm3303_vm2, %v226_v43, %v230_v26  ;;  %v1034_v58 = vor.u32 %v1033_v50, %v1030_v49  ;;  %v250_v2 = vshll.u32 %v3313_v51, 16  ;;  %v256_v3 = vshll.u32 %v3321_v56, 16  ;;  %v2439_v8 = vld [vmem:[%s3258_s10 + $0x18] sm:$0xf]  ;;  %v3346_v16 = vld [vmem:[%s3258_s10 + $0x1c] sm:$0x1] }
  0x1b   : > { %2808 = vmatpush3.bf16.msra.mxu1 %v3112_v10  ;;  %v245_v57 = vsel %vm3303_vm2, %v240_v48, %v244_v29  ;;  %v1021_v0 = vrot.slane %v1020_v53, 4  ;;  %v249_v5 = vrot.slane %v247_v61, 4  ;;  %v261_v6 = vshrl.u32 %v3318_v55, 16  ;;  %v2441_v17 = vld [vmem:[%s3258_s10 + $0x20] sm:$0xf]  ;;  %v3120_v43 = vld [vmem:[%s3788_s1 + $0x8] sm:$0xff]  }
  0x1c   : > { %2904 = vmatpush3.bf16.msra.mxu0 %v3113_v14  ;;  %2809 = vmatprep.subr.bf16.mxu1 %v3114_v22  ;;  %v2339_v62 = vcombine.low %v231_v52, %v245_v57  ;;  %v1035_v4 = vrot.slane %v1034_v58, 4  ;;  %v264_v7 = vshll.u32 %v3318_v55, 16  ;;  %v252_v10 = vrot.slane %v250_v2, 5  ;;  %v3352_v21 = vld [vmem:[%s3258_s10 + $0x24] sm:$0x1] }
  0x1d   : > { %2905 = vmatprep.subr.bf16.mxu0 %v3115_v23  ;;  %v1026_v9 = vsel %vm3303_vm2, %v1021_v0, %v1025_v54  ;;  %v270_v14 = vshll.u32 %v3326_v60, 16  ;;  %v263_v19 = vrot.slane %v261_v6, 4  ;;  %v258_v24 = vrot.slane %v256_v3, 5  ;;  %v3121_v54 = vld [vmem:[%s3788_s1 + $0x148] sm:$0xff]   ;;  %v3382_v0 = vld [vmem:[%s3258_s10 + $0x24] sm:$0x1] }
  0x1e   : > { %2813 = vmatprep.mubr.bf16.mxu1 %v2339_v62  ;;  %v1040_v18 = vsel %vm3303_vm2, %v1035_v4, %v1039_v59  ;;  %v266_v20 = vrot.slane %v264_v7, 5  ;;  %v1042_v27 = vshrl.u32 %v2439_v8, 16  ;;  %v1045_v28 = vshll.u32 %v2439_v8, 16  ;;  %v3122_v59 = vld [vmem:[%s3788_s1 + $0x10] sm:$0xff]   ;;  %v3376_v62 = vld [vmem:[%s3258_s10 + $0x20] sm:$0xf] }
  0x1f   : > { %2810 = vmatpush3.bf16.msra.mxu1 %v3114_v22  ;;  %v2467_v22 = vcombine.low %v1026_v9, %v1040_v18  ;;  %v272_v25 = vrot.slane %v270_v14, 5  ;;  %v1051_v29 = vshll.u32 %v3346_v16, 16  ;;  %v1056_v32 = vshrl.u32 %v2441_v17, 16  ;;  %v3385_v2 = vld [vmem:[%s3258_s10 + $0x2c] sm:$0x1]  ;;  %v3123_v9 = vld [vmem:[%s3788_s1 + $0x150] sm:$0xff]  }
  0x20   : > { %2906 = vmatpush3.bf16.msra.mxu0 %v3115_v23  ;;  %2811 = vmatprep.subr.bf16.mxu1 %v3116_v37  ;;  %v253_v23 = vor.u32 %v252_v10, %v249_v5  ;;  %v267_v26 = vor.u32 %v266_v20, %v263_v19  ;;  %v1059_v33 = vshll.u32 %v2441_v17, 16  ;;  %v1065_v35 = vshll.u32 %v3352_v21, 16  ;;  %v3124_v10 = vld [vmem:[%s3788_s1 + $0x18] sm:$0xff]  }
  0x21   : > { %2907 = vmatprep.subr.bf16.mxu0 %v3117_v47  ;;  %2909 = vmatprep.mubr.bf16.mxu0 %v2467_v22  ;;  %v1047_v39 = vrot.slane %v1045_v28, 5  ;;  %v1058_v41 = vrot.slane %v1056_v32, 4  ;;  %v1053_v46 = vrot.slane %v1051_v29, 5  ;;  %v1305_v57 = vrot.slane %v3292_v31, 5  ;;  %v3125_v29 = vld [vmem:[%s3788_s1 + $0x158] sm:$0xff]  }
  0x22   : > { %v254_v30 = vrot.slane %v253_v23, 4  ;;  %v268_v36 = vrot.slane %v267_v26, 4  ;;  %v1061_v42 = vrot.slane %v1059_v33, 5  ;;  %v275_v3 = vshrl.u32 %v3376_v62, 16  ;;  %v2443_v23 = vld [vmem:[%s3258_s10 + $0x28] sm:$0xf] }
  0x23   : > { %2812 = vmatpush3.bf16.msra.mxu1 %v3116_v37  ;;  %v1044_v37 = vrot.slane %v1042_v27, 4  ;;  %v278_v4 = vshll.u32 %v3376_v62, 16  ;;  %v284_v5 = vshll.u32 %v3382_v0, 16  ;;  %v298_v8 = vshll.u32 %v3385_v2, 16  ;;  %v3406_v26 = vld [vmem:[%s3258_s10 + $0x34] sm:$0x1] }
  0x24   : > { %2908 = vmatpush3.bf16.msra.mxu0 %v3117_v47  ;;  %2821 = vmatprep.subr.bf16.mxu1 %v3118_v63  ;;  %v259_v40 = vsel %vm3303_vm2, %v254_v30, %v258_v24  ;;  %v273_v44 = vsel %vm3303_vm2, %v268_v36, %v272_v25  ;;  %v1067_v47 = vrot.slane %v1065_v35, 5  ;;  %v1062_v49 = vor.u32 %v1061_v42, %v1058_v41  ;;  %v3402_v24 = vld [vmem:[%s3258_s10 + $0x2c] sm:$0x1]  ;;  %v2445_v25 = vld [vmem:[%s3258_s10 + $0x30] sm:$0xf]  ;;  %v3126_v30 = vld [vmem:[%s3788_s1 + $0x20] sm:$0xff]  }
  0x25   : > { %2917 = vmatprep.subr.bf16.mxu0 %v3335_v1  ;;  %v1048_v45 = vor.u32 %v1047_v39, %v1044_v37  ;;  %v2340_v48 = vcombine.low %v259_v40, %v273_v44  ;;  %v277_v14 = vrot.slane %v275_v3, 4  ;;  %v280_v17 = vrot.slane %v278_v4, 5 }
  0x26   : > { %v1063_v52 = vrot.slane %v1062_v49, 4  ;;  %v286_v18 = vrot.slane %v284_v5, 5  ;;  %v300_v22 = vrot.slane %v298_v8, 5  ;;  %v1070_v27 = vshrl.u32 %v2443_v23, 16  ;;  %v2447_v5 = vld [vmem:[%s3258_s10 + $0x38] sm:$0xf] }
  0x27   : > { %v1049_v50 = vrot.slane %v1048_v45, 4  ;;  %2814 = vmatmul.mubr.bf16.vlgmr.msra.gmra.mrb[0].mxu1 %v2340_v48  ;;  %v1073_v28 = vshll.u32 %v2443_v23, 16  ;;  %v1079_v33 = vshll.u32 %v3402_v24, 16  ;;  %v1084_v35 = vshrl.u32 %v2445_v25, 16 }
  0x28   : > { %2822 = vmatpush3.bf16.msra.mxu1 %v3118_v63  ;;  %v1068_v58 = vsel %vm3303_vm2, %v1063_v52, %v1067_v47  ;;  %v3379_v63 = vld [vmem:[%s3258_s10 + $0x28] sm:$0xf]  ;;  %v1087_v36 = vshll.u32 %v2445_v25, 16  ;;  %v1072_v39 = vrot.slane %v1070_v27, 4  ;;  %v1093_v41 = vshll.u32 %v3406_v26, 16 }
  0x29   : > { %v1054_v53 = vsel %vm3303_vm2, %v1049_v50, %v1053_v46  ;;  %2823 = vmatprep.subr.bf16.mxu1 %v3120_v43  ;;  %v289_v6 = vshrl.u32 %v3379_v63, 16  ;;  %v292_v7 = vshll.u32 %v3379_v63, 16  ;;  %v1075_v40 = vrot.slane %v1073_v28, 5  ;;  %v3417_v46 = vld [vmem:[%s3258_s10 + $0x30] sm:$0xf] }
  0x2a   : > { %v2468_v61 = vcombine.low %v1054_v53, %v1068_v58  ;;  %v1086_v44 = vrot.slane %v1084_v35, 4  ;;  %v1089_v45 = vrot.slane %v1087_v36, 5  ;;  %v1095_v49 = vrot.slane %v1093_v41, 5  ;;  %v3422_v50 = vld [vmem:[%s3258_s10 + $0x38] sm:$0xf] }
  0x2b   : > { %v291_v19 = vrot.slane %v289_v6, 4  ;;  %v294_v20 = vrot.slane %v292_v7, 5  ;;  %v1076_v48 = vor.u32 %v1075_v40, %v1072_v39  ;;  %v3425_v52 = vld [vmem:[%s3258_s10 + $0x34] sm:$0x1]  ;;  %v303_v53 = vshrl.u32 %v3417_v46, 16  ;;  %v3128_v6 = vld [vmem:[%s3788_s1 + $0x28] sm:$0xff]  }
  0x2c   : > { %2910 = vmatmul.mubr.bf16.vlgmr.msra.gmra.mrb[0].mxu0 %v2468_v61  ;;  %2824 = vmatpush3.bf16.msra.mxu1 %v3120_v43  ;;  %v1081_v43 = vrot.slane %v1079_v33, 5  ;;  %v3434_v61 = vld [vmem:[%s3258_s10 + $0x3c] sm:$0x1]  ;;  %v306_v3 = vshll.u32 %v3417_v46, 16  ;;  %v312_v4 = vshll.u32 %v3425_v52, 16  ;;  %v1098_v28 = vshrl.u32 %v2447_v5, 16 }
  0x2d   : > { %2918 = vmatpush3.bf16.msra.mxu0 %v3335_v1  ;;  %2825 = vmatprep.subr.bf16.mxu1 %v3122_v59  ;;  %v281_v1 = vor.u32 %v280_v17, %v277_v14  ;;  %v295_v32 = vor.u32 %v294_v20, %v291_v19  ;;  %v1077_v8 = vrot.slane %v1076_v48, 4  ;;  %v317_v14 = vshrl.u32 %v3422_v50, 16  ;;  %v3444_v17 = vld [vmem:[%s3258_s10 + $0x3c] sm:$0x1]  ;;  %v3452_v27 = vld [vmem:[%s3258_s10 + $0x44] sm:$0x1] }
  0x2e   : > { %2919 = vmatprep.subr.bf16.mxu0 %v3121_v54  ;;  %v308_v19 = vrot.slane %v306_v3, 5  ;;  %v314_v20 = vrot.slane %v312_v4, 5  ;;  %v326_v25 = vshll.u32 %v3434_v61, 16  ;;  %v1101_v36 = vshll.u32 %v2447_v5, 16 }
  0x2f   : > { %v282_v37 = vrot.slane %v281_v1, 4  ;;  %v296_v42 = vrot.slane %v295_v32, 4  ;;  %v1082_v23 = vsel %vm3303_vm2, %v1077_v8, %v1081_v43  ;;  %v319_v1 = vrot.slane %v317_v14, 4 }
  0x30   : > { %2826 = vmatpush3.bf16.msra.mxu1 %v3122_v59  ;;  %v1090_v59 = vor.u32 %v1089_v45, %v1086_v44  ;;  %v328_v40 = vrot.slane %v326_v25, 5  ;;  %v1100_v41 = vrot.slane %v1098_v28, 4  ;;  %v1103_v45 = vrot.slane %v1101_v36, 5  ;;  %v2481_v25 = vld [vmem:[%s3258_s10 + $0x18] sm:$0xe] }
  0x31   : > { %2920 = vmatpush3.bf16.msra.mxu0 %v3121_v54  ;;  %2827 = vmatprep.subr.bf16.mxu1 %v3124_v10  ;;  %v287_v47 = vsel %vm3303_vm2, %v282_v37, %v286_v18  ;;  %v3127_v54 = vld [vmem:[%s3788_s1 + $0x160] sm:$0xff]   ;;  %v301_v58 = vsel %vm3303_vm2, %v296_v42, %v300_v22  ;;  %v320_v22 = vshll.u32 %v3422_v50, 16  ;;  %v3130_v37 = vld [vmem:[%s3788_s1 + $0x30] sm:$0xff]   ;;  %v1107_v42 = vshll.u32 %v3444_v17, 16  ;;  %v3133_v28 = vld [vmem:[%s3788_s1 + $0x178] sm:$0xff]  }
  0x32   : > { %2921 = vmatprep.subr.bf16.mxu0 %v3123_v9  ;;  %v2341_v7 = vcombine.low %v287_v47, %v301_v58  ;;  %v1091_v18 = vrot.slane %v1090_v59, 4  ;;  %v1309_v47 = vrot.slane %v3296_v34, 5  ;;  %v1313_v48 = vrot.slane %v3346_v16, 5  ;;  %v3131_v58 = vld [vmem:[%s3788_s1 + $0x170] sm:$0xff]  }
  0x33   : > { %v322_v35 = vrot.slane %v320_v22, 5  ;;  %v1104_v4 = vor.u32 %v1103_v45, %v1100_v41  ;;  %v1109_v34 = vrot.slane %v1107_v42, 5  ;;  %v1317_v22 = vrot.slane %v3352_v21, 5  ;;  %v3136_v41 = vld [vmem:[%s3788_s1 + $0x180] sm:$0xff]  }
  0x34   : > { %2828 = vmatpush3.bf16.msra.mxu1 %v3124_v10  ;;  %v305_v10 = vrot.slane %v303_v53, 4  ;;  %2817 = vmatprep.mubr.bf16.mxu1 %v2341_v7  ;;  %v1096_v32 = vsel %vm3303_vm2, %v1091_v18, %v1095_v49  ;;  %v1121_v53 = vshll.u32 %v3452_v27, 16  ;;  %v2479_v7 = vld [vmem:[%s3258_s10 + $0x8] sm:$0xe]  ;;  %v2489_v36 = vrot.slane %v2481_v25, 9 }
  0x35   : > { %2922 = vmatpush3.bf16.msra.mxu0 %v3123_v9  ;;  %2829 = vmatprep.subr.bf16.mxu1 %v3126_v30  ;;  %v2449_v9 = vld [vmem:[%s3258_s10 + $0x40] sm:$0xf]  ;;  %v2469_v39 = vcombine.low %v1082_v23, %v1096_v32  ;;  %v323_v44 = vor.u32 %v322_v35, %v319_v1  ;;  %v2487_v14 = vrot.slane %v2479_v7, 9  ;;  %v1105_v18 = vrot.slane %v1104_v4, 4 }
  0x36   : > { %2923 = vmatprep.subr.bf16.mxu0 %v3125_v29  ;;  %v309_v33 = vor.u32 %v308_v19, %v305_v10  ;;  %v1115_v49 = vshll.u32 %v2449_v9, 16  ;;  %v2480_v10 = vld [vmem:[%s3258_s10 + $0x10] sm:$0xe]  ;;  %v2351_v19 = vcombine.low %v3264_v11, %v3267_v12  ;;  %v1123_v1 = vrot.slane %v1121_v53, 5  ;;  %v2482_v12 = vld [vmem:[%s3258_s10 + $0x20] sm:$0xe] }
  0x37   : > { %2913 = vmatprep.mubr.bf16.mxu0 %v2469_v39  ;;  %v324_v3 = vrot.slane %v323_v44, 4  ;;  %v1306_v32 = vsel %vm3477_vm5, %v2487_v14, %v1305_v57  ;;  %v1110_v21 = vsel %vm3303_vm2, %v1105_v18, %v1109_v34  ;;  %v3135_v35 = vld [vmem:[%s3788_s1 + $0x80] sm:$0xff]   ;;  %v1314_v42 = vsel %vm3477_vm5, %v2489_v36, %v1313_v48  ;;  %v3140_v44 = vld [vmem:[%s3788_s1 + $0x90] sm:$0xff]  }
  0x38   : > { %2830 = vmatpush3.bf16.msra.mxu1 %v3126_v30  ;;  %v3129_v30 = vld [vmem:[%s3788_s1 + $0x168] sm:$0xff]   ;;  %v310_v43 = vrot.slane %v309_v33, 4  ;;  %v1117_v16 = vrot.slane %v1115_v49, 5  ;;  %v1321_v45 = vrot.slane %v3402_v24, 5  ;;  %v1329_v53 = vrot.slane %v3444_v17, 5  ;;  %v3144_v18 = vld [vmem:[%s3788_s1 + $0xa0] sm:$0xff]  }
  0x39   : > { %2924 = vmatpush3.bf16.msra.mxu0 %v3125_v29  ;;  %2831 = vmatprep.subr.bf16.mxu1 %v3128_v6  ;;  %v1112_v29 = vshrl.u32 %v2449_v9, 16  ;;  %v1333_v24 = vrot.slane %v3452_v27, 5  ;;  %v646_v34 = vrot.slane %v3276_v15, 5  ;;  %v650_v17 = vrot.slane %v3321_v56, 5  ;;  %v614_v15 = vld [vmem:[%s3258_s10 + $0x8] sm:$0xe] }
  0x3a   : > { %2925 = vmatprep.subr.bf16.mxu0 %v3127_v54  ;;  %v315_v59 = vsel %vm3303_vm2, %v310_v43, %v314_v20  ;;  %v2488_v20 = vrot.slane %v2480_v10, 9  ;;  %v3138_v43 = vld [vmem:[%s3788_s1 + $0x88] sm:$0xff]   ;;  %v3141_v10 = vld [vmem:[%s3788_s1 + $0x190] sm:$0xff]   ;;  %v2364_v14 = vrot.slane %v614_v15, 9  ;;  %v658_v36 = vrot.slane %v3382_v0, 5  ;;  %v3154_v0 = vld [vmem:[%s3788_s1 + $0xc0] sm:$0xff]  }
  0x3b   : > { %v1114_v5 = vrot.slane %v1112_v29, 4  ;;  %v1325_v29 = vrot.slane %v3406_v26, 5  ;;  %v2354_v26 = vcombine.low %v3417_v46, %v3422_v50  ;;  %v3142_v46 = vld [vmem:[%s3788_s1 + $0x98] sm:$0xff]   ;;  %v3159_v15 = vld [vmem:[%s3788_s1 + $0x1c8] sm:$0xff]  }
  0x3c   : > { %2832 = vmatpush3.bf16.msra.mxu1 %v3128_v6  ;;  %v3132_v6 = vld [vmem:[%s3788_s1 + $0x38] sm:$0xff]   ;;  %v1310_v11 = vsel %vm3477_vm5, %v2488_v20, %v1309_v47 }
  0x3d   : > { %2926 = vmatpush3.bf16.msra.mxu0 %v3127_v54  ;;  %2833 = vmatprep.subr.bf16.mxu1 %v3130_v37  ;;  %v329_v54 = vsel %vm3303_vm2, %v324_v3, %v328_v40  ;;  %v1118_v23 = vor.u32 %v1117_v16, %v1114_v5  ;;  %v2511_v57 = vcombine.low %v1306_v32, %v1310_v11  ;;  %v613_v16 = vld [vmem:[%s3258_s10] sm:$0xe]  ;;  %v3143_v20 = vld [vmem:[%s3788_s1 + $0x198] sm:$0xff]  }
  0x3e   : > { %2927 = vmatprep.subr.bf16.mxu0 %v3129_v30  ;;  %v2342_v9 = vcombine.low %v315_v59, %v329_v54  ;;  %v2352_v40 = vcombine.low %v3313_v51, %v3318_v55  ;;  %v2353_v51 = vcombine.low %v3376_v62, %v3379_v63  ;;  %v642_v55 = vrot.slane %v3270_v13, 5  ;;  %v3139_v62 = vld [vmem:[%s3788_s1 + $0x188] sm:$0xff]   ;;  %v2484_v63 = vld [vmem:[%s3258_s10 + $0x30] sm:$0xe]  ;;  %v2486_v59 = vld [vmem:[%s3258_s10 + $0x40] sm:$0xe] }
  0x3f   : > { %v1119_v33 = vrot.slane %v1118_v23, 4  ;;  %v2483_v13 = vld [vmem:[%s3258_s10 + $0x28] sm:$0xe]  ;;  %v2492_v49 = vrot.slane %v2484_v63, 9  ;;  %v2494_v7 = vrot.slane %v2486_v59, 9  ;;  %v2363_v56 = vrot.slane %v613_v16, 9 }
  0x40   : > { %2834 = vmatpush3.bf16.msra.mxu1 %v3130_v37  ;;  %v2490_v37 = vrot.slane %v2482_v12, 9  ;;  %v2491_v48 = vrot.slane %v2483_v13, 9  ;;  %v654_v54 = vrot.slane %v3326_v60, 5  ;;  %v615_v23 = vld [vmem:[%s3258_s10 + $0x10] sm:$0xe] }
  0x41   : > { %2928 = vmatpush3.bf16.msra.mxu0 %v3129_v30  ;;  %2818 = vmatmul.mubr.bf16.gmra.mrb[4].mxu1 %v2342_v9  ;;  %v1124_v31 = vsel %vm3303_vm2, %v1119_v33, %v1123_v1  ;;  %v1326_v4 = vsel %vm3477_vm5, %v2492_v49, %v1325_v29  ;;  %v647_v9 = vsel %vm3477_vm5, %v2364_v14, %v646_v34  ;;  %v616_v60 = vld [vmem:[%s3258_s10 + $0x18] sm:$0xe]  ;;  %v2365_v25 = vrot.slane %v615_v23, 9  ;;  %v3146_v33 = vld [vmem:[%s3788_s1 + $0xa8] sm:$0xff]  }
  0x42   : > { %2929 = vmatprep.subr.bf16.mxu0 %v3131_v58  ;;  %2835 = vmatprep.subr.bf16.mxu1 %v3132_v6  ;;  %v2470_v39 = vcombine.low %v1110_v21, %v1124_v31  ;;  %v1318_v30 = vsel %vm3477_vm5, %v2490_v37, %v1317_v22  ;;  %v1322_v3 = vsel %vm3477_vm5, %v2491_v48, %v1321_v45  ;;  %v3155_v32 = vld [vmem:[%s3258_s10 + $0x10] ss:$8 sps:$4 sm:$0xff]   ;;  %v666_v29 = vrot.slane %v3425_v52, 5  ;;  %v3158_v49 = vld [vmem:[%s3788_s1 + $0xc8] sm:$0xff]  }
  0x43   : > { %2837 = vmatprep.mubr.bf16.mxu1 %v2351_v19  ;;  %v2512_v47 = vcombine.low %v1314_v42, %v1318_v30  ;;  %v2513_v27 = vcombine.low %v1322_v3, %v1326_v4  ;;  %v643_v19 = vsel %vm3477_vm5, %v2363_v56, %v642_v55  ;;  %v651_v11 = vsel %vm3477_vm5, %v2365_v25, %v650_v17  ;;  %v3149_v31 = vld [vmem:[%s3788_s1 + $0xb0] sm:$0xff]   ;;  %v3152_v37 = vld [vmem:[%s3788_s1 + $0xb8] sm:$0xff]   ;;  %v2565_v25 = vld [vmem:[%s3258_s10 + $0x28] sm:$0xf] }
  0x44   : > { %2836 = vmatpush3.bf16.msra.mxu1 %v3132_v6  ;;  %2914 = vmatmul.mubr.bf16.gmra.mrb[4].mxu0 %v2470_v39  ;;  %v1334_v6 = vsel %vm3477_vm5, %v2494_v7, %v1333_v24  ;;  %v2387_v1 = vcombine.low %v643_v19, %v647_v9  ;;  %v617_v39 = vld [vmem:[%s3258_s10 + $0x20] sm:$0xe]  ;;  %v3153_v45 = vld [vmem:[%s3788_s1 + $0x1b8] sm:$0xff]   ;;  %v3616_v24 = vld [vmem:[%s3258_s10 + $0x14] sm:$0x1] }
  0x45   : > { %2930 = vmatpush3.bf16.msra.mxu0 %v3131_v58  ;;  %2845 = vmatprep.subr.bf16.mxu1 %v3135_v35  ;;  %v2485_v58 = vld [vmem:[%s3258_s10 + $0x38] sm:$0xe]  ;;  %v2367_v42 = vrot.slane %v617_v39, 9  ;;  %v1686_v59 = vshll.u32 %v3616_v24, 16  ;;  %v3157_v7 = vld [vmem:[%s3258_s10 + $0x20] ss:$8 sps:$4 sm:$0xff]  }
  0x46   : > { %2931 = vmatprep.subr.bf16.mxu0 %v3133_v28  ;;  %2933 = vmatprep.mubr.bf16.mxu0 %v2511_v57  ;;  %v2493_v5 = vrot.slane %v2485_v58, 9  ;;  %v3147_v57 = vld [vmem:[%s3788_s1 + $0x1a8] sm:$0xff]   ;;  %v2561_v52 = vld [vmem:[%s3258_s10 + $0x18] sm:$0xf]  ;;  %v3161_v9 = vld [vmem:[%s3788_s1 + $0x1d0] sm:$0xff]  }
  0x47   : > { %v1691_v3 = vshrl.u32 %v2561_v52, 16  ;;  %v1694_v4 = vshll.u32 %v2561_v52, 16  ;;  %v3168_v56 = vld [vmem:[%s3258_s10 + $0x30] ss:$8 sps:$4 sm:$0xff]   ;;  %v3167_v52 = vld [vmem:[%s3788_s1 + $0x1e8] sm:$0xff]  }
  0x48   : > { %v1330_v50 = vsel %vm3477_vm5, %v2493_v5, %v1329_v53  ;;  %v2559_v53 = vld [vmem:[%s3258_s10 + $0x10] sm:$0xf]  ;;  %v3162_v23 = vld [vmem:[%s3788_s1 + $0xd8] sm:$0xff]  }
  0x49   : > { %2932 = vmatpush3.bf16.msra.mxu0 %v3133_v28  ;;  %2838 = vmatmul.mubr.bf16.vlgmr.msra.gmra.mrb[0].mxu1 %v2352_v40  ;;  %v2514_v22 = vcombine.low %v1330_v50, %v1334_v6  ;;  %v2366_v28 = vrot.slane %v616_v60, 9  ;;  %v618_v40 = vld [vmem:[%s3258_s10 + $0x28] sm:$0xe]  ;;  %v1680_v58 = vshll.u32 %v2559_v53, 16  ;;  %v1693_v50 = vrot.slane %v1691_v3, 4 }
  0x4a   : > { %2941 = vmatprep.subr.bf16.mxu0 %v3136_v41  ;;  %2846 = vmatpush3.bf16.msra.mxu1 %v3135_v35  ;;  %v3145_v35 = vld [vmem:[%s3788_s1 + $0x1a0] sm:$0xff]   ;;  %v2368_v30 = vrot.slane %v618_v40, 9  ;;  %v1696_v6 = vrot.slane %v1694_v4, 5 }
  0x4b   : > { %2847 = vmatprep.subr.bf16.mxu1 %v3138_v43  ;;  %2841 = vmatprep.mubr.bf16.mxu1 %v2353_v51  ;;  %v655_v12 = vsel %vm3477_vm5, %v2366_v28, %v654_v54  ;;  %v619_v51 = vld [vmem:[%s3258_s10 + $0x30] sm:$0xe]  ;;  %v1682_v16 = vrot.slane %v1680_v58, 5  ;;  %v1688_v54 = vrot.slane %v1686_v59, 5 }
  0x4c   : > { %2934 = vmatmul.mubr.bf16.vlgmr.msra.gmra.mrb[0].mxu0 %v2512_v47  ;;  %v2388_v21 = vcombine.low %v651_v11, %v655_v12  ;;  %v670_v47 = vrot.slane %v3434_v61, 5  ;;  %v2369_v63 = vrot.slane %v619_v51, 9  ;;  %v3620_v61 = vld [vmem:[%s3258_s10 + $0x1c] sm:$0x1]  ;;  %v3170_v11 = vld [vmem:[%s3258_s10 + $0x40] ss:$8 sps:$4 sm:$0xff]  }
  0x4d   : > { %2942 = vmatpush3.bf16.msra.mxu0 %v3136_v41  ;;  %2937 = vmatprep.mubr.bf16.mxu0 %v2513_v27  ;;  %v662_v41 = vrot.slane %v3385_v2, 5  ;;  %v659_v2 = vsel %vm3477_vm5, %v2367_v42, %v658_v36  ;;  %v1700_v5 = vshll.u32 %v3620_v61, 16  ;;  %v2567_v12 = vld [vmem:[%s3258_s10 + $0x30] sm:$0xf]  ;;  %v1722_v36 = vshll.u32 %v2565_v25, 16 }
  0x4e   : > { %2848 = vmatpush3.bf16.msra.mxu1 %v3138_v43  ;;  %2943 = vmatprep.subr.bf16.mxu0 %v3139_v62  ;;  %v3150_v43 = vld [vmem:[%s3788_s1 + $0x1b0] sm:$0xff]   ;;  %v667_v34 = vsel %vm3477_vm5, %v2369_v63, %v666_v29  ;;  %v1733_v40 = vshrl.u32 %v2567_v12, 16  ;;  %v3665_v51 = vld [vmem:[%s3258_s10 + $0x24] sm:$0x1] }
  0x4f   : > { %2849 = vmatprep.subr.bf16.mxu1 %v3140_v44  ;;  %v663_v55 = vsel %vm3477_vm5, %v2368_v30, %v662_v41  ;;  %v1702_v19 = vrot.slane %v1700_v5, 5  ;;  %v1736_v41 = vshll.u32 %v2567_v12, 16  ;;  %v1724_v29 = vrot.slane %v1722_v36, 5  ;;  %v2573_v5 = vld [vmem:[%s3258_s10 + $0x48] sm:$0xf]  ;;  %v3173_v12 = vld [vmem:[%s3788_s1 + $0x1f8] sm:$0xff]  }
  0x50   : > { %v2389_v13 = vcombine.low %v659_v2, %v663_v55  ;;  %v3668_v2 = vld [vmem:[%s3258_s10 + $0x2c] sm:$0x1]  ;;  %v1714_v58 = vshll.u32 %v3665_v51, 16 }
  0x51   : > { %2842 = vmatmul.mubr.bf16.gmra.mrb[4].mxu1 %v2354_v26  ;;  %2944 = vmatpush3.bf16.msra.mxu0 %v3139_v62  ;;  %v3156_v62 = vld [vmem:[%s3788_s1 + $0x1c0] sm:$0xff]   ;;  %v1677_v26 = vshrl.u32 %v2559_v53, 16  ;;  %v1738_v63 = vrot.slane %v1736_v41, 5  ;;  %v1728_v59 = vshll.u32 %v3668_v2, 16 }
  0x52   : > { %2850 = vmatpush3.bf16.msra.mxu1 %v3140_v44  ;;  %2945 = vmatprep.subr.bf16.mxu0 %v3141_v10  ;;  %v620_v44 = vld [vmem:[%s3258_s10 + $0x38] sm:$0xe]  ;;  %v2571_v53 = vld [vmem:[%s3258_s10 + $0x40] sm:$0xf] }
  0x53   : > { %2851 = vmatprep.subr.bf16.mxu1 %v3142_v46  ;;  %2861 = vmatprep.mubr.bf16.mxu1 %v2387_v1  ;;  %v2370_v48 = vrot.slane %v620_v44, 9  ;;  %v1679_v27 = vrot.slane %v1677_v26, 4  ;;  %v2563_v1 = vld [vmem:[%s3258_s10 + $0x20] sm:$0xf]  ;;  %v3169_v26 = vld [vmem:[%s3788_s1 + $0xf0] sm:$0xff]  }
  0x54   : > { %2938 = vmatmul.mubr.bf16.gmra.mrb[4].mxu0 %v2514_v22 }
  0x55   : > { %2946 = vmatpush3.bf16.msra.mxu0 %v3141_v10  ;;  %2957 = vmatprep.mubr.bf16.mxu0 %v3155_v32  ;;  %v671_v17 = vsel %vm3477_vm5, %v2370_v48, %v670_v47  ;;  %v1683_v10 = vor.u32 %v1682_v16, %v1679_v27  ;;  %v3671_v47 = vld [vmem:[%s3258_s10 + $0x34] sm:$0x1]  ;;  %v1764_v27 = vshll.u32 %v2571_v53, 16 }
  0x56   : > { %2852 = vmatpush3.bf16.msra.mxu1 %v3142_v46  ;;  %2947 = vmatprep.subr.bf16.mxu0 %v3143_v20  ;;  %v3160_v46 = vld [vmem:[%s3788_s1 + $0xd0] sm:$0xff]   ;;  %v2390_v14 = vcombine.low %v667_v34, %v671_v17  ;;  %v1742_v3 = vshll.u32 %v3671_v47, 16  ;;  %v1761_v17 = vshrl.u32 %v2571_v53, 16  ;;  %v2604_v53 = vld [vmem:[%s3258_s10 + $0x18] sm:$0xe] }
  0x57   : > { %2853 = vmatprep.subr.bf16.mxu1 %v3144_v18  ;;  %v1684_v22 = vrot.slane %v1683_v10, 4 }
  0x59   : > { %2948 = vmatpush3.bf16.msra.mxu0 %v3143_v20  ;;  %v3174_v20 = vld [vmem:[%s3258_s10 + $0x8] ss:$8 sps:$4 sm:$0xff]   ;;  %v1689_v28 = vsel %vm3303_vm2, %v1684_v22, %v1688_v54 }
  0x5a   : > { %2854 = vmatpush3.bf16.msra.mxu1 %v3144_v18  ;;  %2949 = vmatprep.subr.bf16.mxu0 %v3145_v35  ;;  %v1697_v18 = vor.u32 %v1696_v6, %v1693_v50  ;;  %v1775_v50 = vshrl.u32 %v2573_v5, 16  ;;  %v1778_v6 = vshll.u32 %v2573_v5, 16  ;;  %v2612_v5 = vrot.slane %v2604_v53, 9 }
  0x5b   : > { %2855 = vmatprep.subr.bf16.mxu1 %v3146_v33 }
  0x5c   : > { %v1698_v60 = vrot.slane %v1697_v18, 4  ;;  %v1730_v18 = vrot.slane %v1728_v59, 5  ;;  %v3179_v59 = vld [vmem:[%s3258_s10 + $0x38] ss:$8 sps:$4 sm:$0xff]  }
  0x5d   : > { %2950 = vmatpush3.bf16.msra.mxu0 %v3145_v35  ;;  %v1705_v35 = vshrl.u32 %v2563_v1, 16 }
  0x5e   : > { %2856 = vmatpush3.bf16.msra.mxu1 %v3146_v33  ;;  %2951 = vmatprep.subr.bf16.mxu0 %v3147_v57  ;;  %v1703_v32 = vsel %vm3303_vm2, %v1698_v60, %v1702_v19  ;;  %v3164_v33 = vld [vmem:[%s3788_s1 + $0xe0] sm:$0xff]   ;;  %v3698_v60 = vld [vmem:[%s3258_s10 + $0x4c] sm:$0x1] }
  0x5f   : > { %2857 = vmatprep.subr.bf16.mxu1 %v3149_v31  ;;  %v2591_v39 = vcombine.low %v1689_v28, %v1703_v32  ;;  %v1707_v55 = vrot.slane %v1705_v35, 4  ;;  %v1777_v28 = vrot.slane %v1775_v50, 4  ;;  %v1780_v32 = vrot.slane %v1778_v6, 5  ;;  %v3175_v35 = vld [vmem:[%s3258_s10 + $0x18] ss:$8 sps:$4 sm:$0xff]   ;;  %v3183_v6 = vld [vmem:[%s3788_s1 + $0x228] sm:$0xff]  }
  0x61   : > { %2952 = vmatpush3.bf16.msra.mxu0 %v3147_v57  ;;  %v1719_v57 = vshrl.u32 %v2565_v25, 16  ;;  %v1766_v25 = vrot.slane %v1764_v27, 5 }
  0x62   : > { %2858 = vmatpush3.bf16.msra.mxu1 %v3149_v31  ;;  %2953 = vmatprep.subr.bf16.mxu0 %v3150_v43  ;;  %v1708_v31 = vshll.u32 %v2563_v1, 16  ;;  %v1763_v1 = vrot.slane %v1761_v17, 4 }
  0x63   : > { %2859 = vmatprep.subr.bf16.mxu1 %v3152_v37 }
  0x64   : > { %v1710_v44 = vrot.slane %v1708_v31, 5 }
  0x65   : > { %2954 = vmatpush3.bf16.msra.mxu0 %v3150_v43  ;;  %v3165_v43 = vld [vmem:[%s3788_s1 + $0x1e0] sm:$0xff]  }
  0x66   : > { %2860 = vmatpush3.bf16.msra.mxu1 %v3152_v37  ;;  %2955 = vmatprep.subr.bf16.mxu0 %v3153_v45  ;;  %v3163_v37 = vld [vmem:[%s3788_s1 + $0x1d8] sm:$0xff]  }
  0x67   : > { %2869 = vmatprep.subr.bf16.mxu1 %v3154_v0 }
  0x69   : > { %2862 = vmatmul.mubr.bf16.vlgmr.msra.gmra.mrb[0].mxu1 %v2388_v21  ;;  %2956 = vmatpush3.bf16.msra.mxu0 %v3153_v45  ;;  %v2569_v21 = vld [vmem:[%s3258_s10 + $0x38] sm:$0xf]  ;;  %v1721_v45 = vrot.slane %v1719_v57, 4 }
  0x6a   : > { %2870 = vmatpush3.bf16.msra.mxu1 %v3154_v0  ;;  %2865 = vmatprep.mubr.bf16.mxu1 %v2389_v13  ;;  %v1747_v42 = vshrl.u32 %v2569_v21, 16  ;;  %v1750_v30 = vshll.u32 %v2569_v21, 16  ;;  %v3166_v0 = vld [vmem:[%s3788_s1 + $0xe8] sm:$0xff]   ;;  %v1735_v13 = vrot.slane %v1733_v40, 4  ;;  %v2607_v21 = vld [vmem:[%s3258_s10 + $0x30] sm:$0xe] }
  0x6b   : > { %2871 = vmatprep.subr.bf16.mxu1 %v3158_v49  ;;  %2965 = vmatprep.subr.bf16.mxu0 %v3156_v62  ;;  %v1725_v34 = vor.u32 %v1724_v29, %v1721_v45 }
  0x6c   : > { %2958 = vmatmul.mubr.bf16.vlgmr.msra.gmra.mrb[0].mxu0 %v3157_v7  ;;  %v1749_v48 = vrot.slane %v1747_v42, 4  ;;  %v1711_v7 = vor.u32 %v1710_v44, %v1707_v55  ;;  %v1739_v16 = vor.u32 %v1738_v63, %v1735_v13  ;;  %v1767_v42 = vor.u32 %v1766_v25, %v1763_v1 }
  0x6d   : > { %2966 = vmatpush3.bf16.msra.mxu0 %v3156_v62  ;;  %2961 = vmatprep.mubr.bf16.mxu0 %v3168_v56  ;;  %v3674_v62 = vld [vmem:[%s3258_s10 + $0x3c] sm:$0x1]  ;;  %v3171_v56 = vld [vmem:[%s3788_s1 + $0x1f0] sm:$0xff]   ;;  %v1726_v54 = vrot.slane %v1725_v34, 4  ;;  %v1984_v55 = vrot.slane %v3671_v47, 5  ;;  %v1976_v25 = vrot.slane %v3665_v51, 5 }
  0x6e   : > { %2872 = vmatpush3.bf16.msra.mxu1 %v3158_v49  ;;  %2967 = vmatprep.subr.bf16.mxu0 %v3159_v15  ;;  %v1752_v49 = vrot.slane %v1750_v30, 5  ;;  %v1756_v4 = vshll.u32 %v3674_v62, 16  ;;  %v1712_v10 = vrot.slane %v1711_v7, 4  ;;  %v1740_v19 = vrot.slane %v1739_v16, 4  ;;  %v3181_v16 = vld [vmem:[%s3788_s1 + $0x218] sm:$0xff]  }
  0x6f   : > { %2873 = vmatprep.subr.bf16.mxu1 %v3160_v46  ;;  %v1731_v57 = vsel %vm3303_vm2, %v1726_v54, %v1730_v18  ;;  %v1781_v30 = vor.u32 %v1780_v32, %v1777_v28  ;;  %v1988_v45 = vrot.slane %v3674_v62, 5  ;;  %v1972_v7 = vrot.slane %v3620_v61, 5 }
  0x70   : > { %v1996_v54 = vrot.slane %v3698_v60, 5  ;;  %v1980_v32 = vrot.slane %v3668_v2, 5 }
  0x71   : > { %2866 = vmatmul.mubr.bf16.gmra.mrb[4].mxu1 %v2390_v14  ;;  %2968 = vmatpush3.bf16.msra.mxu0 %v3159_v15  ;;  %v3172_v15 = vld [vmem:[%s3788_s1 + $0xf8] sm:$0xff]   ;;  %v1716_v14 = vrot.slane %v1714_v58, 5  ;;  %v3180_v58 = vld [vmem:[%s3788_s1 + $0x210] sm:$0xff]   ;;  %v1973_v61 = vsel %vm3477_vm5, %v2612_v5, %v1972_v7 }
  0x72   : > { %2874 = vmatpush3.bf16.msra.mxu1 %v3160_v46  ;;  %2885 = vmatprep.mubr.bf16.mxu1 %v3174_v20  ;;  %v1753_v46 = vor.u32 %v1752_v49, %v1749_v48  ;;  %v1744_v20 = vrot.slane %v1742_v3, 5  ;;  %v2603_v49 = vld [vmem:[%s3258_s10 + $0x10] sm:$0xe] }
  0x73   : > { %2875 = vmatprep.subr.bf16.mxu1 %v3162_v23  ;;  %2969 = vmatprep.subr.bf16.mxu0 %v3161_v9  ;;  %v1717_v31 = vsel %vm3303_vm2, %v1712_v10, %v1716_v14  ;;  %v2611_v3 = vrot.slane %v2603_v49, 9  ;;  %v2610_v10 = vld [vmem:[%s3258_s10 + $0x48] sm:$0xe] }
  0x74   : > { %2962 = vmatmul.mubr.bf16.gmra.mrb[4].mxu0 %v3170_v11  ;;  %v1754_v22 = vrot.slane %v1753_v46, 4  ;;  %v3176_v11 = vld [vmem:[%s3788_s1 + $0x200] sm:$0xff]   ;;  %v1745_v40 = vsel %vm3303_vm2, %v1740_v19, %v1744_v20  ;;  %v2592_v29 = vcombine.low %v1717_v31, %v1731_v57  ;;  %v2618_v19 = vrot.slane %v2610_v10, 9  ;;  %v3185_v20 = vld [vmem:[%s3788_s1 + $0x238] sm:$0xff]  }
  0x75   : > { %2970 = vmatpush3.bf16.msra.mxu0 %v3161_v9  ;;  %2981 = vmatprep.mubr.bf16.mxu0 %v2591_v39  ;;  %v1758_v9 = vrot.slane %v1756_v4, 5  ;;  %v3178_v39 = vld [vmem:[%s3258_s10 + $0x28] ss:$8 sps:$4 sm:$0xff]   ;;  %v1968_v4 = vrot.slane %v3616_v24, 5 }
  0x76   : > { %2876 = vmatpush3.bf16.msra.mxu1 %v3162_v23  ;;  %2971 = vmatprep.subr.bf16.mxu0 %v3163_v37  ;;  %v3695_v23 = vld [vmem:[%s3258_s10 + $0x44] sm:$0x1] }
  0x77   : > { %2877 = vmatprep.subr.bf16.mxu1 %v3164_v33  ;;  %v1770_v36 = vshll.u32 %v3695_v23, 16  ;;  %v1759_v41 = vsel %vm3303_vm2, %v1754_v22, %v1758_v9  ;;  %v1969_v24 = vsel %vm3477_vm5, %v2611_v3, %v1968_v4  ;;  %v1992_v14 = vrot.slane %v3695_v23, 5  ;;  %v2605_v22 = vld [vmem:[%s3258_s10 + $0x20] sm:$0xe]  ;;  %v2606_v9 = vld [vmem:[%s3258_s10 + $0x28] sm:$0xe] }
  0x78   : > { %v2593_v13 = vcombine.low %v1745_v40, %v1759_v41  ;;  %v2635_v50 = vcombine.low %v1969_v24, %v1973_v61  ;;  %v1997_v23 = vsel %vm3477_vm5, %v2618_v19, %v1996_v54  ;;  %v2614_v28 = vrot.slane %v2606_v9, 9 }
  0x79   : > { %2972 = vmatpush3.bf16.msra.mxu0 %v3163_v37  ;;  %v1784_v37 = vshll.u32 %v3698_v60, 16  ;;  %v1772_v63 = vrot.slane %v1770_v36, 5  ;;  %v2613_v60 = vrot.slane %v2605_v22, 9 }
  0x7a   : > { %2878 = vmatpush3.bf16.msra.mxu1 %v3164_v33  ;;  %2973 = vmatprep.subr.bf16.mxu0 %v3165_v43  ;;  %v2608_v33 = vld [vmem:[%s3258_s10 + $0x38] sm:$0xe] }
  0x7b   : > { %2879 = vmatprep.subr.bf16.mxu1 %v3166_v0  ;;  %v2616_v44 = vrot.slane %v2608_v33, 9  ;;  %v1786_v48 = vrot.slane %v1784_v37, 5 }
  0x7d   : > { %2974 = vmatpush3.bf16.msra.mxu0 %v3165_v43  ;;  %v3177_v43 = vld [vmem:[%s3788_s1 + $0x208] sm:$0xff]   ;;  %v1989_v62 = vsel %vm3477_vm5, %v2616_v44, %v1988_v45 }
  0x7e   : > { %2880 = vmatpush3.bf16.msra.mxu1 %v3166_v0  ;;  %2975 = vmatprep.subr.bf16.mxu0 %v3167_v52  ;;  %v2615_v0 = vrot.slane %v2607_v21, 9  ;;  %v1981_v21 = vsel %vm3477_vm5, %v2614_v28, %v1980_v32 }
  0x7f   : > { %2881 = vmatprep.subr.bf16.mxu1 %v3169_v26 }
  0x80   : > { %v1985_v47 = vsel %vm3477_vm5, %v2615_v0, %v1984_v55 }
  0x81   : > { %2976 = vmatpush3.bf16.msra.mxu0 %v3167_v52  ;;  %v1768_v52 = vrot.slane %v1767_v42, 4  ;;  %v2637_v34 = vcombine.low %v1985_v47, %v1989_v62 }
  0x82   : > { %2882 = vmatpush3.bf16.msra.mxu1 %v3169_v26  ;;  %2977 = vmatprep.subr.bf16.mxu0 %v3171_v56  ;;  %v1782_v26 = vrot.slane %v1781_v30, 4 }
  0x83   : > { %2883 = vmatprep.subr.bf16.mxu1 %v3172_v15  ;;  %v1773_v17 = vsel %vm3303_vm2, %v1768_v52, %v1772_v63 }
  0x84   : > { %v1787_v27 = vsel %vm3303_vm2, %v1782_v26, %v1786_v48 }
  0x85   : > { %2978 = vmatpush3.bf16.msra.mxu0 %v3171_v56  ;;  %v2594_v46 = vcombine.low %v1773_v17, %v1787_v27  ;;  %v2609_v56 = vld [vmem:[%s3258_s10 + $0x40] sm:$0xe]  ;;  %s2657_s10 = sshll.u32 %s3796_s13, 5 }
  0x86   : > { %2884 = vmatpush3.bf16.msra.mxu1 %v3172_v15  ;;  %2979 = vmatprep.subr.bf16.mxu0 %v3173_v12  ;;  %v3184_v15 = vld [vmem:[%s3788_s1 + $0x230] sm:$0xff]   ;;  %v2617_v18 = vrot.slane %v2609_v56, 9  ;;  %s177_s19 = scalar_lea.vmem %s3789_s2, %s2657_s10 }
  0x87   : > { %3013 = vmatprep.subr.bf16.mxu1 %v3176_v11 }
  0x88   : > { %v1993_v1 = vsel %vm3477_vm5, %v2617_v18, %v1992_v14 }
  0x89   : > { %2886 = vmatmul.mubr.bf16.vlgmr.msra.gmra.mrb[0].mxu1 %v3175_v35  ;;  %2980 = vmatpush3.bf16.msra.mxu0 %v3173_v12  ;;  %v1977_v12 = vsel %vm3477_vm5, %v2613_v60, %v1976_v25 }
  0x8a   : > { %3021 = vmatpush3.bf16.msra.mxu1 %v3176_v11  ;;  %2889 = vmatprep.mubr.bf16.mxu1 %v3178_v39  ;;  %v2636_v33 = vcombine.low %v1977_v12, %v1981_v21 }
  0x8b   : > { %3014 = vmatprep.subr.bf16.mxu1 %v3177_v43  ;;  %2989 = vmatprep.subr.bf16.mxu0 %v3176_v11 }
  0x8c   : > { %2982 = vmatmul.mubr.bf16.vlgmr.msra.gmra.mrb[0].mxu0 %v2592_v29 }
  0x8d   : > { %2990 = vmatpush3.bf16.msra.mxu0 %v3176_v11  ;;  %2985 = vmatprep.mubr.bf16.mxu0 %v2593_v13  ;;  %v2638_v11 = vcombine.low %v1993_v1, %v1997_v23 }
  0x8e   : > { %3022 = vmatpush3.bf16.msra.mxu1 %v3177_v43  ;;  %2991 = vmatprep.subr.bf16.mxu0 %v3177_v43 }
  0x8f   : > { %3015 = vmatprep.subr.bf16.mxu1 %v3180_v58 }
  0x91   : > { %2890 = vmatmul.mubr.bf16.gmra.mrb[4].mxu1 %v3179_v59  ;;  %2992 = vmatpush3.bf16.msra.mxu0 %v3177_v43 }
  0x92   : > { %3023 = vmatpush3.bf16.msra.mxu1 %v3180_v58  ;;  %3009 = vmatprep.mubr.bf16.mxu1 %v2637_v34 }
  0x93   : > { %3016 = vmatprep.subr.bf16.mxu1 %v3181_v16  ;;  %2993 = vmatprep.subr.bf16.mxu0 %v3180_v58 }
  0x94   : > { %2986 = vmatmul.mubr.bf16.gmra.mrb[4].mxu0 %v2594_v46 }
  0x95   : > { %2994 = vmatpush3.bf16.msra.mxu0 %v3180_v58  ;;  %3005 = vmatprep.mubr.bf16.mxu0 %v2635_v50 }
  0x96   : > { %3024 = vmatpush3.bf16.msra.mxu1 %v3181_v16  ;;  %2995 = vmatprep.subr.bf16.mxu0 %v3181_v16 }
  0x97   : > { %3017 = vmatprep.subr.bf16.mxu1 %v3182_v38 }
  0x99   : > { %2996 = vmatpush3.bf16.msra.mxu0 %v3181_v16 }
  0x9a   : > { %3025 = vmatpush3.bf16.msra.mxu1 %v3182_v38  ;;  %2997 = vmatprep.subr.bf16.mxu0 %v3182_v38 }
  0x9b   : > { %3018 = vmatprep.subr.bf16.mxu1 %v3183_v6 }
  0x9d   : > { %2998 = vmatpush3.bf16.msra.mxu0 %v3182_v38 }
  0x9e   : > { %3026 = vmatpush3.bf16.msra.mxu1 %v3183_v6  ;;  %2999 = vmatprep.subr.bf16.mxu0 %v3183_v6 }
  0x9f   : > { %3019 = vmatprep.subr.bf16.mxu1 %v3184_v15 }
  0xa1   : > { %3000 = vmatpush3.bf16.msra.mxu0 %v3183_v6 }
  0xa2   : > { %3027 = vmatpush3.bf16.msra.mxu1 %v3184_v15  ;;  %3001 = vmatprep.subr.bf16.mxu0 %v3184_v15 }
  0xa3   : > { %3020 = vmatprep.subr.bf16.mxu1 %v3185_v20 }
  0xa5   : > { %3002 = vmatpush3.bf16.msra.mxu0 %v3184_v15 }
  0xa6   : > { %3028 = vmatpush3.bf16.msra.mxu1 %v3185_v20  ;;  %3003 = vmatprep.subr.bf16.mxu0 %v3185_v20 }
  0xa9   : > { %3010 = vmatmul.mubr.bf16.vlgmr.msra.gmra.mrb[8].mxu1 %v2638_v11  ;;  %3004 = vmatpush3.bf16.msra.mxu0 %v3185_v20 }
  0xac   : > { %3006 = vmatmul.mubr.bf16.vlgmr.msra.gmra.mrb[0].mxu0 %v2636_v33 }
 0x15c   : > { %v2887_v35 = vpop.f32.mrb[0].mxu1 }
 0x15d   : > { %v958_v51 = vpop.f32.mrb[1].mxu1 }
 0x15e   : > { %v2888_v31 = vpop.f32.mrb[2].mxu1 }
 0x15f   : > { %v961_v57 = vpop.f32.mrb[3].mxu1 }
 0x164   : > { %v2891_v2 = vpop.f32.mrb[4].mxu1 }
 0x165   : > { %v974_v36 = vpop.f32.mrb[5].mxu1 }
 0x166   : > { %v2892_v37 = vpop.f32.mrb[6].mxu1 }
 0x167   : > { %v977_v39 = vpop.f32.mrb[7].mxu1  ;;  %v2987_v40 = vpop.f32.mrb[4].mxu0 }
 0x168   : > { %v3033_v41 = vadd.f32 %v2987_v40, %v2891_v2  ;;  %v1919_v42 = vpop.f32.mrb[5].mxu0 }
 0x169   : > { %v3035_v30 = vadd.f32 %v1919_v42, %v974_v36  ;;  %v2988_v8 = vpop.f32.mrb[6].mxu0 }
 0x16a   : > { %v3037_v43 = vadd.f32 %v2988_v8, %v2892_v37  ;;  %v1922_v0 = vpop.f32.mrb[7].mxu0 }
 0x16b   : > { %v3039_v55 = vadd.f32 %v1922_v0, %v977_v39 }
 0x17c   : > { %v3011_v44 = vpop.f32.mrb[8].mxu1 }
 0x17d   : > { %v3034_v45 = vadd.f32 %v3033_v41, %v3011_v44  ;;  %v2129_v29 = vpop.f32.mrb[9].mxu1 }
 0x17e   : > { %v3036_v13 = vadd.f32 %v3035_v30, %v2129_v29  ;;  %v3012_v63 = vpop.f32.mrb[10].mxu1 }
 0x17f   : > { %v3038_v48 = vadd.f32 %v3037_v43, %v3012_v63  ;;  %v2132_v49 = vpop.f32.mrb[11].mxu1  ;;  %v3007_v52 = vpop.f32.mrb[0].mxu0  ;;  %v2212_v20 = vmul.f32 %v3034_v45, %v3034_v45 }
 0x180   : > { %v3040_v53 = vadd.f32 %v3039_v55, %v2132_v49  ;;  %v3029_v47 = vadd.f32 %v3007_v52, %v2887_v35  ;;  %v2113_v62 = vpop.f32.mrb[1].mxu0  ;;  %v2210_v56 = vmul.f32 %v3036_v13, %v3036_v13 }
 0x181   : > { %v2684_v26 = vpack.c.bf16 %v3038_v48, %v3034_v45  ;;  %v3030_v59 = vadd.f32 %v2113_v62, %v958_v51  ;;  %v3008_v3 = vpop.f32.mrb[2].mxu0  ;;  %v2213_v1 = vmul.f32 %v3038_v48, %v3038_v48 }
 0x182   : > { %v2679_v58 = vpack.c.bf16 %v3040_v53, %v3036_v13  ;;  %v3031_v4 = vadd.f32 %v3008_v3, %v2888_v31  ;;  %v2116_v5 = vpop.f32.mrb[3].mxu0  ;;  %v2208_v61 = vmul.f32 %v3029_v47, %v3029_v47  ;;  %v2211_v18 = vmul.f32 %v3040_v53, %v3040_v53 }
 0x183   : > { %2688 = vst [vmem:[%s177_s19 + $0x18] sm:$0xff] %v2684_v26   ;;  %v3032_v7 = vadd.f32 %v2116_v5, %v961_v57  ;;  %v2206_v17 = vmul.f32 %v3030_v59, %v3030_v59 }
 0x184   : > { %2687 = vst [vmem:[%s177_s19 + $0x10] sm:$0xff] %v2679_v58   ;;  %v2674_v34 = vpack.c.bf16 %v3031_v4, %v3029_v47  ;;  %v2209_v50 = vmul.f32 %v3031_v4, %v3031_v4 }
 0x185   : > { %v2669_v27 = vpack.c.bf16 %v3032_v7, %v3030_v59  ;;  %v2192_v16 = vadd.f32 %v3032_v7, %v3030_v59  ;;  %v2207_v24 = vmul.f32 %v3032_v7, %v3032_v7 }
 0x186   : > { %2686 = vst [vmem:[%s177_s19 + $0x8] sm:$0xff] %v2674_v34  }
 0x187   : > { %2670 = vst [vmem:[%s177_s19] sm:$0xff] %v2669_v27   ;;  %v2193_v46 = vadd.f32 %v3029_v47, %v2192_v16  ;;  %v2214_v38 = vadd.f32 %v2207_v24, %v2206_v17 }
 0x189   : > { %v2215_v6 = vadd.f32 %v2214_v38, %v2208_v61  ;;  %v2194_v15 = vadd.f32 %v3031_v4, %v2193_v46 }
 0x18b   : > { %v2195_v10 = vadd.f32 %v3036_v13, %v2194_v15  ;;  %v2216_v14 = vadd.f32 %v2215_v6, %v2209_v50 }
 0x18d   : > { %v2196_v54 = vadd.f32 %v3040_v53, %v2195_v10  ;;  %v2217_v19 = vadd.f32 %v2216_v14, %v2210_v56 }
 0x18f   : > { %v2197_v22 = vadd.f32 %v3034_v45, %v2196_v54  ;;  %v2218_v9 = vadd.f32 %v2217_v19, %v2211_v18 }
 0x191   : > { %v2198_v23 = vadd.f32 %v3038_v48, %v2197_v22  ;;  %v2219_v60 = vadd.f32 %v2218_v9, %v2212_v20 }
 0x193   : > { %v2199_v25 = vrot.slane %v2198_v23, 4  ;;  %v2220_v28 = vadd.f32 %v2219_v60, %v2213_v1 }
 0x195   : > { %v2200_v32 = vadd.f32 %v2199_v25, %v2198_v23  ;;  %v2221_v11 = vrot.slane %v2220_v28, 4 }
 0x197   : > { %v2201_v12 = vrot.slane %v2200_v32, 2  ;;  %v2222_v21 = vadd.f32 %v2221_v11, %v2220_v28 }
 0x199   : > { %v2202_v33 = vadd.f32 %v2201_v12, %v2200_v32  ;;  %v2223_v35 = vrot.slane %v2222_v21, 2 }
 0x19b   : > { %v2203_v51 = vrot.slane %v2202_v33, 1  ;;  %v2224_v31 = vadd.f32 %v2223_v35, %v2222_v21 }
 0x19d   : > { %v2204_v57 = vadd.f32 %v2203_v51, %v2202_v33  ;;  %v2225_v2 = vrot.slane %v2224_v31, 1 }
 0x19f   : > { %2205 = vst [vmem:[%s181_s23] sm:$0x1] %v2204_v57  ;;  %v2226_v36 = vadd.f32 %v2225_v2, %v2224_v31 }
 0x1a1   : > { %2227 = vst [vmem:[%s181_s23 + $0x1] sm:$0x1] %v2226_v36 }
 0x1a2 PF: > { %s14_s12 = sadd.s32 1, %s3192_s12  }
 0x1a3   : > { %p11_p4 = scmp.ge.s32.totalorder %s14_s12, 4  }
 0x1a5   :  { %13 = sbr.rel (!%p11_p4) target bundleno = 1 (0x1), region = 80 }

</bundles_post_ra>
